<compile_context>
chip_gen: v7x
topology: tpu7x:2x2x1
jax: 0.10.0
libtpu: 0.0.40
codegen_flags: <defaults>
</compile_context>

<pallas_src>
import functools

import jax
import jax.numpy as jnp
import numpy as np
from jax import lax
from jax.experimental import pallas as pl
from jax.experimental.pallas import tpu as pltpu


# ----------------------------------------------------------------------------
# Fused MARM kernel: one grid step == one batch element, everything in VMEM,
# channel-major layout (channels on sublanes, flattened H*W on lanes).
# ----------------------------------------------------------------------------
def _marm_fused_kernel(x_ref, xout_ref, mask_ref,
                       wb_ref, bb_ref, wg_ref, bg_ref, wca_ref,
                       wt_ref, bt_ref, wf1_ref, bf1_ref, wf2_ref, bf2_ref,
                       out_ref, *, H, W, cac):
    HW = H * W
    PAD = W + 1                       # covers tap offsets in [-(W+1), W+1]
    f32 = jnp.float32
    TAPS = [(dy, dx) for dy in (-1, 0, 1) for dx in (-1, 0, 1)]

    x = x_ref[...].astype(f32)        # (Cin, HW)   lane-dense
    xout = xout_ref[...].astype(f32)  # (cac, HW)
    cin = x.shape[0]

    mask_l = mask_ref[0:1, :]         # (1, HW): 0 where w == 0      (for dx=-1)
    mask_r = mask_ref[1:2, :]         # (1, HW): 0 where w == W - 1  (for dx=+1)

    # --- convb (1x1): VPU broadcast-FMA (K=Cin=4, off the MXU) ---------------
    acc = jnp.zeros((cac, HW), f32)
    for ci in range(cin):
        acc = acc + wb_ref[:, ci:ci + 1] * x[ci:ci + 1, :]
    xo = acc + bb_ref[...]                                   # (cac, HW)

    # --- gated residual branch (xcropiaf/xcropiaff modeled as ones) ----------
    xtc = xout - xo                                          # xoutputtc
    g = jax.nn.sigmoid(
        jnp.sum(wg_ref[...] * xtc, axis=0, keepdims=True) + bg_ref[...])
    right = xtc * (g + 1.0)                                  # xtc*g + xtc

    # --- channel attention: avg+max pool, fc2(fc1(.)) pre-folded to wca ------
    pool_xo = (jnp.mean(xo, axis=1, keepdims=True)
               + jnp.max(xo, axis=1, keepdims=True))         # (cac, 1)
    pool_r = (jnp.mean(right, axis=1, keepdims=True)
              + jnp.max(right, axis=1, keepdims=True))       # (cac, 1)
    ca = jax.nn.sigmoid(
        jnp.sum(wca_ref[:cac, :] * pool_xo, axis=0, keepdims=True)
        + jnp.sum(wca_ref[cac:, :] * pool_r, axis=0, keepdims=True))  # (1, 2cac)

    # Fold the channel-attention scale into the convt weights:
    # convt(outcat * ca) == conv with w[.., ci, ..] * ca[ci].
    ca_cols = jnp.concatenate([ca] * 9, axis=1)              # (1, 9*2cac)
    wt_eff = wt_ref[...] * ca_cols                           # (cac, 9*2cac)

    # --- 3x3 tap helpers: zero-padded flat value + static lane-window slices -
    def padded(a):
        z = jnp.zeros((a.shape[0], PAD), f32)
        return jnp.concatenate([z, a, z], axis=1)            # (C, HW + 2*PAD)

    def tap(apad, dy, dx):
        start = PAD + dy * W + dx
        s = apad[:, start:start + HW]                        # (C, HW)
        if dx < 0:
            s = s * mask_l
        elif dx > 0:
            s = s * mask_r
        return s

    # --- convt: dense 3x3 as 9 shifted VPU broadcast-FMA accumulations -------
    xo_pad = padded(xo)
    r_pad = padded(right)
    acc = jnp.zeros((cac, HW), f32)
    for t, (dy, dx) in enumerate(TAPS):
        xo_t = tap(xo_pad, dy, dx)                           # (cac, HW)
        r_t = tap(r_pad, dy, dx)                             # (cac, HW)
        base = t * 2 * cac
        for ci in range(cac):                                # outcat first half
            acc = acc + wt_eff[:, base + ci:base + ci + 1] * xo_t[ci:ci + 1, :]
        for ci in range(cac):                                # outcat second half
            c = base + cac + ci
            acc = acc + wt_eff[:, c:c + 1] * r_t[ci:ci + 1, :]
    y = jnp.maximum(acc + bt_ref[...], 0.0)                  # Conv_act ReLU

    # --- convf1 / convf2: depthwise 3x3, per-sublane weight columns ----------
    for w_ref, b_ref in ((wf1_ref, bf1_ref), (wf2_ref, bf2_ref)):
        ypad = padded(y)
        acc = jnp.zeros((cac, HW), f32)
        for t, (dy, dx) in enumerate(TAPS):
            acc = acc + w_ref[:, t:t + 1] * tap(ypad, dy, dx)
        y = jnp.maximum(acc + b_ref[...], 0.0)

    out_ref[...] = y.astype(out_ref.dtype)                   # lane-dense (cac, HW)


def marm_fused(x_flat, xout_flat, masks, kp, *, H, W):
    """x_flat: (B, Cin, HW), xout_flat: (B, cac, HW) -> (B, cac, HW)."""
    B, Cin, HW = x_flat.shape
    cac = kp["wb"].shape[0]
    kernel = functools.partial(_marm_fused_kernel, H=H, W=W, cac=cac)

    cost = pl.CostEstimate(
        flops=int(B * HW * (2 * Cin * cac + 6 * cac
                            + 2 * 9 * 2 * cac * cac
                            + 2 * 2 * 9 * cac)),
        transcendentals=int(B * (HW + 2 * cac)),
        bytes_accessed=int(4 * B * HW * (Cin + 2 * cac)),
    )

    return pl.pallas_call(
        kernel,
        grid=(B,),
        in_specs=[
            pl.BlockSpec((None, Cin, HW), lambda i: (i, 0, 0)),     # x
            pl.BlockSpec((None, cac, HW), lambda i: (i, 0, 0)),     # xout
            pl.BlockSpec((2, HW), lambda i: (0, 0)),                # border masks
            pl.BlockSpec((cac, Cin), lambda i: (0, 0)),             # wb
            pl.BlockSpec((cac, 1), lambda i: (0, 0)),               # bb
            pl.BlockSpec((cac, 1), lambda i: (0, 0)),               # wg
            pl.BlockSpec((1, 1), lambda i: (0, 0)),                 # bg
            pl.BlockSpec((2 * cac, 2 * cac), lambda i: (0, 0)),     # wca = w1@w2
            pl.BlockSpec((cac, 9 * 2 * cac), lambda i: (0, 0)),     # wt (folded taps)
            pl.BlockSpec((cac, 1), lambda i: (0, 0)),               # bt
            pl.BlockSpec((cac, 9), lambda i: (0, 0)),               # wf1
            pl.BlockSpec((cac, 1), lambda i: (0, 0)),               # bf1
            pl.BlockSpec((cac, 9), lambda i: (0, 0)),               # wf2
            pl.BlockSpec((cac, 1), lambda i: (0, 0)),               # bf2
        ],
        out_specs=pl.BlockSpec((None, cac, HW), lambda i: (i, 0, 0)),
        out_shape=jax.ShapeDtypeStruct((B, cac, HW), jnp.float32),
        compiler_params=pltpu.CompilerParams(
            dimension_semantics=("parallel",)),
        cost_estimate=cost,
    )(x_flat, xout_flat, masks, kp["wb"], kp["bb"], kp["wg"], kp["bg"],
      kp["wca"], kp["wt"], kp["bt"], kp["wf1"], kp["bf1"], kp["wf2"], kp["bf2"])


# ----------------------------------------------------------------------------
# Full MARM forward (Pallas path) and a pure-JAX reference for verification
# ----------------------------------------------------------------------------
@jax.jit
def marm_forward(x_nchw, xout_nchw, p):
    B, Cin, H, W = x_nchw.shape
    cac = p["wb"].shape[1]
    HW = H * W
    # NCHW-native: only collapse the spatial dims (free), no transposes.
    x_flat = x_nchw.reshape(B, Cin, HW)
    xout_flat = xout_nchw.reshape(B, cac, HW)

    # Row-boundary masks for SAME zero padding in the flattened-HW layout.
    col = jnp.arange(HW, dtype=jnp.int32) % W
    masks = jnp.stack([(col != 0), (col != W - 1)], axis=0).astype(jnp.float32)

    # Kernel-layout parameters (channel-major; fc1/fc2 folded; tiny one-time work).
    kp = {
        "wb": p["wb"].T,                                            # (cac, Cin)
        "bb": p["bb"].T,                                            # (cac, 1)
        "wg": p["wg"],                                              # (cac, 1)
        "bg": p["bg"],                                              # (1, 1)
        "wca": jnp.dot(p["w1"], p["w2"],
                       precision=lax.Precision.HIGHEST),            # (2cac, 2cac)
        "wt": jnp.transpose(p["wt"], (3, 0, 1, 2)).reshape(cac, 9 * 2 * cac),
        "bt": p["bt"].T,                                            # (cac, 1)
        "wf1": p["wf1"].reshape(9, cac).T,                          # (cac, 9)
        "bf1": p["bf1"].T,
        "wf2": p["wf2"].reshape(9, cac).T,
        "bf2": p["bf2"].T,
    }
    y = marm_fused(x_flat, xout_flat, masks, kp, H=H, W=W)          # (B, cac, HW)
    return y.reshape(B, cac, H, W)                                  # free reshape


def reference_forward(x_nchw, xout_nchw, p):
    hp = lax.Precision.HIGHEST
    x = jnp.transpose(x_nchw, (0, 2, 3, 1))
    xout = jnp.transpose(xout_nchw, (0, 2, 3, 1))
    xo = jnp.einsum("bhwc,cd->bhwd", x, p["wb"], precision=hp) + p["bb"][0]
    xtc = xout - xo
    g = jax.nn.sigmoid(jnp.einsum("bhwc,cd->bhwd", xtc, p["wg"], precision=hp)
                       + p["bg"][0])
    outcat = jnp.concatenate([xo, xtc * g + xtc], axis=-1)
    avg = jnp.mean(outcat, axis=(1, 2))
    mx = jnp.max(outcat, axis=(1, 2))

    def mlp(v):
        return jnp.dot(jnp.dot(v, p["w1"], precision=hp), p["w2"], precision=hp)

    ca = jax.nn.sigmoid(mlp(avg) + mlp(mx))
    scaled = outcat * ca[:, None, None, :]
    dn = ("NHWC", "HWIO", "NHWC")
    y = lax.conv_general_dilated(scaled, p["wt"], (1, 1), "SAME",
                                 dimension_numbers=dn, precision=hp) + p["bt"][0]
    y = jnp.maximum(y, 0.0)
    for wn, bn in (("wf1", "bf1"), ("wf2", "bf2")):
        wdw = p[wn].reshape(3, 3, 1, -1)
        y = lax.conv_general_dilated(y, wdw, (1, 1), "SAME",
                                     dimension_numbers=dn,
                                     feature_group_count=y.shape[-1],
                                     precision=hp) + p[bn][0]
        y = jnp.maximum(y, 0.0)
    return jnp.transpose(y, (0, 3, 1, 2))


def init_params(key, Channel, cac):
    ks = jax.random.split(key, 12)
    s = 0.2
    return {
        # convb: 1x1, Channel -> cac, bias
        "wb": s * jax.random.normal(ks[0], (Channel, cac), jnp.float32),
        "bb": s * jax.random.normal(ks[1], (1, cac), jnp.float32),
        # convg1: 1x1, cac -> 1, bias
        "wg": s * jax.random.normal(ks[2], (cac, 1), jnp.float32),
        "bg": s * jax.random.normal(ks[3], (1, 1), jnp.float32),
        # fc1 / fc2: 1x1, no bias
        "w1": s * jax.random.normal(ks[4], (2 * cac, 8), jnp.float32),
        "w2": s * jax.random.normal(ks[5], (8, 2 * cac), jnp.float32),
        # convt: 3x3 dense, 2*cac -> cac, bias (HWIO)
        "wt": s * jax.random.normal(ks[6], (3, 3, 2 * cac, cac), jnp.float32),
        "bt": s * jax.random.normal(ks[7], (1, cac), jnp.float32),
        # convf1 / convf2: 3x3 depthwise (groups = cac), bias
        "wf1": s * jax.random.normal(ks[8], (3, 3, cac), jnp.float32),
        "bf1": s * jax.random.normal(ks[9], (1, cac), jnp.float32),
        "wf2": s * jax.random.normal(ks[10], (3, 3, cac), jnp.float32),
        "bf2": s * jax.random.normal(ks[11], (1, cac), jnp.float32),
    }


if __name__ == "__main__":
    B, Channel, cac, H, W = 2, 4, 4, 16, 16
    key = jax.random.PRNGKey(0)
    kx, kxo, kprm = jax.random.split(key, 3)

    # PyTorch-convention NCHW inputs.
    x = jax.random.normal(kx, (B, Channel, H, W), jnp.float32)
    xoutput = jax.random.normal(kxo, (B, cac, H, W), jnp.float32)
    params = init_params(kprm, Channel, cac)

    out = jax.block_until_ready(marm_forward(x, xoutput, params))

    ref = reference_forward(x, xoutput, params)
    np.testing.assert_allclose(np.asarray(out), np.asarray(ref),
                               rtol=2e-3, atol=2e-3)
    print("KERNEL_OK")
</pallas_src>

<mosaic_0001>
module attributes {stable_mosaic.version = 11 : i64} {
  func.func @_marm_fused_kernel(%arg0: i32, %arg1: memref<1x4x256xf32, #tpu.memory_space<vmem>>, %arg2: memref<1x4x256xf32, #tpu.memory_space<vmem>>, %arg3: memref<2x256xf32, #tpu.memory_space<vmem>>, %arg4: memref<4x4xf32, #tpu.memory_space<vmem>>, %arg5: memref<4x1xf32, #tpu.memory_space<vmem>>, %arg6: memref<4x1xf32, #tpu.memory_space<vmem>>, %arg7: memref<1x1xf32, #tpu.memory_space<vmem>>, %arg8: memref<8x8xf32, #tpu.memory_space<vmem>>, %arg9: memref<4x72xf32, #tpu.memory_space<vmem>>, %arg10: memref<4x1xf32, #tpu.memory_space<vmem>>, %arg11: memref<4x9xf32, #tpu.memory_space<vmem>>, %arg12: memref<4x1xf32, #tpu.memory_space<vmem>>, %arg13: memref<4x9xf32, #tpu.memory_space<vmem>>, %arg14: memref<4x1xf32, #tpu.memory_space<vmem>>, %arg15: memref<1x4x256xf32, #tpu.memory_space<vmem>>) attributes {dimension_semantics = [#tpu.dimension_semantics<parallel>], iteration_bounds = array<i64: 2>, scalar_prefetch = 0 : i64, scratch_operands = 0 : i64, tpu.core_type = #tpu.core_type<tc>, window_params = [{transform_indices = @transform_0, window_bounds = array<i64: 1, 4, 256>}, {transform_indices = @transform_1, window_bounds = array<i64: 1, 4, 256>}, {pipeline_mode = #tpu.pipeline_mode<synchronous>, transform_indices = @transform_2, window_bounds = array<i64: 2, 256>}, {pipeline_mode = #tpu.pipeline_mode<synchronous>, transform_indices = @transform_3, window_bounds = array<i64: 4, 4>}, {pipeline_mode = #tpu.pipeline_mode<synchronous>, transform_indices = @transform_4, window_bounds = array<i64: 4, 1>}, {pipeline_mode = #tpu.pipeline_mode<synchronous>, transform_indices = @transform_5, window_bounds = array<i64: 4, 1>}, {pipeline_mode = #tpu.pipeline_mode<synchronous>, transform_indices = @transform_6, window_bounds = array<i64: 1, 1>}, {pipeline_mode = #tpu.pipeline_mode<synchronous>, transform_indices = @transform_7, window_bounds = array<i64: 8, 8>}, {pipeline_mode = #tpu.pipeline_mode<synchronous>, transform_indices = @transform_8, window_bounds = array<i64: 4, 72>}, {pipeline_mode = #tpu.pipeline_mode<synchronous>, transform_indices = @transform_9, window_bounds = array<i64: 4, 1>}, {pipeline_mode = #tpu.pipeline_mode<synchronous>, transform_indices = @transform_10, window_bounds = array<i64: 4, 9>}, {pipeline_mode = #tpu.pipeline_mode<synchronous>, transform_indices = @transform_11, window_bounds = array<i64: 4, 1>}, {pipeline_mode = #tpu.pipeline_mode<synchronous>, transform_indices = @transform_12, window_bounds = array<i64: 4, 9>}, {pipeline_mode = #tpu.pipeline_mode<synchronous>, transform_indices = @transform_13, window_bounds = array<i64: 4, 1>}, {transform_indices = @transform_14, window_bounds = array<i64: 1, 4, 256>}]} {
    %c0 = arith.constant 0 : index
    %c0_0 = arith.constant 0 : index
    %c0_1 = arith.constant 0 : index
    %0 = vector.load %arg1[%c0, %c0_0, %c0_1] : memref<1x4x256xf32, #tpu.memory_space<vmem>>, vector<1x4x256xf32>
    %1 = vector.shape_cast %0 : vector<1x4x256xf32> to vector<4x256xf32>
    %c0_2 = arith.constant 0 : index
    %c0_3 = arith.constant 0 : index
    %c0_4 = arith.constant 0 : index
    %2 = vector.load %arg2[%c0_2, %c0_3, %c0_4] : memref<1x4x256xf32, #tpu.memory_space<vmem>>, vector<1x4x256xf32>
    %3 = vector.shape_cast %2 : vector<1x4x256xf32> to vector<4x256xf32>
    %c0_5 = arith.constant 0 : index
    %c0_6 = arith.constant 0 : index
    %4 = vector.load %arg3[%c0_5, %c0_6] : memref<2x256xf32, #tpu.memory_space<vmem>>, vector<1x256xf32>
    %c1 = arith.constant 1 : index
    %c0_7 = arith.constant 0 : index
    %5 = vector.load %arg3[%c1, %c0_7] : memref<2x256xf32, #tpu.memory_space<vmem>>, vector<1x256xf32>
    %cst = arith.constant 0.000000e+00 : f32
    %6 = vector.broadcast %cst : f32 to vector<4x256xf32>
    %c0_8 = arith.constant 0 : index
    %c0_9 = arith.constant 0 : index
    %7 = vector.load %arg4[%c0_8, %c0_9] : memref<4x4xf32, #tpu.memory_space<vmem>>, vector<4x1xf32>
    %8 = vector.extract_strided_slice %1 {offsets = [0, 0], sizes = [1, 256], strides = [1, 1]} : vector<4x256xf32> to vector<1x256xf32>
    %9 = vector.broadcast %7 : vector<4x1xf32> to vector<4x256xf32>
    %10 = vector.broadcast %8 : vector<1x256xf32> to vector<4x256xf32>
    %11 = arith.mulf %9, %10 : vector<4x256xf32>
    %12 = arith.addf %6, %11 : vector<4x256xf32>
    %c0_10 = arith.constant 0 : index
    %c1_11 = arith.constant 1 : index
    %13 = vector.load %arg4[%c0_10, %c1_11] : memref<4x4xf32, #tpu.memory_space<vmem>>, vector<4x1xf32>
    %14 = vector.extract_strided_slice %1 {offsets = [1, 0], sizes = [1, 256], strides = [1, 1]} : vector<4x256xf32> to vector<1x256xf32>
    %15 = vector.broadcast %13 : vector<4x1xf32> to vector<4x256xf32>
    %16 = vector.broadcast %14 : vector<1x256xf32> to vector<4x256xf32>
    %17 = arith.mulf %15, %16 : vector<4x256xf32>
    %18 = arith.addf %12, %17 : vector<4x256xf32>
    %c0_12 = arith.constant 0 : index
    %c2 = arith.constant 2 : index
    %19 = vector.load %arg4[%c0_12, %c2] : memref<4x4xf32, #tpu.memory_space<vmem>>, vector<4x1xf32>
    %20 = vector.extract_strided_slice %1 {offsets = [2, 0], sizes = [1, 256], strides = [1, 1]} : vector<4x256xf32> to vector<1x256xf32>
    %21 = vector.broadcast %19 : vector<4x1xf32> to vector<4x256xf32>
    %22 = vector.broadcast %20 : vector<1x256xf32> to vector<4x256xf32>
    %23 = arith.mulf %21, %22 : vector<4x256xf32>
    %24 = arith.addf %18, %23 : vector<4x256xf32>
    %c0_13 = arith.constant 0 : index
    %c3 = arith.constant 3 : index
    %25 = vector.load %arg4[%c0_13, %c3] : memref<4x4xf32, #tpu.memory_space<vmem>>, vector<4x1xf32>
    %26 = vector.extract_strided_slice %1 {offsets = [3, 0], sizes = [1, 256], strides = [1, 1]} : vector<4x256xf32> to vector<1x256xf32>
    %27 = vector.broadcast %25 : vector<4x1xf32> to vector<4x256xf32>
    %28 = vector.broadcast %26 : vector<1x256xf32> to vector<4x256xf32>
    %29 = arith.mulf %27, %28 : vector<4x256xf32>
    %30 = arith.addf %24, %29 : vector<4x256xf32>
    %c0_14 = arith.constant 0 : index
    %c0_15 = arith.constant 0 : index
    %31 = vector.load %arg5[%c0_14, %c0_15] : memref<4x1xf32, #tpu.memory_space<vmem>>, vector<4x1xf32>
    %32 = vector.broadcast %31 : vector<4x1xf32> to vector<4x256xf32>
    %33 = arith.addf %30, %32 : vector<4x256xf32>
    %34 = arith.subf %3, %33 : vector<4x256xf32>
    %c0_16 = arith.constant 0 : index
    %c0_17 = arith.constant 0 : index
    %35 = vector.load %arg6[%c0_16, %c0_17] : memref<4x1xf32, #tpu.memory_space<vmem>>, vector<4x1xf32>
    %36 = vector.broadcast %35 : vector<4x1xf32> to vector<4x256xf32>
    %37 = arith.mulf %36, %34 : vector<4x256xf32>
    %cst_18 = arith.constant dense<0.000000e+00> : vector<256xf32>
    %38 = vector.multi_reduction <add>, %37, %cst_18 [0] : vector<4x256xf32> to vector<256xf32>
    %39 = vector.shape_cast %38 : vector<256xf32> to vector<1x256xf32>
    %c0_19 = arith.constant 0 : index
    %c0_20 = arith.constant 0 : index
    %40 = vector.load %arg7[%c0_19, %c0_20] : memref<1x1xf32, #tpu.memory_space<vmem>>, vector<1x1xf32>
    %41 = vector.broadcast %40 : vector<1x1xf32> to vector<1x256xf32>
    %42 = arith.addf %39, %41 : vector<1x256xf32>
    %43 = arith.negf %42 : vector<1x256xf32>
    %44 = math.exp %43 : vector<1x256xf32>
    %cst_21 = arith.constant 1.000000e+00 : f32
    %45 = vector.broadcast %cst_21 : f32 to vector<1x256xf32>
    %46 = arith.addf %45, %44 : vector<1x256xf32>
    %47 = arith.divf %45, %46 : vector<1x256xf32>
    %cst_22 = arith.constant 1.000000e+00 : f32
    %48 = vector.broadcast %cst_22 : f32 to vector<1x256xf32>
    %49 = arith.addf %47, %48 : vector<1x256xf32>
    %50 = vector.broadcast %49 : vector<1x256xf32> to vector<4x256xf32>
    %51 = arith.mulf %34, %50 : vector<4x256xf32>
    %cst_23 = arith.constant dense<0.000000e+00> : vector<4xf32>
    %52 = vector.multi_reduction <add>, %33, %cst_23 [1] : vector<4x256xf32> to vector<4xf32>
    %53 = vector.shape_cast %52 : vector<4xf32> to vector<4x1xf32>
    %cst_24 = arith.constant 2.560000e+02 : f32
    %54 = vector.broadcast %cst_24 : f32 to vector<4x1xf32>
    %55 = arith.divf %53, %54 : vector<4x1xf32>
    %cst_25 = arith.constant dense<0xFF800000> : vector<4xf32>
    %56 = vector.multi_reduction <maximumf>, %33, %cst_25 [1] : vector<4x256xf32> to vector<4xf32>
    %57 = vector.shape_cast %56 : vector<4xf32> to vector<4x1xf32>
    %58 = arith.addf %55, %57 : vector<4x1xf32>
    %cst_26 = arith.constant dense<0.000000e+00> : vector<4xf32>
    %59 = vector.multi_reduction <add>, %51, %cst_26 [1] : vector<4x256xf32> to vector<4xf32>
    %60 = vector.shape_cast %59 : vector<4xf32> to vector<4x1xf32>
    %cst_27 = arith.constant 2.560000e+02 : f32
    %61 = vector.broadcast %cst_27 : f32 to vector<4x1xf32>
    %62 = arith.divf %60, %61 : vector<4x1xf32>
    %cst_28 = arith.constant dense<0xFF800000> : vector<4xf32>
    %63 = vector.multi_reduction <maximumf>, %51, %cst_28 [1] : vector<4x256xf32> to vector<4xf32>
    %64 = vector.shape_cast %63 : vector<4xf32> to vector<4x1xf32>
    %65 = arith.addf %62, %64 : vector<4x1xf32>
    %c0_29 = arith.constant 0 : index
    %c0_30 = arith.constant 0 : index
    %66 = vector.load %arg8[%c0_29, %c0_30] : memref<8x8xf32, #tpu.memory_space<vmem>>, vector<4x8xf32>
    %67 = vector.broadcast %58 : vector<4x1xf32> to vector<4x8xf32>
    %68 = arith.mulf %66, %67 : vector<4x8xf32>
    %cst_31 = arith.constant dense<0.000000e+00> : vector<8xf32>
    %69 = vector.multi_reduction <add>, %68, %cst_31 [0] : vector<4x8xf32> to vector<8xf32>
    %70 = vector.shape_cast %69 : vector<8xf32> to vector<1x8xf32>
    %c4 = arith.constant 4 : index
    %c0_32 = arith.constant 0 : index
    %71 = vector.load %arg8[%c4, %c0_32] : memref<8x8xf32, #tpu.memory_space<vmem>>, vector<4x8xf32>
    %72 = vector.broadcast %65 : vector<4x1xf32> to vector<4x8xf32>
    %73 = arith.mulf %71, %72 : vector<4x8xf32>
    %cst_33 = arith.constant dense<0.000000e+00> : vector<8xf32>
    %74 = vector.multi_reduction <add>, %73, %cst_33 [0] : vector<4x8xf32> to vector<8xf32>
    %75 = vector.shape_cast %74 : vector<8xf32> to vector<1x8xf32>
    %76 = arith.addf %70, %75 : vector<1x8xf32>
    %77 = arith.negf %76 : vector<1x8xf32>
    %78 = math.exp %77 : vector<1x8xf32>
    %cst_34 = arith.constant 1.000000e+00 : f32
    %79 = vector.broadcast %cst_34 : f32 to vector<1x8xf32>
    %80 = arith.addf %79, %78 : vector<1x8xf32>
    %81 = arith.divf %79, %80 : vector<1x8xf32>
    %82 = tpu.concatenate %81, %81, %81, %81, %81, %81, %81, %81, %81 in 1 : vector<1x8xf32>, vector<1x8xf32>, vector<1x8xf32>, vector<1x8xf32>, vector<1x8xf32>, vector<1x8xf32>, vector<1x8xf32>, vector<1x8xf32>, vector<1x8xf32> -> vector<1x72xf32>
    %c0_35 = arith.constant 0 : index
    %c0_36 = arith.constant 0 : index
    %83 = vector.load %arg9[%c0_35, %c0_36] : memref<4x72xf32, #tpu.memory_space<vmem>>, vector<4x72xf32>
    %84 = vector.broadcast %82 : vector<1x72xf32> to vector<4x72xf32>
    %85 = arith.mulf %83, %84 : vector<4x72xf32>
    %cst_37 = arith.constant 0.000000e+00 : f32
    %86 = vector.broadcast %cst_37 : f32 to vector<4x17xf32>
    %87 = tpu.concatenate %86, %33, %86 in 1 : vector<4x17xf32>, vector<4x256xf32>, vector<4x17xf32> -> vector<4x290xf32>
    %cst_38 = arith.constant 0.000000e+00 : f32
    %88 = vector.broadcast %cst_38 : f32 to vector<4x17xf32>
    %89 = tpu.concatenate %88, %51, %88 in 1 : vector<4x17xf32>, vector<4x256xf32>, vector<4x17xf32> -> vector<4x290xf32>
    %cst_39 = arith.constant 0.000000e+00 : f32
    %90 = vector.broadcast %cst_39 : f32 to vector<4x256xf32>
    %91 = vector.extract_strided_slice %87 {offsets = [0, 0], sizes = [4, 256], strides = [1, 1]} : vector<4x290xf32> to vector<4x256xf32>
    %92 = vector.broadcast %4 : vector<1x256xf32> to vector<4x256xf32>
    %93 = arith.mulf %91, %92 : vector<4x256xf32>
    %94 = vector.extract_strided_slice %89 {offsets = [0, 0], sizes = [4, 256], strides = [1, 1]} : vector<4x290xf32> to vector<4x256xf32>
    %95 = vector.broadcast %4 : vector<1x256xf32> to vector<4x256xf32>
    %96 = arith.mulf %94, %95 : vector<4x256xf32>
    %97 = vector.extract_strided_slice %85 {offsets = [0, 0], sizes = [4, 1], strides = [1, 1]} : vector<4x72xf32> to vector<4x1xf32>
    %98 = vector.extract_strided_slice %93 {offsets = [0, 0], sizes = [1, 256], strides = [1, 1]} : vector<4x256xf32> to vector<1x256xf32>
    %99 = vector.broadcast %97 : vector<4x1xf32> to vector<4x256xf32>
    %100 = vector.broadcast %98 : vector<1x256xf32> to vector<4x256xf32>
    %101 = arith.mulf %99, %100 : vector<4x256xf32>
    %102 = arith.addf %90, %101 : vector<4x256xf32>
    %103 = vector.extract_strided_slice %85 {offsets = [0, 1], sizes = [4, 1], strides = [1, 1]} : vector<4x72xf32> to vector<4x1xf32>
    %104 = vector.extract_strided_slice %93 {offsets = [1, 0], sizes = [1, 256], strides = [1, 1]} : vector<4x256xf32> to vector<1x256xf32>
    %105 = vector.broadcast %103 : vector<4x1xf32> to vector<4x256xf32>
    %106 = vector.broadcast %104 : vector<1x256xf32> to vector<4x256xf32>
    %107 = arith.mulf %105, %106 : vector<4x256xf32>
    %108 = arith.addf %102, %107 : vector<4x256xf32>
    %109 = vector.extract_strided_slice %85 {offsets = [0, 2], sizes = [4, 1], strides = [1, 1]} : vector<4x72xf32> to vector<4x1xf32>
    %110 = vector.extract_strided_slice %93 {offsets = [2, 0], sizes = [1, 256], strides = [1, 1]} : vector<4x256xf32> to vector<1x256xf32>
    %111 = vector.broadcast %109 : vector<4x1xf32> to vector<4x256xf32>
    %112 = vector.broadcast %110 : vector<1x256xf32> to vector<4x256xf32>
    %113 = arith.mulf %111, %112 : vector<4x256xf32>
    %114 = arith.addf %108, %113 : vector<4x256xf32>
    %115 = vector.extract_strided_slice %85 {offsets = [0, 3], sizes = [4, 1], strides = [1, 1]} : vector<4x72xf32> to vector<4x1xf32>
    %116 = vector.extract_strided_slice %93 {offsets = [3, 0], sizes = [1, 256], strides = [1, 1]} : vector<4x256xf32> to vector<1x256xf32>
    %117 = vector.broadcast %115 : vector<4x1xf32> to vector<4x256xf32>
    %118 = vector.broadcast %116 : vector<1x256xf32> to vector<4x256xf32>
    %119 = arith.mulf %117, %118 : vector<4x256xf32>
    %120 = arith.addf %114, %119 : vector<4x256xf32>
    %121 = vector.extract_strided_slice %85 {offsets = [0, 4], sizes = [4, 1], strides = [1, 1]} : vector<4x72xf32> to vector<4x1xf32>
    %122 = vector.extract_strided_slice %96 {offsets = [0, 0], sizes = [1, 256], strides = [1, 1]} : vector<4x256xf32> to vector<1x256xf32>
    %123 = vector.broadcast %121 : vector<4x1xf32> to vector<4x256xf32>
    %124 = vector.broadcast %122 : vector<1x256xf32> to vector<4x256xf32>
    %125 = arith.mulf %123, %124 : vector<4x256xf32>
    %126 = arith.addf %120, %125 : vector<4x256xf32>
    %127 = vector.extract_strided_slice %85 {offsets = [0, 5], sizes = [4, 1], strides = [1, 1]} : vector<4x72xf32> to vector<4x1xf32>
    %128 = vector.extract_strided_slice %96 {offsets = [1, 0], sizes = [1, 256], strides = [1, 1]} : vector<4x256xf32> to vector<1x256xf32>
    %129 = vector.broadcast %127 : vector<4x1xf32> to vector<4x256xf32>
    %130 = vector.broadcast %128 : vector<1x256xf32> to vector<4x256xf32>
    %131 = arith.mulf %129, %130 : vector<4x256xf32>
    %132 = arith.addf %126, %131 : vector<4x256xf32>
    %133 = vector.extract_strided_slice %85 {offsets = [0, 6], sizes = [4, 1], strides = [1, 1]} : vector<4x72xf32> to vector<4x1xf32>
    %134 = vector.extract_strided_slice %96 {offsets = [2, 0], sizes = [1, 256], strides = [1, 1]} : vector<4x256xf32> to vector<1x256xf32>
    %135 = vector.broadcast %133 : vector<4x1xf32> to vector<4x256xf32>
    %136 = vector.broadcast %134 : vector<1x256xf32> to vector<4x256xf32>
    %137 = arith.mulf %135, %136 : vector<4x256xf32>
    %138 = arith.addf %132, %137 : vector<4x256xf32>
    %139 = vector.extract_strided_slice %85 {offsets = [0, 7], sizes = [4, 1], strides = [1, 1]} : vector<4x72xf32> to vector<4x1xf32>
    %140 = vector.extract_strided_slice %96 {offsets = [3, 0], sizes = [1, 256], strides = [1, 1]} : vector<4x256xf32> to vector<1x256xf32>
    %141 = vector.broadcast %139 : vector<4x1xf32> to vector<4x256xf32>
    %142 = vector.broadcast %140 : vector<1x256xf32> to vector<4x256xf32>
    %143 = arith.mulf %141, %142 : vector<4x256xf32>
    %144 = arith.addf %138, %143 : vector<4x256xf32>
    %145 = vector.extract_strided_slice %87 {offsets = [0, 1], sizes = [4, 256], strides = [1, 1]} : vector<4x290xf32> to vector<4x256xf32>
    %146 = vector.extract_strided_slice %89 {offsets = [0, 1], sizes = [4, 256], strides = [1, 1]} : vector<4x290xf32> to vector<4x256xf32>
    %147 = vector.extract_strided_slice %85 {offsets = [0, 8], sizes = [4, 1], strides = [1, 1]} : vector<4x72xf32> to vector<4x1xf32>
    %148 = vector.extract_strided_slice %145 {offsets = [0, 0], sizes = [1, 256], strides = [1, 1]} : vector<4x256xf32> to vector<1x256xf32>
    %149 = vector.broadcast %147 : vector<4x1xf32> to vector<4x256xf32>
    %150 = vector.broadcast %148 : vector<1x256xf32> to vector<4x256xf32>
    %151 = arith.mulf %149, %150 : vector<4x256xf32>
    %152 = arith.addf %144, %151 : vector<4x256xf32>
    %153 = vector.extract_strided_slice %85 {offsets = [0, 9], sizes = [4, 1], strides = [1, 1]} : vector<4x72xf32> to vector<4x1xf32>
    %154 = vector.extract_strided_slice %145 {offsets = [1, 0], sizes = [1, 256], strides = [1, 1]} : vector<4x256xf32> to vector<1x256xf32>
    %155 = vector.broadcast %153 : vector<4x1xf32> to vector<4x256xf32>
    %156 = vector.broadcast %154 : vector<1x256xf32> to vector<4x256xf32>
    %157 = arith.mulf %155, %156 : vector<4x256xf32>
    %158 = arith.addf %152, %157 : vector<4x256xf32>
    %159 = vector.extract_strided_slice %85 {offsets = [0, 10], sizes = [4, 1], strides = [1, 1]} : vector<4x72xf32> to vector<4x1xf32>
    %160 = vector.extract_strided_slice %145 {offsets = [2, 0], sizes = [1, 256], strides = [1, 1]} : vector<4x256xf32> to vector<1x256xf32>
    %161 = vector.broadcast %159 : vector<4x1xf32> to vector<4x256xf32>
    %162 = vector.broadcast %160 : vector<1x256xf32> to vector<4x256xf32>
    %163 = arith.mulf %161, %162 : vector<4x256xf32>
    %164 = arith.addf %158, %163 : vector<4x256xf32>
    %165 = vector.extract_strided_slice %85 {offsets = [0, 11], sizes = [4, 1], strides = [1, 1]} : vector<4x72xf32> to vector<4x1xf32>
    %166 = vector.extract_strided_slice %145 {offsets = [3, 0], sizes = [1, 256], strides = [1, 1]} : vector<4x256xf32> to vector<1x256xf32>
    %167 = vector.broadcast %165 : vector<4x1xf32> to vector<4x256xf32>
    %168 = vector.broadcast %166 : vector<1x256xf32> to vector<4x256xf32>
    %169 = arith.mulf %167, %168 : vector<4x256xf32>
    %170 = arith.addf %164, %169 : vector<4x256xf32>
    %171 = vector.extract_strided_slice %85 {offsets = [0, 12], sizes = [4, 1], strides = [1, 1]} : vector<4x72xf32> to vector<4x1xf32>
    %172 = vector.extract_strided_slice %146 {offsets = [0, 0], sizes = [1, 256], strides = [1, 1]} : vector<4x256xf32> to vector<1x256xf32>
    %173 = vector.broadcast %171 : vector<4x1xf32> to vector<4x256xf32>
    %174 = vector.broadcast %172 : vector<1x256xf32> to vector<4x256xf32>
    %175 = arith.mulf %173, %174 : vector<4x256xf32>
    %176 = arith.addf %170, %175 : vector<4x256xf32>
    %177 = vector.extract_strided_slice %85 {offsets = [0, 13], sizes = [4, 1], strides = [1, 1]} : vector<4x72xf32> to vector<4x1xf32>
    %178 = vector.extract_strided_slice %146 {offsets = [1, 0], sizes = [1, 256], strides = [1, 1]} : vector<4x256xf32> to vector<1x256xf32>
    %179 = vector.broadcast %177 : vector<4x1xf32> to vector<4x256xf32>
    %180 = vector.broadcast %178 : vector<1x256xf32> to vector<4x256xf32>
    %181 = arith.mulf %179, %180 : vector<4x256xf32>
    %182 = arith.addf %176, %181 : vector<4x256xf32>
    %183 = vector.extract_strided_slice %85 {offsets = [0, 14], sizes = [4, 1], strides = [1, 1]} : vector<4x72xf32> to vector<4x1xf32>
    %184 = vector.extract_strided_slice %146 {offsets = [2, 0], sizes = [1, 256], strides = [1, 1]} : vector<4x256xf32> to vector<1x256xf32>
    %185 = vector.broadcast %183 : vector<4x1xf32> to vector<4x256xf32>
    %186 = vector.broadcast %184 : vector<1x256xf32> to vector<4x256xf32>
    %187 = arith.mulf %185, %186 : vector<4x256xf32>
    %188 = arith.addf %182, %187 : vector<4x256xf32>
    %189 = vector.extract_strided_slice %85 {offsets = [0, 15], sizes = [4, 1], strides = [1, 1]} : vector<4x72xf32> to vector<4x1xf32>
    %190 = vector.extract_strided_slice %146 {offsets = [3, 0], sizes = [1, 256], strides = [1, 1]} : vector<4x256xf32> to vector<1x256xf32>
    %191 = vector.broadcast %189 : vector<4x1xf32> to vector<4x256xf32>
    %192 = vector.broadcast %190 : vector<1x256xf32> to vector<4x256xf32>
    %193 = arith.mulf %191, %192 : vector<4x256xf32>
    %194 = arith.addf %188, %193 : vector<4x256xf32>
    %195 = vector.extract_strided_slice %87 {offsets = [0, 2], sizes = [4, 256], strides = [1, 1]} : vector<4x290xf32> to vector<4x256xf32>
    %196 = vector.broadcast %5 : vector<1x256xf32> to vector<4x256xf32>
    %197 = arith.mulf %195, %196 : vector<4x256xf32>
    %198 = vector.extract_strided_slice %89 {offsets = [0, 2], sizes = [4, 256], strides = [1, 1]} : vector<4x290xf32> to vector<4x256xf32>
    %199 = vector.broadcast %5 : vector<1x256xf32> to vector<4x256xf32>
    %200 = arith.mulf %198, %199 : vector<4x256xf32>
    %201 = vector.extract_strided_slice %85 {offsets = [0, 16], sizes = [4, 1], strides = [1, 1]} : vector<4x72xf32> to vector<4x1xf32>
    %202 = vector.extract_strided_slice %197 {offsets = [0, 0], sizes = [1, 256], strides = [1, 1]} : vector<4x256xf32> to vector<1x256xf32>
    %203 = vector.broadcast %201 : vector<4x1xf32> to vector<4x256xf32>
    %204 = vector.broadcast %202 : vector<1x256xf32> to vector<4x256xf32>
    %205 = arith.mulf %203, %204 : vector<4x256xf32>
    %206 = arith.addf %194, %205 : vector<4x256xf32>
    %207 = vector.extract_strided_slice %85 {offsets = [0, 17], sizes = [4, 1], strides = [1, 1]} : vector<4x72xf32> to vector<4x1xf32>
    %208 = vector.extract_strided_slice %197 {offsets = [1, 0], sizes = [1, 256], strides = [1, 1]} : vector<4x256xf32> to vector<1x256xf32>
    %209 = vector.broadcast %207 : vector<4x1xf32> to vector<4x256xf32>
    %210 = vector.broadcast %208 : vector<1x256xf32> to vector<4x256xf32>
    %211 = arith.mulf %209, %210 : vector<4x256xf32>
    %212 = arith.addf %206, %211 : vector<4x256xf32>
    %213 = vector.extract_strided_slice %85 {offsets = [0, 18], sizes = [4, 1], strides = [1, 1]} : vector<4x72xf32> to vector<4x1xf32>
    %214 = vector.extract_strided_slice %197 {offsets = [2, 0], sizes = [1, 256], strides = [1, 1]} : vector<4x256xf32> to vector<1x256xf32>
    %215 = vector.broadcast %213 : vector<4x1xf32> to vector<4x256xf32>
    %216 = vector.broadcast %214 : vector<1x256xf32> to vector<4x256xf32>
    %217 = arith.mulf %215, %216 : vector<4x256xf32>
    %218 = arith.addf %212, %217 : vector<4x256xf32>
    %219 = vector.extract_strided_slice %85 {offsets = [0, 19], sizes = [4, 1], strides = [1, 1]} : vector<4x72xf32> to vector<4x1xf32>
    %220 = vector.extract_strided_slice %197 {offsets = [3, 0], sizes = [1, 256], strides = [1, 1]} : vector<4x256xf32> to vector<1x256xf32>
    %221 = vector.broadcast %219 : vector<4x1xf32> to vector<4x256xf32>
    %222 = vector.broadcast %220 : vector<1x256xf32> to vector<4x256xf32>
    %223 = arith.mulf %221, %222 : vector<4x256xf32>
    %224 = arith.addf %218, %223 : vector<4x256xf32>
    %225 = vector.extract_strided_slice %85 {offsets = [0, 20], sizes = [4, 1], strides = [1, 1]} : vector<4x72xf32> to vector<4x1xf32>
    %226 = vector.extract_strided_slice %200 {offsets = [0, 0], sizes = [1, 256], strides = [1, 1]} : vector<4x256xf32> to vector<1x256xf32>
    %227 = vector.broadcast %225 : vector<4x1xf32> to vector<4x256xf32>
    %228 = vector.broadcast %226 : vector<1x256xf32> to vector<4x256xf32>
    %229 = arith.mulf %227, %228 : vector<4x256xf32>
    %230 = arith.addf %224, %229 : vector<4x256xf32>
    %231 = vector.extract_strided_slice %85 {offsets = [0, 21], sizes = [4, 1], strides = [1, 1]} : vector<4x72xf32> to vector<4x1xf32>
    %232 = vector.extract_strided_slice %200 {offsets = [1, 0], sizes = [1, 256], strides = [1, 1]} : vector<4x256xf32> to vector<1x256xf32>
    %233 = vector.broadcast %231 : vector<4x1xf32> to vector<4x256xf32>
    %234 = vector.broadcast %232 : vector<1x256xf32> to vector<4x256xf32>
    %235 = arith.mulf %233, %234 : vector<4x256xf32>
    %236 = arith.addf %230, %235 : vector<4x256xf32>
    %237 = vector.extract_strided_slice %85 {offsets = [0, 22], sizes = [4, 1], strides = [1, 1]} : vector<4x72xf32> to vector<4x1xf32>
    %238 = vector.extract_strided_slice %200 {offsets = [2, 0], sizes = [1, 256], strides = [1, 1]} : vector<4x256xf32> to vector<1x256xf32>
    %239 = vector.broadcast %237 : vector<4x1xf32> to vector<4x256xf32>
    %240 = vector.broadcast %238 : vector<1x256xf32> to vector<4x256xf32>
    %241 = arith.mulf %239, %240 : vector<4x256xf32>
    %242 = arith.addf %236, %241 : vector<4x256xf32>
    %243 = vector.extract_strided_slice %85 {offsets = [0, 23], sizes = [4, 1], strides = [1, 1]} : vector<4x72xf32> to vector<4x1xf32>
    %244 = vector.extract_strided_slice %200 {offsets = [3, 0], sizes = [1, 256], strides = [1, 1]} : vector<4x256xf32> to vector<1x256xf32>
    %245 = vector.broadcast %243 : vector<4x1xf32> to vector<4x256xf32>
    %246 = vector.broadcast %244 : vector<1x256xf32> to vector<4x256xf32>
    %247 = arith.mulf %245, %246 : vector<4x256xf32>
    %248 = arith.addf %242, %247 : vector<4x256xf32>
    %249 = vector.extract_strided_slice %87 {offsets = [0, 16], sizes = [4, 256], strides = [1, 1]} : vector<4x290xf32> to vector<4x256xf32>
    %250 = vector.broadcast %4 : vector<1x256xf32> to vector<4x256xf32>
    %251 = arith.mulf %249, %250 : vector<4x256xf32>
    %252 = vector.extract_strided_slice %89 {offsets = [0, 16], sizes = [4, 256], strides = [1, 1]} : vector<4x290xf32> to vector<4x256xf32>
    %253 = vector.broadcast %4 : vector<1x256xf32> to vector<4x256xf32>
    %254 = arith.mulf %252, %253 : vector<4x256xf32>
    %255 = vector.extract_strided_slice %85 {offsets = [0, 24], sizes = [4, 1], strides = [1, 1]} : vector<4x72xf32> to vector<4x1xf32>
    %256 = vector.extract_strided_slice %251 {offsets = [0, 0], sizes = [1, 256], strides = [1, 1]} : vector<4x256xf32> to vector<1x256xf32>
    %257 = vector.broadcast %255 : vector<4x1xf32> to vector<4x256xf32>
    %258 = vector.broadcast %256 : vector<1x256xf32> to vector<4x256xf32>
    %259 = arith.mulf %257, %258 : vector<4x256xf32>
    %260 = arith.addf %248, %259 : vector<4x256xf32>
    %261 = vector.extract_strided_slice %85 {offsets = [0, 25], sizes = [4, 1], strides = [1, 1]} : vector<4x72xf32> to vector<4x1xf32>
    %262 = vector.extract_strided_slice %251 {offsets = [1, 0], sizes = [1, 256], strides = [1, 1]} : vector<4x256xf32> to vector<1x256xf32>
    %263 = vector.broadcast %261 : vector<4x1xf32> to vector<4x256xf32>
    %264 = vector.broadcast %262 : vector<1x256xf32> to vector<4x256xf32>
    %265 = arith.mulf %263, %264 : vector<4x256xf32>
    %266 = arith.addf %260, %265 : vector<4x256xf32>
    %267 = vector.extract_strided_slice %85 {offsets = [0, 26], sizes = [4, 1], strides = [1, 1]} : vector<4x72xf32> to vector<4x1xf32>
    %268 = vector.extract_strided_slice %251 {offsets = [2, 0], sizes = [1, 256], strides = [1, 1]} : vector<4x256xf32> to vector<1x256xf32>
    %269 = vector.broadcast %267 : vector<4x1xf32> to vector<4x256xf32>
    %270 = vector.broadcast %268 : vector<1x256xf32> to vector<4x256xf32>
    %271 = arith.mulf %269, %270 : vector<4x256xf32>
    %272 = arith.addf %266, %271 : vector<4x256xf32>
    %273 = vector.extract_strided_slice %85 {offsets = [0, 27], sizes = [4, 1], strides = [1, 1]} : vector<4x72xf32> to vector<4x1xf32>
    %274 = vector.extract_strided_slice %251 {offsets = [3, 0], sizes = [1, 256], strides = [1, 1]} : vector<4x256xf32> to vector<1x256xf32>
    %275 = vector.broadcast %273 : vector<4x1xf32> to vector<4x256xf32>
    %276 = vector.broadcast %274 : vector<1x256xf32> to vector<4x256xf32>
    %277 = arith.mulf %275, %276 : vector<4x256xf32>
    %278 = arith.addf %272, %277 : vector<4x256xf32>
    %279 = vector.extract_strided_slice %85 {offsets = [0, 28], sizes = [4, 1], strides = [1, 1]} : vector<4x72xf32> to vector<4x1xf32>
    %280 = vector.extract_strided_slice %254 {offsets = [0, 0], sizes = [1, 256], strides = [1, 1]} : vector<4x256xf32> to vector<1x256xf32>
    %281 = vector.broadcast %279 : vector<4x1xf32> to vector<4x256xf32>
    %282 = vector.broadcast %280 : vector<1x256xf32> to vector<4x256xf32>
    %283 = arith.mulf %281, %282 : vector<4x256xf32>
    %284 = arith.addf %278, %283 : vector<4x256xf32>
    %285 = vector.extract_strided_slice %85 {offsets = [0, 29], sizes = [4, 1], strides = [1, 1]} : vector<4x72xf32> to vector<4x1xf32>
    %286 = vector.extract_strided_slice %254 {offsets = [1, 0], sizes = [1, 256], strides = [1, 1]} : vector<4x256xf32> to vector<1x256xf32>
    %287 = vector.broadcast %285 : vector<4x1xf32> to vector<4x256xf32>
    %288 = vector.broadcast %286 : vector<1x256xf32> to vector<4x256xf32>
    %289 = arith.mulf %287, %288 : vector<4x256xf32>
    %290 = arith.addf %284, %289 : vector<4x256xf32>
    %291 = vector.extract_strided_slice %85 {offsets = [0, 30], sizes = [4, 1], strides = [1, 1]} : vector<4x72xf32> to vector<4x1xf32>
    %292 = vector.extract_strided_slice %254 {offsets = [2, 0], sizes = [1, 256], strides = [1, 1]} : vector<4x256xf32> to vector<1x256xf32>
    %293 = vector.broadcast %291 : vector<4x1xf32> to vector<4x256xf32>
    %294 = vector.broadcast %292 : vector<1x256xf32> to vector<4x256xf32>
    %295 = arith.mulf %293, %294 : vector<4x256xf32>
    %296 = arith.addf %290, %295 : vector<4x256xf32>
    %297 = vector.extract_strided_slice %85 {offsets = [0, 31], sizes = [4, 1], strides = [1, 1]} : vector<4x72xf32> to vector<4x1xf32>
    %298 = vector.extract_strided_slice %254 {offsets = [3, 0], sizes = [1, 256], strides = [1, 1]} : vector<4x256xf32> to vector<1x256xf32>
    %299 = vector.broadcast %297 : vector<4x1xf32> to vector<4x256xf32>
    %300 = vector.broadcast %298 : vector<1x256xf32> to vector<4x256xf32>
    %301 = arith.mulf %299, %300 : vector<4x256xf32>
    %302 = arith.addf %296, %301 : vector<4x256xf32>
    %303 = vector.extract_strided_slice %87 {offsets = [0, 17], sizes = [4, 256], strides = [1, 1]} : vector<4x290xf32> to vector<4x256xf32>
    %304 = vector.extract_strided_slice %89 {offsets = [0, 17], sizes = [4, 256], strides = [1, 1]} : vector<4x290xf32> to vector<4x256xf32>
    %305 = vector.extract_strided_slice %85 {offsets = [0, 32], sizes = [4, 1], strides = [1, 1]} : vector<4x72xf32> to vector<4x1xf32>
    %306 = vector.extract_strided_slice %303 {offsets = [0, 0], sizes = [1, 256], strides = [1, 1]} : vector<4x256xf32> to vector<1x256xf32>
    %307 = vector.broadcast %305 : vector<4x1xf32> to vector<4x256xf32>
    %308 = vector.broadcast %306 : vector<1x256xf32> to vector<4x256xf32>
    %309 = arith.mulf %307, %308 : vector<4x256xf32>
    %310 = arith.addf %302, %309 : vector<4x256xf32>
    %311 = vector.extract_strided_slice %85 {offsets = [0, 33], sizes = [4, 1], strides = [1, 1]} : vector<4x72xf32> to vector<4x1xf32>
    %312 = vector.extract_strided_slice %303 {offsets = [1, 0], sizes = [1, 256], strides = [1, 1]} : vector<4x256xf32> to vector<1x256xf32>
    %313 = vector.broadcast %311 : vector<4x1xf32> to vector<4x256xf32>
    %314 = vector.broadcast %312 : vector<1x256xf32> to vector<4x256xf32>
    %315 = arith.mulf %313, %314 : vector<4x256xf32>
    %316 = arith.addf %310, %315 : vector<4x256xf32>
    %317 = vector.extract_strided_slice %85 {offsets = [0, 34], sizes = [4, 1], strides = [1, 1]} : vector<4x72xf32> to vector<4x1xf32>
    %318 = vector.extract_strided_slice %303 {offsets = [2, 0], sizes = [1, 256], strides = [1, 1]} : vector<4x256xf32> to vector<1x256xf32>
    %319 = vector.broadcast %317 : vector<4x1xf32> to vector<4x256xf32>
    %320 = vector.broadcast %318 : vector<1x256xf32> to vector<4x256xf32>
    %321 = arith.mulf %319, %320 : vector<4x256xf32>
    %322 = arith.addf %316, %321 : vector<4x256xf32>
    %323 = vector.extract_strided_slice %85 {offsets = [0, 35], sizes = [4, 1], strides = [1, 1]} : vector<4x72xf32> to vector<4x1xf32>
    %324 = vector.extract_strided_slice %303 {offsets = [3, 0], sizes = [1, 256], strides = [1, 1]} : vector<4x256xf32> to vector<1x256xf32>
    %325 = vector.broadcast %323 : vector<4x1xf32> to vector<4x256xf32>
    %326 = vector.broadcast %324 : vector<1x256xf32> to vector<4x256xf32>
    %327 = arith.mulf %325, %326 : vector<4x256xf32>
    %328 = arith.addf %322, %327 : vector<4x256xf32>
    %329 = vector.extract_strided_slice %85 {offsets = [0, 36], sizes = [4, 1], strides = [1, 1]} : vector<4x72xf32> to vector<4x1xf32>
    %330 = vector.extract_strided_slice %304 {offsets = [0, 0], sizes = [1, 256], strides = [1, 1]} : vector<4x256xf32> to vector<1x256xf32>
    %331 = vector.broadcast %329 : vector<4x1xf32> to vector<4x256xf32>
    %332 = vector.broadcast %330 : vector<1x256xf32> to vector<4x256xf32>
    %333 = arith.mulf %331, %332 : vector<4x256xf32>
    %334 = arith.addf %328, %333 : vector<4x256xf32>
    %335 = vector.extract_strided_slice %85 {offsets = [0, 37], sizes = [4, 1], strides = [1, 1]} : vector<4x72xf32> to vector<4x1xf32>
    %336 = vector.extract_strided_slice %304 {offsets = [1, 0], sizes = [1, 256], strides = [1, 1]} : vector<4x256xf32> to vector<1x256xf32>
    %337 = vector.broadcast %335 : vector<4x1xf32> to vector<4x256xf32>
    %338 = vector.broadcast %336 : vector<1x256xf32> to vector<4x256xf32>
    %339 = arith.mulf %337, %338 : vector<4x256xf32>
    %340 = arith.addf %334, %339 : vector<4x256xf32>
    %341 = vector.extract_strided_slice %85 {offsets = [0, 38], sizes = [4, 1], strides = [1, 1]} : vector<4x72xf32> to vector<4x1xf32>
    %342 = vector.extract_strided_slice %304 {offsets = [2, 0], sizes = [1, 256], strides = [1, 1]} : vector<4x256xf32> to vector<1x256xf32>
    %343 = vector.broadcast %341 : vector<4x1xf32> to vector<4x256xf32>
    %344 = vector.broadcast %342 : vector<1x256xf32> to vector<4x256xf32>
    %345 = arith.mulf %343, %344 : vector<4x256xf32>
    %346 = arith.addf %340, %345 : vector<4x256xf32>
    %347 = vector.extract_strided_slice %85 {offsets = [0, 39], sizes = [4, 1], strides = [1, 1]} : vector<4x72xf32> to vector<4x1xf32>
    %348 = vector.extract_strided_slice %304 {offsets = [3, 0], sizes = [1, 256], strides = [1, 1]} : vector<4x256xf32> to vector<1x256xf32>
    %349 = vector.broadcast %347 : vector<4x1xf32> to vector<4x256xf32>
    %350 = vector.broadcast %348 : vector<1x256xf32> to vector<4x256xf32>
    %351 = arith.mulf %349, %350 : vector<4x256xf32>
    %352 = arith.addf %346, %351 : vector<4x256xf32>
    %353 = vector.extract_strided_slice %87 {offsets = [0, 18], sizes = [4, 256], strides = [1, 1]} : vector<4x290xf32> to vector<4x256xf32>
    %354 = vector.broadcast %5 : vector<1x256xf32> to vector<4x256xf32>
    %355 = arith.mulf %353, %354 : vector<4x256xf32>
    %356 = vector.extract_strided_slice %89 {offsets = [0, 18], sizes = [4, 256], strides = [1, 1]} : vector<4x290xf32> to vector<4x256xf32>
    %357 = vector.broadcast %5 : vector<1x256xf32> to vector<4x256xf32>
    %358 = arith.mulf %356, %357 : vector<4x256xf32>
    %359 = vector.extract_strided_slice %85 {offsets = [0, 40], sizes = [4, 1], strides = [1, 1]} : vector<4x72xf32> to vector<4x1xf32>
    %360 = vector.extract_strided_slice %355 {offsets = [0, 0], sizes = [1, 256], strides = [1, 1]} : vector<4x256xf32> to vector<1x256xf32>
    %361 = vector.broadcast %359 : vector<4x1xf32> to vector<4x256xf32>
    %362 = vector.broadcast %360 : vector<1x256xf32> to vector<4x256xf32>
    %363 = arith.mulf %361, %362 : vector<4x256xf32>
    %364 = arith.addf %352, %363 : vector<4x256xf32>
    %365 = vector.extract_strided_slice %85 {offsets = [0, 41], sizes = [4, 1], strides = [1, 1]} : vector<4x72xf32> to vector<4x1xf32>
    %366 = vector.extract_strided_slice %355 {offsets = [1, 0], sizes = [1, 256], strides = [1, 1]} : vector<4x256xf32> to vector<1x256xf32>
    %367 = vector.broadcast %365 : vector<4x1xf32> to vector<4x256xf32>
    %368 = vector.broadcast %366 : vector<1x256xf32> to vector<4x256xf32>
    %369 = arith.mulf %367, %368 : vector<4x256xf32>
    %370 = arith.addf %364, %369 : vector<4x256xf32>
    %371 = vector.extract_strided_slice %85 {offsets = [0, 42], sizes = [4, 1], strides = [1, 1]} : vector<4x72xf32> to vector<4x1xf32>
    %372 = vector.extract_strided_slice %355 {offsets = [2, 0], sizes = [1, 256], strides = [1, 1]} : vector<4x256xf32> to vector<1x256xf32>
    %373 = vector.broadcast %371 : vector<4x1xf32> to vector<4x256xf32>
    %374 = vector.broadcast %372 : vector<1x256xf32> to vector<4x256xf32>
    %375 = arith.mulf %373, %374 : vector<4x256xf32>
    %376 = arith.addf %370, %375 : vector<4x256xf32>
    %377 = vector.extract_strided_slice %85 {offsets = [0, 43], sizes = [4, 1], strides = [1, 1]} : vector<4x72xf32> to vector<4x1xf32>
    %378 = vector.extract_strided_slice %355 {offsets = [3, 0], sizes = [1, 256], strides = [1, 1]} : vector<4x256xf32> to vector<1x256xf32>
    %379 = vector.broadcast %377 : vector<4x1xf32> to vector<4x256xf32>
    %380 = vector.broadcast %378 : vector<1x256xf32> to vector<4x256xf32>
    %381 = arith.mulf %379, %380 : vector<4x256xf32>
    %382 = arith.addf %376, %381 : vector<4x256xf32>
    %383 = vector.extract_strided_slice %85 {offsets = [0, 44], sizes = [4, 1], strides = [1, 1]} : vector<4x72xf32> to vector<4x1xf32>
    %384 = vector.extract_strided_slice %358 {offsets = [0, 0], sizes = [1, 256], strides = [1, 1]} : vector<4x256xf32> to vector<1x256xf32>
    %385 = vector.broadcast %383 : vector<4x1xf32> to vector<4x256xf32>
    %386 = vector.broadcast %384 : vector<1x256xf32> to vector<4x256xf32>
    %387 = arith.mulf %385, %386 : vector<4x256xf32>
    %388 = arith.addf %382, %387 : vector<4x256xf32>
    %389 = vector.extract_strided_slice %85 {offsets = [0, 45], sizes = [4, 1], strides = [1, 1]} : vector<4x72xf32> to vector<4x1xf32>
    %390 = vector.extract_strided_slice %358 {offsets = [1, 0], sizes = [1, 256], strides = [1, 1]} : vector<4x256xf32> to vector<1x256xf32>
    %391 = vector.broadcast %389 : vector<4x1xf32> to vector<4x256xf32>
    %392 = vector.broadcast %390 : vector<1x256xf32> to vector<4x256xf32>
    %393 = arith.mulf %391, %392 : vector<4x256xf32>
    %394 = arith.addf %388, %393 : vector<4x256xf32>
    %395 = vector.extract_strided_slice %85 {offsets = [0, 46], sizes = [4, 1], strides = [1, 1]} : vector<4x72xf32> to vector<4x1xf32>
    %396 = vector.extract_strided_slice %358 {offsets = [2, 0], sizes = [1, 256], strides = [1, 1]} : vector<4x256xf32> to vector<1x256xf32>
    %397 = vector.broadcast %395 : vector<4x1xf32> to vector<4x256xf32>
    %398 = vector.broadcast %396 : vector<1x256xf32> to vector<4x256xf32>
    %399 = arith.mulf %397, %398 : vector<4x256xf32>
    %400 = arith.addf %394, %399 : vector<4x256xf32>
    %401 = vector.extract_strided_slice %85 {offsets = [0, 47], sizes = [4, 1], strides = [1, 1]} : vector<4x72xf32> to vector<4x1xf32>
    %402 = vector.extract_strided_slice %358 {offsets = [3, 0], sizes = [1, 256], strides = [1, 1]} : vector<4x256xf32> to vector<1x256xf32>
    %403 = vector.broadcast %401 : vector<4x1xf32> to vector<4x256xf32>
    %404 = vector.broadcast %402 : vector<1x256xf32> to vector<4x256xf32>
    %405 = arith.mulf %403, %404 : vector<4x256xf32>
    %406 = arith.addf %400, %405 : vector<4x256xf32>
    %407 = vector.extract_strided_slice %87 {offsets = [0, 32], sizes = [4, 256], strides = [1, 1]} : vector<4x290xf32> to vector<4x256xf32>
    %408 = vector.broadcast %4 : vector<1x256xf32> to vector<4x256xf32>
    %409 = arith.mulf %407, %408 : vector<4x256xf32>
    %410 = vector.extract_strided_slice %89 {offsets = [0, 32], sizes = [4, 256], strides = [1, 1]} : vector<4x290xf32> to vector<4x256xf32>
    %411 = vector.broadcast %4 : vector<1x256xf32> to vector<4x256xf32>
    %412 = arith.mulf %410, %411 : vector<4x256xf32>
    %413 = vector.extract_strided_slice %85 {offsets = [0, 48], sizes = [4, 1], strides = [1, 1]} : vector<4x72xf32> to vector<4x1xf32>
    %414 = vector.extract_strided_slice %409 {offsets = [0, 0], sizes = [1, 256], strides = [1, 1]} : vector<4x256xf32> to vector<1x256xf32>
    %415 = vector.broadcast %413 : vector<4x1xf32> to vector<4x256xf32>
    %416 = vector.broadcast %414 : vector<1x256xf32> to vector<4x256xf32>
    %417 = arith.mulf %415, %416 : vector<4x256xf32>
    %418 = arith.addf %406, %417 : vector<4x256xf32>
    %419 = vector.extract_strided_slice %85 {offsets = [0, 49], sizes = [4, 1], strides = [1, 1]} : vector<4x72xf32> to vector<4x1xf32>
    %420 = vector.extract_strided_slice %409 {offsets = [1, 0], sizes = [1, 256], strides = [1, 1]} : vector<4x256xf32> to vector<1x256xf32>
    %421 = vector.broadcast %419 : vector<4x1xf32> to vector<4x256xf32>
    %422 = vector.broadcast %420 : vector<1x256xf32> to vector<4x256xf32>
    %423 = arith.mulf %421, %422 : vector<4x256xf32>
    %424 = arith.addf %418, %423 : vector<4x256xf32>
    %425 = vector.extract_strided_slice %85 {offsets = [0, 50], sizes = [4, 1], strides = [1, 1]} : vector<4x72xf32> to vector<4x1xf32>
    %426 = vector.extract_strided_slice %409 {offsets = [2, 0], sizes = [1, 256], strides = [1, 1]} : vector<4x256xf32> to vector<1x256xf32>
    %427 = vector.broadcast %425 : vector<4x1xf32> to vector<4x256xf32>
    %428 = vector.broadcast %426 : vector<1x256xf32> to vector<4x256xf32>
    %429 = arith.mulf %427, %428 : vector<4x256xf32>
    %430 = arith.addf %424, %429 : vector<4x256xf32>
    %431 = vector.extract_strided_slice %85 {offsets = [0, 51], sizes = [4, 1], strides = [1, 1]} : vector<4x72xf32> to vector<4x1xf32>
    %432 = vector.extract_strided_slice %409 {offsets = [3, 0], sizes = [1, 256], strides = [1, 1]} : vector<4x256xf32> to vector<1x256xf32>
    %433 = vector.broadcast %431 : vector<4x1xf32> to vector<4x256xf32>
    %434 = vector.broadcast %432 : vector<1x256xf32> to vector<4x256xf32>
    %435 = arith.mulf %433, %434 : vector<4x256xf32>
    %436 = arith.addf %430, %435 : vector<4x256xf32>
    %437 = vector.extract_strided_slice %85 {offsets = [0, 52], sizes = [4, 1], strides = [1, 1]} : vector<4x72xf32> to vector<4x1xf32>
    %438 = vector.extract_strided_slice %412 {offsets = [0, 0], sizes = [1, 256], strides = [1, 1]} : vector<4x256xf32> to vector<1x256xf32>
    %439 = vector.broadcast %437 : vector<4x1xf32> to vector<4x256xf32>
    %440 = vector.broadcast %438 : vector<1x256xf32> to vector<4x256xf32>
    %441 = arith.mulf %439, %440 : vector<4x256xf32>
    %442 = arith.addf %436, %441 : vector<4x256xf32>
    %443 = vector.extract_strided_slice %85 {offsets = [0, 53], sizes = [4, 1], strides = [1, 1]} : vector<4x72xf32> to vector<4x1xf32>
    %444 = vector.extract_strided_slice %412 {offsets = [1, 0], sizes = [1, 256], strides = [1, 1]} : vector<4x256xf32> to vector<1x256xf32>
    %445 = vector.broadcast %443 : vector<4x1xf32> to vector<4x256xf32>
    %446 = vector.broadcast %444 : vector<1x256xf32> to vector<4x256xf32>
    %447 = arith.mulf %445, %446 : vector<4x256xf32>
    %448 = arith.addf %442, %447 : vector<4x256xf32>
    %449 = vector.extract_strided_slice %85 {offsets = [0, 54], sizes = [4, 1], strides = [1, 1]} : vector<4x72xf32> to vector<4x1xf32>
    %450 = vector.extract_strided_slice %412 {offsets = [2, 0], sizes = [1, 256], strides = [1, 1]} : vector<4x256xf32> to vector<1x256xf32>
    %451 = vector.broadcast %449 : vector<4x1xf32> to vector<4x256xf32>
    %452 = vector.broadcast %450 : vector<1x256xf32> to vector<4x256xf32>
    %453 = arith.mulf %451, %452 : vector<4x256xf32>
    %454 = arith.addf %448, %453 : vector<4x256xf32>
    %455 = vector.extract_strided_slice %85 {offsets = [0, 55], sizes = [4, 1], strides = [1, 1]} : vector<4x72xf32> to vector<4x1xf32>
    %456 = vector.extract_strided_slice %412 {offsets = [3, 0], sizes = [1, 256], strides = [1, 1]} : vector<4x256xf32> to vector<1x256xf32>
    %457 = vector.broadcast %455 : vector<4x1xf32> to vector<4x256xf32>
    %458 = vector.broadcast %456 : vector<1x256xf32> to vector<4x256xf32>
    %459 = arith.mulf %457, %458 : vector<4x256xf32>
    %460 = arith.addf %454, %459 : vector<4x256xf32>
    %461 = vector.extract_strided_slice %87 {offsets = [0, 33], sizes = [4, 256], strides = [1, 1]} : vector<4x290xf32> to vector<4x256xf32>
    %462 = vector.extract_strided_slice %89 {offsets = [0, 33], sizes = [4, 256], strides = [1, 1]} : vector<4x290xf32> to vector<4x256xf32>
    %463 = vector.extract_strided_slice %85 {offsets = [0, 56], sizes = [4, 1], strides = [1, 1]} : vector<4x72xf32> to vector<4x1xf32>
    %464 = vector.extract_strided_slice %461 {offsets = [0, 0], sizes = [1, 256], strides = [1, 1]} : vector<4x256xf32> to vector<1x256xf32>
    %465 = vector.broadcast %463 : vector<4x1xf32> to vector<4x256xf32>
    %466 = vector.broadcast %464 : vector<1x256xf32> to vector<4x256xf32>
    %467 = arith.mulf %465, %466 : vector<4x256xf32>
    %468 = arith.addf %460, %467 : vector<4x256xf32>
    %469 = vector.extract_strided_slice %85 {offsets = [0, 57], sizes = [4, 1], strides = [1, 1]} : vector<4x72xf32> to vector<4x1xf32>
    %470 = vector.extract_strided_slice %461 {offsets = [1, 0], sizes = [1, 256], strides = [1, 1]} : vector<4x256xf32> to vector<1x256xf32>
    %471 = vector.broadcast %469 : vector<4x1xf32> to vector<4x256xf32>
    %472 = vector.broadcast %470 : vector<1x256xf32> to vector<4x256xf32>
    %473 = arith.mulf %471, %472 : vector<4x256xf32>
    %474 = arith.addf %468, %473 : vector<4x256xf32>
    %475 = vector.extract_strided_slice %85 {offsets = [0, 58], sizes = [4, 1], strides = [1, 1]} : vector<4x72xf32> to vector<4x1xf32>
    %476 = vector.extract_strided_slice %461 {offsets = [2, 0], sizes = [1, 256], strides = [1, 1]} : vector<4x256xf32> to vector<1x256xf32>
    %477 = vector.broadcast %475 : vector<4x1xf32> to vector<4x256xf32>
    %478 = vector.broadcast %476 : vector<1x256xf32> to vector<4x256xf32>
    %479 = arith.mulf %477, %478 : vector<4x256xf32>
    %480 = arith.addf %474, %479 : vector<4x256xf32>
    %481 = vector.extract_strided_slice %85 {offsets = [0, 59], sizes = [4, 1], strides = [1, 1]} : vector<4x72xf32> to vector<4x1xf32>
    %482 = vector.extract_strided_slice %461 {offsets = [3, 0], sizes = [1, 256], strides = [1, 1]} : vector<4x256xf32> to vector<1x256xf32>
    %483 = vector.broadcast %481 : vector<4x1xf32> to vector<4x256xf32>
    %484 = vector.broadcast %482 : vector<1x256xf32> to vector<4x256xf32>
    %485 = arith.mulf %483, %484 : vector<4x256xf32>
    %486 = arith.addf %480, %485 : vector<4x256xf32>
    %487 = vector.extract_strided_slice %85 {offsets = [0, 60], sizes = [4, 1], strides = [1, 1]} : vector<4x72xf32> to vector<4x1xf32>
    %488 = vector.extract_strided_slice %462 {offsets = [0, 0], sizes = [1, 256], strides = [1, 1]} : vector<4x256xf32> to vector<1x256xf32>
    %489 = vector.broadcast %487 : vector<4x1xf32> to vector<4x256xf32>
    %490 = vector.broadcast %488 : vector<1x256xf32> to vector<4x256xf32>
    %491 = arith.mulf %489, %490 : vector<4x256xf32>
    %492 = arith.addf %486, %491 : vector<4x256xf32>
    %493 = vector.extract_strided_slice %85 {offsets = [0, 61], sizes = [4, 1], strides = [1, 1]} : vector<4x72xf32> to vector<4x1xf32>
    %494 = vector.extract_strided_slice %462 {offsets = [1, 0], sizes = [1, 256], strides = [1, 1]} : vector<4x256xf32> to vector<1x256xf32>
    %495 = vector.broadcast %493 : vector<4x1xf32> to vector<4x256xf32>
    %496 = vector.broadcast %494 : vector<1x256xf32> to vector<4x256xf32>
    %497 = arith.mulf %495, %496 : vector<4x256xf32>
    %498 = arith.addf %492, %497 : vector<4x256xf32>
    %499 = vector.extract_strided_slice %85 {offsets = [0, 62], sizes = [4, 1], strides = [1, 1]} : vector<4x72xf32> to vector<4x1xf32>
    %500 = vector.extract_strided_slice %462 {offsets = [2, 0], sizes = [1, 256], strides = [1, 1]} : vector<4x256xf32> to vector<1x256xf32>
    %501 = vector.broadcast %499 : vector<4x1xf32> to vector<4x256xf32>
    %502 = vector.broadcast %500 : vector<1x256xf32> to vector<4x256xf32>
    %503 = arith.mulf %501, %502 : vector<4x256xf32>
    %504 = arith.addf %498, %503 : vector<4x256xf32>
    %505 = vector.extract_strided_slice %85 {offsets = [0, 63], sizes = [4, 1], strides = [1, 1]} : vector<4x72xf32> to vector<4x1xf32>
    %506 = vector.extract_strided_slice %462 {offsets = [3, 0], sizes = [1, 256], strides = [1, 1]} : vector<4x256xf32> to vector<1x256xf32>
    %507 = vector.broadcast %505 : vector<4x1xf32> to vector<4x256xf32>
    %508 = vector.broadcast %506 : vector<1x256xf32> to vector<4x256xf32>
    %509 = arith.mulf %507, %508 : vector<4x256xf32>
    %510 = arith.addf %504, %509 : vector<4x256xf32>
    %511 = vector.extract_strided_slice %87 {offsets = [0, 34], sizes = [4, 256], strides = [1, 1]} : vector<4x290xf32> to vector<4x256xf32>
    %512 = vector.broadcast %5 : vector<1x256xf32> to vector<4x256xf32>
    %513 = arith.mulf %511, %512 : vector<4x256xf32>
    %514 = vector.extract_strided_slice %89 {offsets = [0, 34], sizes = [4, 256], strides = [1, 1]} : vector<4x290xf32> to vector<4x256xf32>
    %515 = vector.broadcast %5 : vector<1x256xf32> to vector<4x256xf32>
    %516 = arith.mulf %514, %515 : vector<4x256xf32>
    %517 = vector.extract_strided_slice %85 {offsets = [0, 64], sizes = [4, 1], strides = [1, 1]} : vector<4x72xf32> to vector<4x1xf32>
    %518 = vector.extract_strided_slice %513 {offsets = [0, 0], sizes = [1, 256], strides = [1, 1]} : vector<4x256xf32> to vector<1x256xf32>
    %519 = vector.broadcast %517 : vector<4x1xf32> to vector<4x256xf32>
    %520 = vector.broadcast %518 : vector<1x256xf32> to vector<4x256xf32>
    %521 = arith.mulf %519, %520 : vector<4x256xf32>
    %522 = arith.addf %510, %521 : vector<4x256xf32>
    %523 = vector.extract_strided_slice %85 {offsets = [0, 65], sizes = [4, 1], strides = [1, 1]} : vector<4x72xf32> to vector<4x1xf32>
    %524 = vector.extract_strided_slice %513 {offsets = [1, 0], sizes = [1, 256], strides = [1, 1]} : vector<4x256xf32> to vector<1x256xf32>
    %525 = vector.broadcast %523 : vector<4x1xf32> to vector<4x256xf32>
    %526 = vector.broadcast %524 : vector<1x256xf32> to vector<4x256xf32>
    %527 = arith.mulf %525, %526 : vector<4x256xf32>
    %528 = arith.addf %522, %527 : vector<4x256xf32>
    %529 = vector.extract_strided_slice %85 {offsets = [0, 66], sizes = [4, 1], strides = [1, 1]} : vector<4x72xf32> to vector<4x1xf32>
    %530 = vector.extract_strided_slice %513 {offsets = [2, 0], sizes = [1, 256], strides = [1, 1]} : vector<4x256xf32> to vector<1x256xf32>
    %531 = vector.broadcast %529 : vector<4x1xf32> to vector<4x256xf32>
    %532 = vector.broadcast %530 : vector<1x256xf32> to vector<4x256xf32>
    %533 = arith.mulf %531, %532 : vector<4x256xf32>
    %534 = arith.addf %528, %533 : vector<4x256xf32>
    %535 = vector.extract_strided_slice %85 {offsets = [0, 67], sizes = [4, 1], strides = [1, 1]} : vector<4x72xf32> to vector<4x1xf32>
    %536 = vector.extract_strided_slice %513 {offsets = [3, 0], sizes = [1, 256], strides = [1, 1]} : vector<4x256xf32> to vector<1x256xf32>
    %537 = vector.broadcast %535 : vector<4x1xf32> to vector<4x256xf32>
    %538 = vector.broadcast %536 : vector<1x256xf32> to vector<4x256xf32>
    %539 = arith.mulf %537, %538 : vector<4x256xf32>
    %540 = arith.addf %534, %539 : vector<4x256xf32>
    %541 = vector.extract_strided_slice %85 {offsets = [0, 68], sizes = [4, 1], strides = [1, 1]} : vector<4x72xf32> to vector<4x1xf32>
    %542 = vector.extract_strided_slice %516 {offsets = [0, 0], sizes = [1, 256], strides = [1, 1]} : vector<4x256xf32> to vector<1x256xf32>
    %543 = vector.broadcast %541 : vector<4x1xf32> to vector<4x256xf32>
    %544 = vector.broadcast %542 : vector<1x256xf32> to vector<4x256xf32>
    %545 = arith.mulf %543, %544 : vector<4x256xf32>
    %546 = arith.addf %540, %545 : vector<4x256xf32>
    %547 = vector.extract_strided_slice %85 {offsets = [0, 69], sizes = [4, 1], strides = [1, 1]} : vector<4x72xf32> to vector<4x1xf32>
    %548 = vector.extract_strided_slice %516 {offsets = [1, 0], sizes = [1, 256], strides = [1, 1]} : vector<4x256xf32> to vector<1x256xf32>
    %549 = vector.broadcast %547 : vector<4x1xf32> to vector<4x256xf32>
    %550 = vector.broadcast %548 : vector<1x256xf32> to vector<4x256xf32>
    %551 = arith.mulf %549, %550 : vector<4x256xf32>
    %552 = arith.addf %546, %551 : vector<4x256xf32>
    %553 = vector.extract_strided_slice %85 {offsets = [0, 70], sizes = [4, 1], strides = [1, 1]} : vector<4x72xf32> to vector<4x1xf32>
    %554 = vector.extract_strided_slice %516 {offsets = [2, 0], sizes = [1, 256], strides = [1, 1]} : vector<4x256xf32> to vector<1x256xf32>
    %555 = vector.broadcast %553 : vector<4x1xf32> to vector<4x256xf32>
    %556 = vector.broadcast %554 : vector<1x256xf32> to vector<4x256xf32>
    %557 = arith.mulf %555, %556 : vector<4x256xf32>
    %558 = arith.addf %552, %557 : vector<4x256xf32>
    %559 = vector.extract_strided_slice %85 {offsets = [0, 71], sizes = [4, 1], strides = [1, 1]} : vector<4x72xf32> to vector<4x1xf32>
    %560 = vector.extract_strided_slice %516 {offsets = [3, 0], sizes = [1, 256], strides = [1, 1]} : vector<4x256xf32> to vector<1x256xf32>
    %561 = vector.broadcast %559 : vector<4x1xf32> to vector<4x256xf32>
    %562 = vector.broadcast %560 : vector<1x256xf32> to vector<4x256xf32>
    %563 = arith.mulf %561, %562 : vector<4x256xf32>
    %564 = arith.addf %558, %563 : vector<4x256xf32>
    %c0_40 = arith.constant 0 : index
    %c0_41 = arith.constant 0 : index
    %565 = vector.load %arg10[%c0_40, %c0_41] : memref<4x1xf32, #tpu.memory_space<vmem>>, vector<4x1xf32>
    %566 = vector.broadcast %565 : vector<4x1xf32> to vector<4x256xf32>
    %567 = arith.addf %564, %566 : vector<4x256xf32>
    %cst_42 = arith.constant 0.000000e+00 : f32
    %568 = vector.broadcast %cst_42 : f32 to vector<4x256xf32>
    %569 = arith.maximumf %567, %568 : vector<4x256xf32>
    %cst_43 = arith.constant 0.000000e+00 : f32
    %570 = vector.broadcast %cst_43 : f32 to vector<4x17xf32>
    %571 = tpu.concatenate %570, %569, %570 in 1 : vector<4x17xf32>, vector<4x256xf32>, vector<4x17xf32> -> vector<4x290xf32>
    %cst_44 = arith.constant 0.000000e+00 : f32
    %572 = vector.broadcast %cst_44 : f32 to vector<4x256xf32>
    %c0_45 = arith.constant 0 : index
    %c0_46 = arith.constant 0 : index
    %573 = vector.load %arg11[%c0_45, %c0_46] : memref<4x9xf32, #tpu.memory_space<vmem>>, vector<4x1xf32>
    %574 = vector.extract_strided_slice %571 {offsets = [0, 0], sizes = [4, 256], strides = [1, 1]} : vector<4x290xf32> to vector<4x256xf32>
    %575 = vector.broadcast %4 : vector<1x256xf32> to vector<4x256xf32>
    %576 = arith.mulf %574, %575 : vector<4x256xf32>
    %577 = vector.broadcast %573 : vector<4x1xf32> to vector<4x256xf32>
    %578 = arith.mulf %577, %576 : vector<4x256xf32>
    %579 = arith.addf %572, %578 : vector<4x256xf32>
    %c0_47 = arith.constant 0 : index
    %c1_48 = arith.constant 1 : index
    %580 = vector.load %arg11[%c0_47, %c1_48] : memref<4x9xf32, #tpu.memory_space<vmem>>, vector<4x1xf32>
    %581 = vector.extract_strided_slice %571 {offsets = [0, 1], sizes = [4, 256], strides = [1, 1]} : vector<4x290xf32> to vector<4x256xf32>
    %582 = vector.broadcast %580 : vector<4x1xf32> to vector<4x256xf32>
    %583 = arith.mulf %582, %581 : vector<4x256xf32>
    %584 = arith.addf %579, %583 : vector<4x256xf32>
    %c0_49 = arith.constant 0 : index
    %c2_50 = arith.constant 2 : index
    %585 = vector.load %arg11[%c0_49, %c2_50] : memref<4x9xf32, #tpu.memory_space<vmem>>, vector<4x1xf32>
    %586 = vector.extract_strided_slice %571 {offsets = [0, 2], sizes = [4, 256], strides = [1, 1]} : vector<4x290xf32> to vector<4x256xf32>
    %587 = vector.broadcast %5 : vector<1x256xf32> to vector<4x256xf32>
    %588 = arith.mulf %586, %587 : vector<4x256xf32>
    %589 = vector.broadcast %585 : vector<4x1xf32> to vector<4x256xf32>
    %590 = arith.mulf %589, %588 : vector<4x256xf32>
    %591 = arith.addf %584, %590 : vector<4x256xf32>
    %c0_51 = arith.constant 0 : index
    %c3_52 = arith.constant 3 : index
    %592 = vector.load %arg11[%c0_51, %c3_52] : memref<4x9xf32, #tpu.memory_space<vmem>>, vector<4x1xf32>
    %593 = vector.extract_strided_slice %571 {offsets = [0, 16], sizes = [4, 256], strides = [1, 1]} : vector<4x290xf32> to vector<4x256xf32>
    %594 = vector.broadcast %4 : vector<1x256xf32> to vector<4x256xf32>
    %595 = arith.mulf %593, %594 : vector<4x256xf32>
    %596 = vector.broadcast %592 : vector<4x1xf32> to vector<4x256xf32>
    %597 = arith.mulf %596, %595 : vector<4x256xf32>
    %598 = arith.addf %591, %597 : vector<4x256xf32>
    %c0_53 = arith.constant 0 : index
    %c4_54 = arith.constant 4 : index
    %599 = vector.load %arg11[%c0_53, %c4_54] : memref<4x9xf32, #tpu.memory_space<vmem>>, vector<4x1xf32>
    %600 = vector.extract_strided_slice %571 {offsets = [0, 17], sizes = [4, 256], strides = [1, 1]} : vector<4x290xf32> to vector<4x256xf32>
    %601 = vector.broadcast %599 : vector<4x1xf32> to vector<4x256xf32>
    %602 = arith.mulf %601, %600 : vector<4x256xf32>
    %603 = arith.addf %598, %602 : vector<4x256xf32>
    %c0_55 = arith.constant 0 : index
    %c5 = arith.constant 5 : index
    %604 = vector.load %arg11[%c0_55, %c5] : memref<4x9xf32, #tpu.memory_space<vmem>>, vector<4x1xf32>
    %605 = vector.extract_strided_slice %571 {offsets = [0, 18], sizes = [4, 256], strides = [1, 1]} : vector<4x290xf32> to vector<4x256xf32>
    %606 = vector.broadcast %5 : vector<1x256xf32> to vector<4x256xf32>
    %607 = arith.mulf %605, %606 : vector<4x256xf32>
    %608 = vector.broadcast %604 : vector<4x1xf32> to vector<4x256xf32>
    %609 = arith.mulf %608, %607 : vector<4x256xf32>
    %610 = arith.addf %603, %609 : vector<4x256xf32>
    %c0_56 = arith.constant 0 : index
    %c6 = arith.constant 6 : index
    %611 = vector.load %arg11[%c0_56, %c6] : memref<4x9xf32, #tpu.memory_space<vmem>>, vector<4x1xf32>
    %612 = vector.extract_strided_slice %571 {offsets = [0, 32], sizes = [4, 256], strides = [1, 1]} : vector<4x290xf32> to vector<4x256xf32>
    %613 = vector.broadcast %4 : vector<1x256xf32> to vector<4x256xf32>
    %614 = arith.mulf %612, %613 : vector<4x256xf32>
    %615 = vector.broadcast %611 : vector<4x1xf32> to vector<4x256xf32>
    %616 = arith.mulf %615, %614 : vector<4x256xf32>
    %617 = arith.addf %610, %616 : vector<4x256xf32>
    %c0_57 = arith.constant 0 : index
    %c7 = arith.constant 7 : index
    %618 = vector.load %arg11[%c0_57, %c7] : memref<4x9xf32, #tpu.memory_space<vmem>>, vector<4x1xf32>
    %619 = vector.extract_strided_slice %571 {offsets = [0, 33], sizes = [4, 256], strides = [1, 1]} : vector<4x290xf32> to vector<4x256xf32>
    %620 = vector.broadcast %618 : vector<4x1xf32> to vector<4x256xf32>
    %621 = arith.mulf %620, %619 : vector<4x256xf32>
    %622 = arith.addf %617, %621 : vector<4x256xf32>
    %c0_58 = arith.constant 0 : index
    %c8 = arith.constant 8 : index
    %623 = vector.load %arg11[%c0_58, %c8] : memref<4x9xf32, #tpu.memory_space<vmem>>, vector<4x1xf32>
    %624 = vector.extract_strided_slice %571 {offsets = [0, 34], sizes = [4, 256], strides = [1, 1]} : vector<4x290xf32> to vector<4x256xf32>
    %625 = vector.broadcast %5 : vector<1x256xf32> to vector<4x256xf32>
    %626 = arith.mulf %624, %625 : vector<4x256xf32>
    %627 = vector.broadcast %623 : vector<4x1xf32> to vector<4x256xf32>
    %628 = arith.mulf %627, %626 : vector<4x256xf32>
    %629 = arith.addf %622, %628 : vector<4x256xf32>
    %c0_59 = arith.constant 0 : index
    %c0_60 = arith.constant 0 : index
    %630 = vector.load %arg12[%c0_59, %c0_60] : memref<4x1xf32, #tpu.memory_space<vmem>>, vector<4x1xf32>
    %631 = vector.broadcast %630 : vector<4x1xf32> to vector<4x256xf32>
    %632 = arith.addf %629, %631 : vector<4x256xf32>
    %cst_61 = arith.constant 0.000000e+00 : f32
    %633 = vector.broadcast %cst_61 : f32 to vector<4x256xf32>
    %634 = arith.maximumf %632, %633 : vector<4x256xf32>
    %cst_62 = arith.constant 0.000000e+00 : f32
    %635 = vector.broadcast %cst_62 : f32 to vector<4x17xf32>
    %636 = tpu.concatenate %635, %634, %635 in 1 : vector<4x17xf32>, vector<4x256xf32>, vector<4x17xf32> -> vector<4x290xf32>
    %cst_63 = arith.constant 0.000000e+00 : f32
    %637 = vector.broadcast %cst_63 : f32 to vector<4x256xf32>
    %c0_64 = arith.constant 0 : index
    %c0_65 = arith.constant 0 : index
    %638 = vector.load %arg13[%c0_64, %c0_65] : memref<4x9xf32, #tpu.memory_space<vmem>>, vector<4x1xf32>
    %639 = vector.extract_strided_slice %636 {offsets = [0, 0], sizes = [4, 256], strides = [1, 1]} : vector<4x290xf32> to vector<4x256xf32>
    %640 = vector.broadcast %4 : vector<1x256xf32> to vector<4x256xf32>
    %641 = arith.mulf %639, %640 : vector<4x256xf32>
    %642 = vector.broadcast %638 : vector<4x1xf32> to vector<4x256xf32>
    %643 = arith.mulf %642, %641 : vector<4x256xf32>
    %644 = arith.addf %637, %643 : vector<4x256xf32>
    %c0_66 = arith.constant 0 : index
    %c1_67 = arith.constant 1 : index
    %645 = vector.load %arg13[%c0_66, %c1_67] : memref<4x9xf32, #tpu.memory_space<vmem>>, vector<4x1xf32>
    %646 = vector.extract_strided_slice %636 {offsets = [0, 1], sizes = [4, 256], strides = [1, 1]} : vector<4x290xf32> to vector<4x256xf32>
    %647 = vector.broadcast %645 : vector<4x1xf32> to vector<4x256xf32>
    %648 = arith.mulf %647, %646 : vector<4x256xf32>
    %649 = arith.addf %644, %648 : vector<4x256xf32>
    %c0_68 = arith.constant 0 : index
    %c2_69 = arith.constant 2 : index
    %650 = vector.load %arg13[%c0_68, %c2_69] : memref<4x9xf32, #tpu.memory_space<vmem>>, vector<4x1xf32>
    %651 = vector.extract_strided_slice %636 {offsets = [0, 2], sizes = [4, 256], strides = [1, 1]} : vector<4x290xf32> to vector<4x256xf32>
    %652 = vector.broadcast %5 : vector<1x256xf32> to vector<4x256xf32>
    %653 = arith.mulf %651, %652 : vector<4x256xf32>
    %654 = vector.broadcast %650 : vector<4x1xf32> to vector<4x256xf32>
    %655 = arith.mulf %654, %653 : vector<4x256xf32>
    %656 = arith.addf %649, %655 : vector<4x256xf32>
    %c0_70 = arith.constant 0 : index
    %c3_71 = arith.constant 3 : index
    %657 = vector.load %arg13[%c0_70, %c3_71] : memref<4x9xf32, #tpu.memory_space<vmem>>, vector<4x1xf32>
    %658 = vector.extract_strided_slice %636 {offsets = [0, 16], sizes = [4, 256], strides = [1, 1]} : vector<4x290xf32> to vector<4x256xf32>
    %659 = vector.broadcast %4 : vector<1x256xf32> to vector<4x256xf32>
    %660 = arith.mulf %658, %659 : vector<4x256xf32>
    %661 = vector.broadcast %657 : vector<4x1xf32> to vector<4x256xf32>
    %662 = arith.mulf %661, %660 : vector<4x256xf32>
    %663 = arith.addf %656, %662 : vector<4x256xf32>
    %c0_72 = arith.constant 0 : index
    %c4_73 = arith.constant 4 : index
    %664 = vector.load %arg13[%c0_72, %c4_73] : memref<4x9xf32, #tpu.memory_space<vmem>>, vector<4x1xf32>
    %665 = vector.extract_strided_slice %636 {offsets = [0, 17], sizes = [4, 256], strides = [1, 1]} : vector<4x290xf32> to vector<4x256xf32>
    %666 = vector.broadcast %664 : vector<4x1xf32> to vector<4x256xf32>
    %667 = arith.mulf %666, %665 : vector<4x256xf32>
    %668 = arith.addf %663, %667 : vector<4x256xf32>
    %c0_74 = arith.constant 0 : index
    %c5_75 = arith.constant 5 : index
    %669 = vector.load %arg13[%c0_74, %c5_75] : memref<4x9xf32, #tpu.memory_space<vmem>>, vector<4x1xf32>
    %670 = vector.extract_strided_slice %636 {offsets = [0, 18], sizes = [4, 256], strides = [1, 1]} : vector<4x290xf32> to vector<4x256xf32>
    %671 = vector.broadcast %5 : vector<1x256xf32> to vector<4x256xf32>
    %672 = arith.mulf %670, %671 : vector<4x256xf32>
    %673 = vector.broadcast %669 : vector<4x1xf32> to vector<4x256xf32>
    %674 = arith.mulf %673, %672 : vector<4x256xf32>
    %675 = arith.addf %668, %674 : vector<4x256xf32>
    %c0_76 = arith.constant 0 : index
    %c6_77 = arith.constant 6 : index
    %676 = vector.load %arg13[%c0_76, %c6_77] : memref<4x9xf32, #tpu.memory_space<vmem>>, vector<4x1xf32>
    %677 = vector.extract_strided_slice %636 {offsets = [0, 32], sizes = [4, 256], strides = [1, 1]} : vector<4x290xf32> to vector<4x256xf32>
    %678 = vector.broadcast %4 : vector<1x256xf32> to vector<4x256xf32>
    %679 = arith.mulf %677, %678 : vector<4x256xf32>
    %680 = vector.broadcast %676 : vector<4x1xf32> to vector<4x256xf32>
    %681 = arith.mulf %680, %679 : vector<4x256xf32>
    %682 = arith.addf %675, %681 : vector<4x256xf32>
    %c0_78 = arith.constant 0 : index
    %c7_79 = arith.constant 7 : index
    %683 = vector.load %arg13[%c0_78, %c7_79] : memref<4x9xf32, #tpu.memory_space<vmem>>, vector<4x1xf32>
    %684 = vector.extract_strided_slice %636 {offsets = [0, 33], sizes = [4, 256], strides = [1, 1]} : vector<4x290xf32> to vector<4x256xf32>
    %685 = vector.broadcast %683 : vector<4x1xf32> to vector<4x256xf32>
    %686 = arith.mulf %685, %684 : vector<4x256xf32>
    %687 = arith.addf %682, %686 : vector<4x256xf32>
    %c0_80 = arith.constant 0 : index
    %c8_81 = arith.constant 8 : index
    %688 = vector.load %arg13[%c0_80, %c8_81] : memref<4x9xf32, #tpu.memory_space<vmem>>, vector<4x1xf32>
    %689 = vector.extract_strided_slice %636 {offsets = [0, 34], sizes = [4, 256], strides = [1, 1]} : vector<4x290xf32> to vector<4x256xf32>
    %690 = vector.broadcast %5 : vector<1x256xf32> to vector<4x256xf32>
    %691 = arith.mulf %689, %690 : vector<4x256xf32>
    %692 = vector.broadcast %688 : vector<4x1xf32> to vector<4x256xf32>
    %693 = arith.mulf %692, %691 : vector<4x256xf32>
    %694 = arith.addf %687, %693 : vector<4x256xf32>
    %c0_82 = arith.constant 0 : index
    %c0_83 = arith.constant 0 : index
    %695 = vector.load %arg14[%c0_82, %c0_83] : memref<4x1xf32, #tpu.memory_space<vmem>>, vector<4x1xf32>
    %696 = vector.broadcast %695 : vector<4x1xf32> to vector<4x256xf32>
    %697 = arith.addf %694, %696 : vector<4x256xf32>
    %cst_84 = arith.constant 0.000000e+00 : f32
    %698 = vector.broadcast %cst_84 : f32 to vector<4x256xf32>
    %699 = arith.maximumf %697, %698 : vector<4x256xf32>
    %c0_85 = arith.constant 0 : index
    %c0_86 = arith.constant 0 : index
    %c0_87 = arith.constant 0 : index
    %700 = vector.load %arg15[%c0_85, %c0_86, %c0_87] : memref<1x4x256xf32, #tpu.memory_space<vmem>>, vector<1x4x256xf32>
    %701 = vector.shape_cast %700 : vector<1x4x256xf32> to vector<4x256xf32>
    %702 = vector.shape_cast %699 : vector<4x256xf32> to vector<1x4x256xf32>
    tpu.vector_store %arg15[%c0_85, %c0_86, %c0_87], %702 {strides = array<i32>} : memref<1x4x256xf32, #tpu.memory_space<vmem>>, vector<1x4x256xf32>,
    return
  }
  func.func @transform_0(%arg0: i32) -> (i32, i32, i32) {
    %c0_i32 = arith.constant 0 : i32
    %c0_i32_0 = arith.constant 0 : i32
    %c0_i32_1 = arith.constant 0 : i32
    return %arg0, %c0_i32, %c0_i32_0 : i32, i32, i32
  }
  func.func @transform_1(%arg0: i32) -> (i32, i32, i32) {
    %c0_i32 = arith.constant 0 : i32
    %c0_i32_0 = arith.constant 0 : i32
    %c0_i32_1 = arith.constant 0 : i32
    return %arg0, %c0_i32, %c0_i32_0 : i32, i32, i32
  }
  func.func @transform_2(%arg0: i32) -> (i32, i32) {
    %c0_i32 = arith.constant 0 : i32
    %c0_i32_0 = arith.constant 0 : i32
    %c0_i32_1 = arith.constant 0 : i32
    return %c0_i32, %c0_i32_0 : i32, i32
  }
  func.func @transform_3(%arg0: i32) -> (i32, i32) {
    %c0_i32 = arith.constant 0 : i32
    %c0_i32_0 = arith.constant 0 : i32
    %c0_i32_1 = arith.constant 0 : i32
    return %c0_i32, %c0_i32_0 : i32, i32
  }
  func.func @transform_4(%arg0: i32) -> (i32, i32) {
    %c0_i32 = arith.constant 0 : i32
    %c0_i32_0 = arith.constant 0 : i32
    %c0_i32_1 = arith.constant 0 : i32
    return %c0_i32, %c0_i32_0 : i32, i32
  }
  func.func @transform_5(%arg0: i32) -> (i32, i32) {
    %c0_i32 = arith.constant 0 : i32
    %c0_i32_0 = arith.constant 0 : i32
    %c0_i32_1 = arith.constant 0 : i32
    return %c0_i32, %c0_i32_0 : i32, i32
  }
  func.func @transform_6(%arg0: i32) -> (i32, i32) {
    %c0_i32 = arith.constant 0 : i32
    %c0_i32_0 = arith.constant 0 : i32
    %c0_i32_1 = arith.constant 0 : i32
    return %c0_i32, %c0_i32_0 : i32, i32
  }
  func.func @transform_7(%arg0: i32) -> (i32, i32) {
    %c0_i32 = arith.constant 0 : i32
    %c0_i32_0 = arith.constant 0 : i32
    %c0_i32_1 = arith.constant 0 : i32
    return %c0_i32, %c0_i32_0 : i32, i32
  }
  func.func @transform_8(%arg0: i32) -> (i32, i32) {
    %c0_i32 = arith.constant 0 : i32
    %c0_i32_0 = arith.constant 0 : i32
    %c0_i32_1 = arith.constant 0 : i32
    return %c0_i32, %c0_i32_0 : i32, i32
  }
  func.func @transform_9(%arg0: i32) -> (i32, i32) {
    %c0_i32 = arith.constant 0 : i32
    %c0_i32_0 = arith.constant 0 : i32
    %c0_i32_1 = arith.constant 0 : i32
    return %c0_i32, %c0_i32_0 : i32, i32
  }
  func.func @transform_10(%arg0: i32) -> (i32, i32) {
    %c0_i32 = arith.constant 0 : i32
    %c0_i32_0 = arith.constant 0 : i32
    %c0_i32_1 = arith.constant 0 : i32
    return %c0_i32, %c0_i32_0 : i32, i32
  }
  func.func @transform_11(%arg0: i32) -> (i32, i32) {
    %c0_i32 = arith.constant 0 : i32
    %c0_i32_0 = arith.constant 0 : i32
    %c0_i32_1 = arith.constant 0 : i32
    return %c0_i32, %c0_i32_0 : i32, i32
  }
  func.func @transform_12(%arg0: i32) -> (i32, i32) {
    %c0_i32 = arith.constant 0 : i32
    %c0_i32_0 = arith.constant 0 : i32
    %c0_i32_1 = arith.constant 0 : i32
    return %c0_i32, %c0_i32_0 : i32, i32
  }
  func.func @transform_13(%arg0: i32) -> (i32, i32) {
    %c0_i32 = arith.constant 0 : i32
    %c0_i32_0 = arith.constant 0 : i32
    %c0_i32_1 = arith.constant 0 : i32
    return %c0_i32, %c0_i32_0 : i32, i32
  }
  func.func @transform_14(%arg0: i32) -> (i32, i32, i32) {
    %c0_i32 = arith.constant 0 : i32
    %c0_i32_0 = arith.constant 0 : i32
    %c0_i32_1 = arith.constant 0 : i32
    return %arg0, %c0_i32, %c0_i32_0 : i32, i32, i32
  }
}

</mosaic_0001>

<bundles_post_ra>
// kernel: marm_forward.1
= control target key start
LH: loop header
LB: loop body
LE: loop exit
PB: predicated region body
PF: predicated region fallthrough
CT: control target
= control target key end

     0   :  { %s3950_s15 = smov 0   ;;  %s6113_s0 = inlined_call_operand.vmem [shape: f32[2,4,256], index: 0, kind: input, shape index: {}]   ;;  %s6114_s1 = inlined_call_operand.vmem [shape: f32[2,4,256], index: 1, kind: input, shape index: {}]   ;;  %s6115_s2 = inlined_call_operand.vmem [shape: f32[2,256], index: 2, kind: input, shape index: {}]   ;;  %s6116_s3 = inlined_call_operand.vmem [shape: f32[4,4], index: 3, kind: input, shape index: {}]   ;;  %s6117_s4 = inlined_call_operand.vmem [shape: f32[4,1], index: 4, kind: input, shape index: {}]   ;;  %s6118_s5 = inlined_call_operand.vmem [shape: f32[4,1], index: 5, kind: input, shape index: {}]   ;;  %s6119_s6 = inlined_call_operand.<no memory space> [shape: f32[1,1], index: 6, kind: input, shape index: {}]   ;;  %s6120_s7 = inlined_call_operand.vmem [shape: f32[8,8], index: 7, kind: input, shape index: {}]   ;;  %s6121_s8 = inlined_call_operand.vmem [shape: f32[4,72], index: 8, kind: input, shape index: {}]   ;;  %s6122_s9 = inlined_call_operand.vmem [shape: f32[4,1], index: 9, kind: input, shape index: {}]   ;;  %s6123_s10 = inlined_call_operand.vmem [shape: f32[4,9], index: 10, kind: input, shape index: {}]   ;;  %s6124_s11 = inlined_call_operand.vmem [shape: f32[4,1], index: 11, kind: input, shape index: {}]   ;;  %s6125_s12 = inlined_call_operand.vmem [shape: f32[4,9], index: 12, kind: input, shape index: {}]   ;;  %s6126_s13 = inlined_call_operand.vmem [shape: f32[4,1], index: 13, kind: input, shape index: {}]   ;;  %s6127_s14 = inlined_call_operand.vmem [shape: f32[2,4,256], index: 14, kind: output, shape index: {}]  }
   0x1   :  { %v19_v0 = vstv %s6119_s6 }
   0x2   :  { %20 = vst [vmem:[#allocation2] sm:$0x1] %v19_v0 }
   0x3 LB: > { %s3544_s16 = sadd.s32 4294967295, %s3778_s15   ;;  %p3548_p0 = scmp.ge.s32.totalorder %s3778_s15, 1  ;;  %s3778_s15 = sphi %s3950_s15, %s26_s15  }
   0x4   : > { %p424_p1 = scmp.lt.s32.totalorder %s3778_s15, 3 }
   0x6   : > { %p425_p2 = pnand %p3548_p0, %p424_p1 }
   0x8   : > { %428 = sbr.rel (%p425_p2) target bundleno = 1914 (0x77a), region = 76 }
   0xf   : > { %v495_v1 = vld [vmem:[%s6116_s3] sm:$0xf]  ;;  %v6143_v2 = vmov 0   ;;  %v6141_v3 = vmov 2   ;;  %v502_v4 = vlaneseq  ;;  %v6137_v7 = vmov 3   ;;  %s3784_s26 = smov 2  }
  0x10   : > { %3664 = vset.pattern.permute.xlu0 %v6143_v2  ;;  %3665 = vset.pattern.permute.xlu1 %v6141_v3  ;;  %v615_v5 = vld [vmem:[%s6118_s5] sm:$0xf]  ;;  %v6128_v10 = vmov 1   ;;  %s3785_s27 = smov 16   ;;  %s3786_s28 = smov 18   ;;  %vm626_vm0 = vcmask 1043456  }
  0x11   : > { %498 = vperm.xlu0 %3664, %v495_v1   ;;  %551 = vperm.xlu1 %3665, %v495_v1   ;;  %v503_v6 = vshrl.u32 %v502_v4, 7  ;;  %v602_v9 = vld [vmem:[%s6117_s4] sm:$0xf]  ;;  %s3787_s29 = smov 32   ;;  %s3788_s30 = smov 34   ;;  %vm702_vm1 = vcmask 60416  }
  0x12   : > { %v3555_v11 = vld [vmem:[%s6115_s2 + $0x1] ss:$2 sm:$0x3]  ;;  %v641_v14 = vld [vmem:[#allocation2] sm:$0x1]  ;;  %p475_p3 = scmp.lt.s32.totalorder %s3544_s16, 1 }
  0x13   : > { %v3967_v8 = vsub.s32 1, %v503_v6  ;;  %v3978_v13 = vsub.s32 0, %v503_v6  ;;  %v492_v15 = vld [vmem:[%s6115_s2] ss:$2 sm:$0x3]  ;;  %v508_v19 = vsub.s32 4, %v503_v6 }
  0x14   : > { %s6553_s16 = smov (!%p475_p3, %s3544_s16), 1  ;;  %v534_v20 = vsub.s32 5, %v503_v6  ;;  %v4008_v22 = vsub.s32 2, %v503_v6  ;;  %v560_v23 = vsub.s32 6, %v503_v6  ;;  %v4010_v25 = vsub.s32 3, %v503_v6  ;;  %s3789_s22 = smov 17  }
  0x15   : > { %618 = vperm.xlu0 %3664, %v615_v5   ;;  %3666 = vset.pattern.permute.xlu1 %v6137_v7  ;;  %v1219_v12 = vrot.slane %v3555_v11, %v3967_v8  ;;  %v3984_v16 = vrot.slane %v492_v15, %v3967_v8  ;;  %v1215_v17 = vrot.slane %v3555_v11, %v3978_v13  ;;  %s4002_s17 = sshll.u32 %s6553_s16, 3  ;;  %v586_v26 = vsub.s32 7, %v503_v6  ;;  %s3792_s18 = smov 40  }
  0x16   : > { %577 = vperm.xlu1 %3666, %v495_v1   ;;  %v3990_v18 = vrot.slane %v492_v15, %v3978_v13  ;;  %s479_s19 = scalar_lea.vmem %s6113_s0, %s4002_s17  ;;  %s484_s21 = scalar_lea.vmem %s6114_s1, %s4002_s17  ;;  %vm751_vm2 = vcmask 64512   ;;  %vm755_vm3 = vcmask 195584   ;;  %vm753_vm4 = vcmask 130048  }
  0x17   : > { %6239 = vst [vmem:[#allocation3_spill] sm:$0xff] %v3984_v16  ;;  %v490_v21 = vld [vmem:[%s479_s19] sm:$0xff]  ;;  %s3793_s6 = smov 48   ;;  %s3794_s19 = smov 56   ;;  %vm759_vm5 = vcmask 326656   ;;  %vm757_vm6 = vcmask 261120  }
  0x18   : > { %6240 = vst [vmem:[#allocation4_spill] sm:$0xff] %v3990_v18  ;;  %v505_v27 = vrot.slane %v490_v21, %v3978_v13  ;;  %v509_v28 = vrot.slane %v490_v21, %v508_v19  ;;  %v531_v29 = vrot.slane %v490_v21, %v3967_v8  ;;  %v535_v30 = vrot.slane %v490_v21, %v534_v20  ;;  %v491_v0 = vld [vmem:[%s484_s21] sm:$0xff]  ;;  %s3795_s16 = smov 64   ;;  %s3838_s20 = smov 127  }
  0x19   : > { %3668 = vset.pattern.permute.xlu0 %v6128_v10  ;;  %v557_v31 = vrot.slane %v490_v21, %v4008_v22  ;;  %v561_v32 = vrot.slane %v490_v21, %v560_v23  ;;  %v583_v34 = vrot.slane %v490_v21, %v4010_v25  ;;  %v587_v35 = vrot.slane %v490_v21, %v586_v26  ;;  %s3850_s21 = smov 126   ;;  %s3864_s23 = smov 112  }
  0x1a   : > { %525 = vperm.xlu0 %3668, %v495_v1   ;;  %3667 = vset.pattern.permute.xlu1 %v6143_v2  ;;  %v515_v37 = vrot.slane %v505_v27, %v3978_v13  ;;  %v519_v38 = vrot.slane %v509_v28, %v3978_v13  ;;  %v541_v39 = vrot.slane %v531_v29, %v3967_v8  ;;  %vm761_vm7 = vcmask 392192   ;;  %s3867_s24 = smov 111   ;;  %s3868_s25 = smov 110  }
  0x1b   : > { %605 = vperm.xlu1 %3667, %v602_v9   ;;  %v545_v40 = vrot.slane %v535_v30, %v3967_v8  ;;  %v567_v41 = vrot.slane %v557_v31, %v4008_v22  ;;  %v571_v42 = vrot.slane %v561_v32, %v4008_v22  ;;  %v593_v43 = vrot.slane %v583_v34, %v4010_v25 }
  0x1c   : > { %v597_v44 = vrot.slane %v587_v35, %v4010_v25  ;;  %vm763_vm8 = vcmask 457728   ;;  %vm765_vm9 = vcmask 523264   ;;  %vm777_vm10 = vcmask 138240  }
  0x1d   : > { %v3852_v2 = vmov 50   ;;  %vm1224_vm11 = vcmask 15360   ;;  %vm1976_vm12 = vcmask 146432   ;;  %vm2728_vm13 = vcmask 277504  }
  0x1e   : > { %1222 = vrot.lane.b32.xlu0 %v1219_v12, %s3784_s26  ;;  %vm966_vm14 = vcmask 1039360   ;;  %vm1263_vm15 = vcmask 1031168  }
  0x1f   : > { %644 = vperm.xlu1 %3667, %v641_v14  }
  0x22   : > { %1510 = vrot.lane.b32.xlu0 %v3984_v16, %s3785_s27 }
  0x23   : > { %1220 = vrot.lane.b32.xlu1 %v1215_v17, %s3784_s26  ;;  %s3869_s26 = smov 96  }
  0x26   : > { %1974 = vrot.lane.b32.xlu0 %v1219_v12, %s3786_s28 }
  0x27   : > { %1508 = vrot.lane.b32.xlu1 %v3990_v18, %s3785_s27 }
  0x2a   : > { %2260 = vrot.lane.b32.xlu0 %v3990_v18, %s3787_s29 }
  0x2b   : > { %1972 = vrot.lane.b32.xlu1 %v1215_v17, %s3786_s28  ;;  %s3790_s28 = smov 8  }
  0x2f   : > { %2262 = vrot.lane.b32.xlu1 %v3984_v16, %s3787_s29 }
  0x33   : > { %2724 = vrot.lane.b32.xlu1 %v1215_v17, %s3788_s30 }
  0x37   : > { %2726 = vrot.lane.b32.xlu1 %v1219_v12, %s3788_s30  ;;  %s3791_s30 = smov 24  }
  0x90   : > { %v499_v24 = vpop.permute.xlu0 %498  ;;  %v552_v36 = vpop.permute.xlu1 %551 }
  0x91   : > { %v520_v46 = vmul.f32 %v515_v37, %v499_v24  ;;  %v521_v47 = vmul.f32 %v519_v38, %v499_v24  ;;  %v572_v50 = vmul.f32 %v567_v41, %v552_v36  ;;  %v573_v51 = vmul.f32 %v571_v42, %v552_v36 }
  0x94   : > { %v619_v33 = vpop.permute.xlu0 %618 }
  0x95   : > { %v578_v52 = vpop.permute.xlu1 %577 }
  0x96   : > { %v598_v53 = vmul.f32 %v593_v43, %v578_v52  ;;  %v599_v54 = vmul.f32 %v597_v44, %v578_v52 }
  0x99   : > { %v526_v45 = vpop.permute.xlu0 %525 }
  0x9a   : > { %v546_v48 = vmul.f32 %v541_v39, %v526_v45  ;;  %v547_v49 = vmul.f32 %v545_v40, %v526_v45  ;;  %v606_v61 = vpop.permute.xlu1 %605 }
  0x9c   : > { %v548_v55 = vadd.f32 %v546_v48, %v520_v46  ;;  %v549_v56 = vadd.f32 %v547_v49, %v521_v47 }
  0x9e   : > { %v574_v57 = vadd.f32 %v572_v50, %v548_v55  ;;  %v575_v58 = vadd.f32 %v573_v51, %v549_v56  ;;  %v645_v24 = vpop.permute.xlu1 %644 }
  0x9f   : > { %v650_v30 = vrot.slane %v645_v24, %v3978_v13 }
  0xa0   : > { %v600_v59 = vadd.f32 %v598_v53, %v574_v57  ;;  %v601_v60 = vadd.f32 %v599_v54, %v575_v58 }
  0xa2   : > { %v608_v62 = vadd.f32 %v606_v61, %v600_v59  ;;  %v609_v63 = vadd.f32 %v606_v61, %v601_v60  ;;  %v4043_v59 = vpop.permute.xlu1 %1220 }
  0xa3   : > { %6241 = vst [vmem:[#allocation5_spill] sm:$0xff] %v4043_v59 }
  0xa4   : > { %v612_v1 = vcombine.low %v608_v62, %v609_v63  ;;  %775 = vrot.lane.b32.xlu0 %v609_v63, %s3789_s22  ;;  %773 = vrot.lane.b32.xlu1 %v608_v62, %s3789_s22  ;;  %v679_v36 = vsel %vm626_vm0, %v608_v62, -inf  ;;  %v680_v37 = vsel %vm626_vm0, %v609_v63, -inf  ;;  %v672_v39 = vsel %vm626_vm0, %v608_v62, 0.0  ;;  %v4049_v62 = vpop.permute.xlu0 %1222 }
  0xa5   : > { %v681_v38 = vmax.f32 %v679_v36, %v680_v37  ;;  %v673_v40 = vsel %vm626_vm0, %v609_v63, 0.0  ;;  %6244 = vst [vmem:[#allocation8_spill] sm:$0xff] %v4049_v62 }
  0xa6   : > { %v614_v4 = vsub.f32 %v491_v0, %v612_v1  ;;  %v674_v43 = vadd.f32 %v673_v40, %v672_v39  ;;  %v4045_v60 = vpop.permute.xlu1 %1508 }
  0xa7   : > { %6242 = vst [vmem:[#allocation6_spill] sm:$0xff] %v4045_v60 }
  0xa8   : > { %v622_v5 = vcombine.high %v614_v4, %v614_v4  ;;  %v624_v6 = vmul.f32 %v619_v33, %v614_v4  ;;  %v4053_v0 = vpop.permute.xlu0 %1510 }
  0xa9   : > { %6246 = vst [vmem:[#allocation10_spill] sm:$0xff] %v4053_v0 }
  0xaa   : > { %v625_v9 = vmul.f32 %v622_v5, %v619_v33  ;;  %v627_v11 = vsel %vm626_vm0, %v624_v6, 0.0  ;;  %v4047_v61 = vpop.permute.xlu1 %1972 }
  0xab   : > { %v628_v12 = vrot.slane %v627_v11, 4  ;;  %6243 = vst [vmem:[#allocation7_spill] sm:$0xff] %v4047_v61 }
  0xac   : > { %v634_v14 = vsel %vm626_vm0, %v625_v9, 0.0 }
  0xad   : > { %v629_v15 = vadd.f32 %v628_v12, %v627_v11  ;;  %v635_v17 = vrot.slane %v634_v14, 4 }
  0xae   : > { %v4051_v63 = vpop.permute.xlu1 %2262 }
  0xaf   : > { %v630_v19 = vrot.slane %v629_v15, 2  ;;  %v636_v20 = vadd.f32 %v635_v17, %v634_v14  ;;  %6245 = vst [vmem:[#allocation9_spill] sm:$0xff] %v4051_v63  ;;  %v3859_v63 = vmov 60  }
  0xb1   : > { %v631_v21 = vadd.f32 %v630_v19, %v629_v15  ;;  %v637_v23 = vrot.slane %v636_v20, 2  ;;  %v700_v19 = vld [vmem:[%s6120_s7] sm:$0xf] }
  0xb2   : > { %v4055_v1 = vpop.permute.xlu1 %2724 }
  0xb3   : > { %v632_v26 = vrot.slane %v631_v21, 1  ;;  %v638_v27 = vadd.f32 %v637_v23, %v636_v20  ;;  %6247 = vst [vmem:[#allocation11_spill] sm:$0xff] %v4055_v1 }
  0xb5   : > { %v633_v28 = vadd.f32 %v632_v26, %v631_v21  ;;  %v639_v29 = vrot.slane %v638_v27, 1 }
  0xb6   : > { %v4059_v5 = vpop.permute.xlu1 %2726 }
  0xb7   : > { %v640_v31 = vadd.f32 %v639_v29, %v638_v27  ;;  %v651_v32 = vadd.f32 %v650_v30, %v633_v28  ;;  %6249 = vst [vmem:[#allocation13_spill] sm:$0xff] %v4059_v5  ;;  %v3855_v5 = vmov 54  }
  0xb9   : > { %v652_v33 = vadd.f32 %v650_v30, %v640_v31  ;;  %v3556_v34 = vmul.f32 -1.442695, %v651_v32  ;;  %v710_v30 = vld [vmem:[%s6120_s7 + $0x4] sm:$0xf] }
  0xbb   : > { %3760 = vpow2.f32 %v3556_v34  ;;  %v3557_v35 = vmul.f32 -1.442695, %v652_v33 }
  0xbd   : > { %3762 = vpow2.f32 %v3557_v35 }
  0xc3   : > { %682 = vmax.xlane.f32.xlu0 %v681_v38 }
  0xc5   : > { %v3761_v41 = vpop.eup %3760 }
  0xc6   : > { %v659_v42 = vadd.f32 1.0, %v3761_v41 }
  0xc7   : > { %v3763_v44 = vpop.eup %3762 }
  0xc8   : > { %v660_v45 = vadd.f32 1.0, %v3763_v44  ;;  %3764 = vrcp.f32 %v659_v42  ;;  %675 = vadd.xlane.f32.xlu1 %v674_v43 }
  0xca   : > { %3766 = vrcp.f32 %v660_v45 }
  0xd2   : > { %v3765_v46 = vpop.eup %3764 }
  0xd3   : > { %v665_v48 = vadd.f32 1.0, %v3765_v46 }
  0xd4   : > { %v3767_v47 = vpop.eup %3766 }
  0xd5   : > { %v666_v49 = vadd.f32 1.0, %v3767_v47 }
  0xd7   : > { %v669_v50 = vcombine.low %v665_v48, %v666_v49 }
  0xd9   : > { %v671_v51 = vmul.f32 %v669_v50, %v614_v4  ;;  %v4057_v4 = vpop.permute.xlu0 %1974 }
  0xda   : > { %6248 = vst [vmem:[#allocation12_spill] sm:$0xff] %v4057_v4  ;;  %v3861_v4 = vmov 63  }
  0xdb   : > { %784 = vrot.lane.b32.xlu1 %v671_v51, %s3789_s22  ;;  %v686_v52 = vcombine.high %v671_v51, %v671_v51  ;;  %v688_v53 = vsel %vm626_vm0, %v671_v51, 0.0  ;;  %v694_v54 = vsel %vm626_vm0, %v671_v51, -inf }
  0xdd   : > { %786 = vrot.lane.b32.xlu0 %v686_v52, %s3789_s22  ;;  %v689_v55 = vsel %vm626_vm0, %v686_v52, 0.0  ;;  %v695_v56 = vsel %vm626_vm0, %v686_v52, -inf  ;;  %v4063_v9 = vpop.permute.xlu0 %2260  ;;  %vm1550_vm0 = vcmask 916480  }
  0xde   : > { %v690_v57 = vadd.f32 %v689_v55, %v688_v53  ;;  %v696_v58 = vmax.f32 %v694_v54, %v695_v56  ;;  %6250 = vst [vmem:[#allocation14_spill] sm:$0xff] %v4063_v9 }
  0xfc   : > { %691 = vadd.xlane.f32.xlu0 %v690_v57 }
  0xff   : > { %697 = vmax.xlane.f32.xlu1 %v696_v58 }
 0x116   : > { %v4061_v6 = vpop.permute.xlu1 %773  ;;  %v4065_v12 = vpop.permute.xlu0 %775 }
 0x150   : > { %v683_v15 = vpop.xlane.xlu0 %682 }
 0x154   : > { %v4070_v21 = vpop.permute.xlu0 %786 }
 0x155   : > { %v676_v11 = vpop.xlane.xlu1 %675 }
 0x156   : > { %v678_v14 = vmul.f32 0.00390625, %v676_v11 }
 0x158   : > { %v684_v17 = vadd.f32 %v683_v15, %v678_v14 }
 0x159   : > { %v4072_v24 = vpop.permute.xlu1 %784 }
 0x15a   : > { %v701_v20 = vmul.f32 %v700_v19, %v684_v17 }
 0x15c   : > { %v703_v23 = vsel %vm702_vm1, %v701_v20, 0.0 }
 0x15d   : > { %v704_v26 = vrot.slane %v703_v23, 4 }
 0x15f   : > { %v705_v29 = vadd.f32 %v704_v26, %v703_v23  ;;  %v767_v23 = vld [vmem:[%s6121_s8] sm:$0xf] }
 0x161   : > { %v706_v34 = vrot.slane %v705_v29, 2 }
 0x163   : > { %v707_v37 = vadd.f32 %v706_v34, %v705_v29  ;;  %v6139_v29 = vmov 4   ;;  %v6133_v34 = vmov 6  }
 0x165   : > { %v708_v40 = vrot.slane %v707_v37, 1 }
 0x167   : > { %v709_v43 = vadd.f32 %v708_v40, %v707_v37  ;;  %v3804_v37 = vmov 52   ;;  %v3807_v40 = vmov 11  }
 0x189   : > { %v692_v27 = vpop.xlane.xlu0 %691 }
 0x18a   : > { %v693_v28 = vmul.f32 0.00390625, %v692_v27 }
 0x18c   : > { %v698_v31 = vpop.xlane.xlu1 %697 }
 0x18d   : > { %v699_v32 = vadd.f32 %v698_v31, %v693_v28  ;;  %v3798_v31 = vmov 9  }
 0x18f   : > { %v711_v33 = vmul.f32 %v710_v30, %v699_v32  ;;  %v6131_v30 = vmov 7   ;;  %v6135_v32 = vmov 5  }
 0x191   : > { %v712_v35 = vsel %vm702_vm1, %v711_v33, 0.0  ;;  %v3800_v33 = vmov 46   ;;  %vm1811_vm1 = vcmask 908288  }
 0x192   : > { %v713_v36 = vrot.slane %v712_v35, 4 }
 0x194   : > { %v714_v38 = vadd.f32 %v713_v36, %v712_v35  ;;  %v3802_v35 = vmov 49   ;;  %v6129_v36 = vmov 8  }
 0x196   : > { %v715_v39 = vrot.slane %v714_v38, 2 }
 0x198   : > { %v716_v41 = vadd.f32 %v715_v39, %v714_v38  ;;  %v3805_v38 = vmov 10   ;;  %v3806_v39 = vmov 55  }
 0x19a   : > { %v717_v42 = vrot.slane %v716_v41, 1 }
 0x19c   : > { %v718_v44 = vadd.f32 %v717_v42, %v716_v41  ;;  %v3808_v41 = vmov 58   ;;  %v3809_v42 = vmov 12  }
 0x19e   : > { %v719_v45 = vadd.f32 %v718_v44, %v709_v43  ;;  %v3810_v43 = vmov 61   ;;  %v3811_v44 = vmov 13  }
 0x1a0   : > { %v3558_v46 = vmul.f32 -1.442695, %v719_v45  ;;  %v3812_v45 = vmov 64  }
 0x1a2   : > { %3768 = vpow2.f32 %v3558_v46  ;;  %v3813_v46 = vmov 14  }
 0x1ac   : > { %v3769_v47 = vpop.eup %3768 }
 0x1ad   : > { %v723_v48 = vadd.f32 1.0, %v3769_v47  ;;  %v3814_v47 = vmov 65  }
 0x1af   : > { %3770 = vrcp.f32 %v723_v48  ;;  %v3815_v48 = vmov 15  }
 0x1b9   : > { %v3771_v49 = vpop.eup %3770 }
 0x1ba   : > { %730 = vrot.lane.b32.xlu1 %v3771_v49, %s3785_s27  ;;  %727 = vrot.lane.b32.xlu0 %v3771_v49, %s3790_s28  ;;  %s3870_s28 = smov 95  }
 0x1be   : > { %733 = vrot.lane.b32.xlu1 %v3771_v49, %s3791_s30  ;;  %736 = vrot.lane.b32.xlu0 %v3771_v49, %s3787_s29  ;;  %s3871_s30 = smov 94  }
 0x1c2   : > { %739 = vrot.lane.b32.xlu1 %v3771_v49, %s3792_s18  ;;  %742 = vrot.lane.b32.xlu0 %v3771_v49, %s3793_s6 }
 0x1c6   : > { %745 = vrot.lane.b32.xlu1 %v3771_v49, %s3794_s19  ;;  %748 = vrot.lane.b32.xlu0 %v3771_v49, %s3795_s16 }
 0x22c   : > { %v731_v50 = vpop.permute.xlu1 %730  ;;  %v728_v51 = vpop.permute.xlu0 %727 }
 0x22d   : > { %v752_v52 = vsel %vm751_vm2, %v3771_v49, %v728_v51  ;;  %v3816_v49 = vmov 68   ;;  %v3818_v51 = vmov 71   ;;  %vm2015_vm2 = vcmask 900096  }
 0x22e   : > { %v754_v54 = vsel %vm753_vm4, %v752_v52, %v731_v50  ;;  %v3817_v50 = vmov 16   ;;  %v3819_v52 = vmov 17  }
 0x230   : > { %v734_v53 = vpop.permute.xlu1 %733  ;;  %v737_v55 = vpop.permute.xlu0 %736 }
 0x231   : > { %v756_v56 = vsel %vm755_vm3, %v754_v54, %v734_v53  ;;  %v3820_v53 = vmov 18   ;;  %v3821_v54 = vmov 19   ;;  %vm2302_vm3 = vcmask 785408  }
 0x232   : > { %v758_v57 = vsel %vm757_vm6, %v756_v56, %v737_v55  ;;  %v3822_v55 = vmov 20   ;;  %v3823_v56 = vmov 21  }
 0x234   : > { %v740_v58 = vpop.permute.xlu1 %739  ;;  %v743_v11 = vpop.permute.xlu0 %742 }
 0x235   : > { %v760_v14 = vsel %vm759_vm5, %v758_v57, %v740_v58  ;;  %v3824_v57 = vmov 22   ;;  %v3825_v58 = vmov 23   ;;  %vm2767_vm5 = vcmask 769024  }
 0x236   : > { %v762_v15 = vsel %vm761_vm7, %v760_v14, %v743_v11  ;;  %v3826_v11 = vmov 24   ;;  %v3827_v14 = vmov 25  }
 0x238   : > { %v746_v17 = vpop.permute.xlu1 %745  ;;  %v749_v19 = vpop.permute.xlu0 %748 }
 0x239   : > { %v764_v20 = vsel %vm763_vm8, %v762_v15, %v746_v17  ;;  %v3828_v15 = vmov 26   ;;  %v3829_v17 = vmov 27  }
 0x23a   : > { %v766_v26 = vsel %vm765_vm9, %v764_v20, %v749_v19  ;;  %v3830_v19 = vmov 28   ;;  %v4137_v20 = vsel %vm777_vm10, %v4061_v6, %v4065_v12 }
 0x23b   : > { %v771_v27 = vrot.slane %v766_v26, %v3978_v13  ;;  %v3831_v26 = vmov 29  }
 0x23d   : > { %v4085_v28 = vmul.f32 %v771_v27, %v767_v23  ;;  %v4141_v23 = vsel %vm777_vm10, 0.0, %v4061_v6  ;;  %v4153_v6 = vsel %vm777_vm10, %v4072_v24, %v4070_v21 }
 0x23e   : > { %v805_v27 = vmul.f32 %v3990_v18, %v4141_v23 }
 0x23f   : > { %827 = vperm.xlu0 %3668, %v4085_v28   ;;  %811 = vperm.xlu1 %3667, %v4085_v28  }
 0x243   : > { %3671 = vset.pattern.permute.xlu0 %v6139_v29  ;;  %3669 = vset.pattern.permute.xlu1 %v6141_v3  ;;  %v3851_v29 = vmov 48  }
 0x244   : > { %875 = vperm.xlu0 %3671, %v4085_v28   ;;  %843 = vperm.xlu1 %3669, %v4085_v28  }
 0x248   : > { %3674 = vset.pattern.permute.xlu0 %v6131_v30  ;;  %3670 = vset.pattern.permute.xlu1 %v6137_v7  ;;  %v3849_v30 = vmov 47  }
 0x249   : > { %923 = vperm.xlu0 %3674, %v4085_v28   ;;  %859 = vperm.xlu1 %3670, %v4085_v28  }
 0x24d   : > { %3676 = vset.pattern.permute.xlu0 %v3798_v31  ;;  %3672 = vset.pattern.permute.xlu1 %v6135_v32  ;;  %v806_v31 = vmul.f32 %v3984_v16, %v4137_v20 }
 0x24e   : > { %974 = vperm.xlu0 %3676, %v4085_v28   ;;  %891 = vperm.xlu1 %3672, %v4085_v28  }
 0x252   : > { %3713 = vset.pattern.permute.xlu0 %v3800_v33  ;;  %3673 = vset.pattern.permute.xlu1 %v6133_v34 }
 0x253   : > { %2193 = vperm.xlu0 %3713, %v4085_v28   ;;  %907 = vperm.xlu1 %3673, %v4085_v28  }
 0x257   : > { %3716 = vset.pattern.permute.xlu0 %v3802_v35  ;;  %3675 = vset.pattern.permute.xlu1 %v6129_v36  ;;  %v833_v35 = vrot.slane %v805_v27, %v3967_v8 }
 0x258   : > { %2310 = vperm.xlu0 %3716, %v4085_v28   ;;  %939 = vperm.xlu1 %3675, %v4085_v28  }
 0x25c   : > { %3719 = vset.pattern.permute.xlu0 %v3804_v37  ;;  %3677 = vset.pattern.permute.xlu1 %v3805_v38  ;;  %v837_v37 = vrot.slane %v806_v31, %v3967_v8 }
 0x25d   : > { %2412 = vperm.xlu0 %3719, %v4085_v28   ;;  %1008 = vperm.xlu1 %3677, %v4085_v28  }
 0x261   : > { %3722 = vset.pattern.permute.xlu0 %v3806_v39  ;;  %3678 = vset.pattern.permute.xlu1 %v3807_v40  ;;  %v3832_v39 = vmov 30   ;;  %v4157_v40 = vsel %vm777_vm10, 0.0, %v4072_v24  ;;  %v808_v24 = vmul.f32 %v3984_v16, %v4153_v6 }
 0x262   : > { %2514 = vperm.xlu0 %3722, %v4085_v28   ;;  %1042 = vperm.xlu1 %3678, %v4085_v28   ;;  %6251 = vst [vmem:[#allocation15_spill] sm:$0xff] %v4157_v40 }
 0x266   : > { %3725 = vset.pattern.permute.xlu0 %v3808_v41  ;;  %3679 = vset.pattern.permute.xlu1 %v3809_v42  ;;  %v817_v41 = vrot.slane %v805_v27, %v3978_v13  ;;  %v821_v42 = vrot.slane %v806_v31, %v3978_v13 }
 0x267   : > { %2593 = vperm.xlu0 %3725, %v4085_v28   ;;  %1076 = vperm.xlu1 %3679, %v4085_v28  }
 0x26b   : > { %3728 = vset.pattern.permute.xlu0 %v3810_v43  ;;  %3680 = vset.pattern.permute.xlu1 %v3811_v44  ;;  %v849_v43 = vrot.slane %v805_v27, %v4008_v22  ;;  %v853_v44 = vrot.slane %v806_v31, %v4008_v22 }
 0x26c   : > { %2659 = vperm.xlu0 %3728, %v4085_v28   ;;  %1110 = vperm.xlu1 %3680, %v4085_v28  }
 0x270   : > { %3731 = vset.pattern.permute.xlu0 %v3812_v45  ;;  %3681 = vset.pattern.permute.xlu1 %v3813_v46 }
 0x271   : > { %2740 = vperm.xlu0 %3731, %v4085_v28   ;;  %1144 = vperm.xlu1 %3681, %v4085_v28  }
 0x275   : > { %3732 = vset.pattern.permute.xlu0 %v3814_v47  ;;  %3682 = vset.pattern.permute.xlu1 %v3815_v48 }
 0x276   : > { %2775 = vperm.xlu0 %3732, %v4085_v28   ;;  %1178 = vperm.xlu1 %3682, %v4085_v28  }
 0x27a   : > { %3735 = vset.pattern.permute.xlu0 %v3816_v49  ;;  %3683 = vset.pattern.permute.xlu1 %v3817_v50  ;;  %v807_v50 = vmul.f32 %v3990_v18, %v4157_v40  ;;  %v3853_v18 = vmov 51  }
 0x27b   : > { %2877 = vperm.xlu0 %3735, %v4085_v28   ;;  %1236 = vperm.xlu1 %3683, %v4085_v28  }
 0x27f   : > { %3738 = vset.pattern.permute.xlu0 %v3818_v51  ;;  %3684 = vset.pattern.permute.xlu1 %v3819_v52 }
 0x280   : > { %2979 = vperm.xlu0 %3738, %v4085_v28   ;;  %1271 = vperm.xlu1 %3684, %v4085_v28  }
 0x284   : > { %3685 = vset.pattern.permute.xlu1 %v3820_v53  ;;  %3740 = vset.pattern.permute.xlu0 %v6128_v10  ;;  %v3833_v53 = vmov 31  }
 0x285   : > { %1305 = vperm.xlu1 %3685, %v4085_v28  }
 0x289   : > { %3686 = vset.pattern.permute.xlu1 %v3821_v54  ;;  %v865_v54 = vrot.slane %v805_v27, %v4010_v25 }
 0x28a   : > { %1339 = vperm.xlu1 %3686, %v4085_v28  }
 0x28e   : > { %3687 = vset.pattern.permute.xlu1 %v3822_v55 }
 0x28f   : > { %1373 = vperm.xlu1 %3687, %v4085_v28  }
 0x293   : > { %3688 = vset.pattern.permute.xlu1 %v3823_v56 }
 0x294   : > { %1407 = vperm.xlu1 %3688, %v4085_v28  }
 0x298   : > { %3689 = vset.pattern.permute.xlu1 %v3824_v57  ;;  %v869_v57 = vrot.slane %v806_v31, %v4010_v25  ;;  %v897_v31 = vrot.slane %v807_v50, %v3967_v8 }
 0x299   : > { %1441 = vperm.xlu1 %3689, %v4085_v28  }
 0x29d   : > { %3690 = vset.pattern.permute.xlu1 %v3825_v58  ;;  %v881_v58 = vrot.slane %v807_v50, %v3978_v13 }
 0x29e   : > { %1475 = vperm.xlu1 %3690, %v4085_v28  }
 0x2a2   : > { %3691 = vset.pattern.permute.xlu1 %v3826_v11  ;;  %v885_v11 = vrot.slane %v808_v24, %v3978_v13 }
 0x2a3   : > { %1523 = vperm.xlu1 %3691, %v4085_v28  }
 0x2a7   : > { %3692 = vset.pattern.permute.xlu1 %v3827_v14 }
 0x2a8   : > { %1558 = vperm.xlu1 %3692, %v4085_v28  }
 0x2ac   : > { %3693 = vset.pattern.permute.xlu1 %v3828_v15 }
 0x2ad   : > { %1592 = vperm.xlu1 %3693, %v4085_v28  }
 0x2b1   : > { %3694 = vset.pattern.permute.xlu1 %v3829_v17 }
 0x2b2   : > { %1626 = vperm.xlu1 %3694, %v4085_v28  }
 0x2b6   : > { %3695 = vset.pattern.permute.xlu1 %v3830_v19 }
 0x2b7   : > { %1660 = vperm.xlu1 %3695, %v4085_v28  }
 0x2bb   : > { %3696 = vset.pattern.permute.xlu1 %v3831_v26 }
 0x2bc   : > { %1694 = vperm.xlu1 %3696, %v4085_v28  }
 0x2be   : > { %v812_v33 = vpop.permute.xlu1 %811  ;;  %v828_v38 = vpop.permute.xlu0 %827 }
 0x2bf   : > { %v838_v45 = vmul.f32 %v833_v35, %v828_v38  ;;  %v839_v46 = vmul.f32 %v837_v37, %v828_v38  ;;  %v822_v47 = vmul.f32 %v817_v41, %v812_v33  ;;  %v823_v48 = vmul.f32 %v821_v42, %v812_v33 }
 0x2c0   : > { %3697 = vset.pattern.permute.xlu1 %v3832_v39  ;;  %v3834_v35 = vmov 32   ;;  %v901_v41 = vrot.slane %v808_v24, %v3967_v8 }
 0x2c1   : > { %1728 = vperm.xlu1 %3697, %v4085_v28   ;;  %v840_v55 = vadd.f32 %v838_v45, %v822_v47  ;;  %v841_v56 = vadd.f32 %v839_v46, %v823_v48  ;;  %v3835_v47 = vmov 33  }
 0x2c3   : > { %v844_v49 = vpop.permute.xlu1 %843  ;;  %v876_v14 = vpop.permute.xlu0 %875 }
 0x2c4   : > { %v854_v51 = vmul.f32 %v849_v43, %v844_v49  ;;  %v855_v52 = vmul.f32 %v853_v44, %v844_v49  ;;  %v886_v37 = vmul.f32 %v881_v58, %v876_v14  ;;  %v887_v38 = vmul.f32 %v885_v11, %v876_v14 }
 0x2c5   : > { %3698 = vset.pattern.permute.xlu1 %v3833_v53  ;;  %v917_v53 = vrot.slane %v808_v24, %v4008_v22  ;;  %v3836_v58 = vmov 34   ;;  %v933_v11 = vrot.slane %v808_v24, %v4010_v25 }
 0x2c6   : > { %1762 = vperm.xlu1 %3698, %v4085_v28   ;;  %v856_v17 = vadd.f32 %v854_v51, %v840_v55  ;;  %v857_v19 = vadd.f32 %v855_v52, %v841_v56  ;;  %v913_v51 = vrot.slane %v807_v50, %v4008_v22  ;;  %v929_v55 = vrot.slane %v807_v50, %v4010_v25 }
 0x2c7   : > { %v4192_v50 = vsel %vm777_vm10, %v4065_v12, 0.0 }
 0x2c8   : > { %v860_v15 = vpop.permute.xlu1 %859  ;;  %v924_v52 = vpop.permute.xlu0 %923  ;;  %6254 = vst [vmem:[#allocation18_spill] sm:$0xff] %v4192_v50  ;;  %v1231_v36 = vmul.f32 %v4049_v62, %v4192_v50 }
 0x2c9   : > { %v870_v26 = vmul.f32 %v865_v54, %v860_v15  ;;  %v871_v33 = vmul.f32 %v869_v57, %v860_v15  ;;  %v934_v14 = vmul.f32 %v929_v55, %v924_v52  ;;  %v3842_v55 = vmov 39  }
 0x2ca   : > { %3699 = vset.pattern.permute.xlu1 %v3834_v35  ;;  %v1250_v7 = vrot.slane %v1231_v36, %v3978_v13 }
 0x2cb   : > { %v872_v39 = vadd.f32 %v870_v26, %v856_v17  ;;  %v873_v27 = vadd.f32 %v871_v33, %v857_v19  ;;  %1796 = vperm.xlu1 %3699, %v4085_v28   ;;  %v935_v19 = vmul.f32 %v933_v11, %v924_v52  ;;  %v4186_v33 = vrot.slane %v4137_v20, %v3978_v13 }
 0x2cd   : > { %v888_v42 = vadd.f32 %v886_v37, %v872_v39  ;;  %v889_v43 = vadd.f32 %v887_v38, %v873_v27  ;;  %v892_v44 = vpop.permute.xlu1 %891  ;;  %6252 = vst [vmem:[#allocation16_spill] sm:$0xff] %v4186_v33  ;;  %v3837_v37 = vmov 35   ;;  %v4198_v39 = vpop.permute.xlu0 %974  ;;  %v4204_v27 = vrot.slane %v4192_v50, %v3967_v8 }
 0x2ce   : > { %v902_v45 = vmul.f32 %v897_v31, %v892_v44  ;;  %v903_v46 = vmul.f32 %v901_v41, %v892_v44  ;;  %v3839_v41 = vmov 36  }
 0x2cf   : > { %3700 = vset.pattern.permute.xlu1 %v3835_v47  ;;  %v991_v31 = vmul.f32 %v4204_v27, %v4198_v39 }
 0x2d0   : > { %v904_v48 = vadd.f32 %v902_v45, %v888_v42  ;;  %v905_v49 = vadd.f32 %v903_v46, %v889_v43  ;;  %1819 = vperm.xlu1 %3700, %v4085_v28   ;;  %v4214_v42 = vrot.slane %v4141_v23, %v4008_v22  ;;  %v3840_v45 = vmov 37  }
 0x2d1   : > { %v4223_v46 = vrot.slane %v4192_v50, %v4008_v22 }
 0x2d2   : > { %v908_v54 = vpop.permute.xlu1 %907  ;;  %v4336_v34 = vpop.permute.xlu0 %2193 }
 0x2d3   : > { %v918_v56 = vmul.f32 %v913_v51, %v908_v54  ;;  %v919_v57 = vmul.f32 %v917_v53, %v908_v54  ;;  %v3841_v51 = vmov 38   ;;  %v4243_v54 = vrot.slane %v4192_v50, %v4010_v25  ;;  %6261 = vst [vmem:[#allocation25_spill] sm:$0xff] %v4336_v34 }
 0x2d4   : > { %3701 = vset.pattern.permute.xlu1 %v3836_v58  ;;  %v4255_v58 = vsel %vm777_vm10, %v4070_v21, 0.0  ;;  %v3860_v34 = vmov 62  }
 0x2d5   : > { %v920_v15 = vadd.f32 %v918_v56, %v904_v48  ;;  %1841 = vperm.xlu1 %3701, %v4085_v28   ;;  %v921_v17 = vadd.f32 %v919_v57, %v905_v49  ;;  %v4233_v49 = vrot.slane %v4141_v23, %v4010_v25  ;;  %v4251_v57 = vrot.slane %v4157_v40, %v3978_v13 }
 0x2d6   : > { %6256 = vst [vmem:[#allocation20_spill] sm:$0xff] %v4255_v58 }
 0x2d7   : > { %v4182_v26 = vpop.permute.xlu1 %939  ;;  %v4188_v35 = vadd.f32 %v934_v14, %v920_v15  ;;  %v4196_v38 = vadd.f32 %v935_v19, %v921_v17  ;;  %v3843_v15 = vmov 40   ;;  %v4265_v17 = vrot.slane %v4255_v58, %v3978_v13  ;;  %v4348_v3 = vpop.permute.xlu0 %2310 }
 0x2d8   : > { %v955_v24 = vmul.f32 %v4186_v33, %v4182_v26  ;;  %6262 = vst [vmem:[#allocation26_spill] sm:$0xff] %v4348_v3 }
 0x2d9   : > { %6253 = vst [vmem:[#allocation17_spill] sm:$0xff] %v4188_v35  ;;  %3702 = vset.pattern.permute.xlu1 %v3837_v37  ;;  %6255 = vst [vmem:[#allocation19_spill] sm:$0xff] %v4196_v38  ;;  %v4273_v37 = vrot.slane %v4157_v40, %v3967_v8  ;;  %v1319_v38 = vrot.slane %v1231_v36, %v4008_v22  ;;  %v3854_v35 = vmov 53  }
 0x2da   : > { %1863 = vperm.xlu1 %3702, %v4085_v28   ;;  %962 = vrot.lane.b32.xlu0 %v955_v24, %s3838_s20  ;;  %v3844_v24 = vmov 41  }
 0x2dc   : > { %v4206_v12 = vpop.permute.xlu1 %1008  ;;  %v4357_v16 = vpop.permute.xlu0 %2412 }
 0x2dd   : > { %v1023_v44 = vmul.f32 %v4214_v42, %v4206_v12  ;;  %v1025_v47 = vmul.f32 %v4223_v46, %v4206_v12  ;;  %6263 = vst [vmem:[#allocation27_spill] sm:$0xff] %v4357_v16 }
 0x2de   : > { %3703 = vset.pattern.permute.xlu1 %v3839_v41  ;;  %999 = vrot.lane.b32.xlu0 %v991_v31, %s3838_s20 }
 0x2df   : > { %1885 = vperm.xlu1 %3703, %v4085_v28  }
 0x2e1   : > { %v4216_v43 = vpop.permute.xlu1 %1042 }
 0x2e2   : > { %1029 = vrot.lane.b32.xlu0 %v1023_v44, %s3838_s20  ;;  %v1057_v52 = vmul.f32 %v4233_v49, %v4216_v43  ;;  %v1059_v56 = vmul.f32 %v4243_v54, %v4216_v43  ;;  %v4283_v44 = vrot.slane %v4255_v58, %v3967_v8 }
 0x2e3   : > { %3704 = vset.pattern.permute.xlu1 %v3840_v45  ;;  %v3845_v45 = vmov 42  }
 0x2e4   : > { %1907 = vperm.xlu1 %3704, %v4085_v28  }
 0x2e6   : > { %v4228_v48 = vpop.permute.xlu1 %1076  ;;  %1033 = vrot.lane.b32.xlu0 %v1025_v47, %s3838_s20 }
 0x2e7   : > { %v1091_v14 = vmul.f32 %v4251_v57, %v4228_v48  ;;  %v1093_v21 = vmul.f32 %v4265_v17, %v4228_v48 }
 0x2e8   : > { %3705 = vset.pattern.permute.xlu1 %v3841_v51 }
 0x2e9   : > { %1929 = vperm.xlu1 %3705, %v4085_v28  }
 0x2ea   : > { %1063 = vrot.lane.b32.xlu0 %v1057_v52, %s3838_s20  ;;  %v4294_v52 = vrot.slane %v4157_v40, %v4008_v22 }
 0x2eb   : > { %v4239_v53 = vpop.permute.xlu1 %1110 }
 0x2ec   : > { %v1125_v31 = vmul.f32 %v4273_v37, %v4239_v53  ;;  %v1127_v47 = vmul.f32 %v4283_v44, %v4239_v53  ;;  %6257 = vst [vmem:[#allocation21_spill] sm:$0xff] %v4294_v52 }
 0x2ed   : > { %3706 = vset.pattern.permute.xlu1 %v3842_v55  ;;  %v3846_v55 = vmov 43  }
 0x2ee   : > { %1951 = vperm.xlu1 %3706, %v4085_v28   ;;  %1067 = vrot.lane.b32.xlu0 %v1059_v56, %s3838_s20 }
 0x2f0   : > { %v4257_v11 = vpop.permute.xlu1 %1144 }
 0x2f1   : > { %v1159_v56 = vmul.f32 %v4294_v52, %v4257_v11 }
 0x2f2   : > { %3707 = vset.pattern.permute.xlu1 %v3843_v15  ;;  %1097 = vrot.lane.b32.xlu0 %v1091_v14, %s3838_s20  ;;  %v4302_v14 = vrot.slane %v4255_v58, %v4008_v22 }
 0x2f3   : > { %1988 = vperm.xlu1 %3707, %v4085_v28  }
 0x2f4   : > { %6258 = vst [vmem:[#allocation22_spill] sm:$0xff] %v4302_v14 }
 0x2f5   : > { %v4267_v19 = vpop.permute.xlu1 %1178 }
 0x2f6   : > { %1101 = vrot.lane.b32.xlu0 %v1093_v21, %s3838_s20  ;;  %v1161_v21 = vmul.f32 %v4302_v14, %v4257_v11 }
 0x2f7   : > { %3708 = vset.pattern.permute.xlu1 %v3844_v24  ;;  %v3847_v24 = vmov 44  }
 0x2f8   : > { %2023 = vperm.xlu1 %3708, %v4085_v28  }
 0x2fa   : > { %v4279_v41 = vpop.permute.xlu1 %1236  ;;  %1131 = vrot.lane.b32.xlu0 %v1125_v31, %s3838_s20  ;;  %v4312_v31 = vrot.slane %v4157_v40, %v4010_v25 }
 0x2fc   : > { %3709 = vset.pattern.permute.xlu1 %v3845_v45  ;;  %6259 = vst [vmem:[#allocation23_spill] sm:$0xff] %v4312_v31 }
 0x2fd   : > { %2057 = vperm.xlu1 %3709, %v4085_v28  }
 0x2fe   : > { %1135 = vrot.lane.b32.xlu0 %v1127_v47, %s3838_s20  ;;  %v1193_v47 = vmul.f32 %v4312_v31, %v4267_v19  ;;  %v3865_v31 = vmov 69  }
 0x2ff   : > { %v4290_v51 = vpop.permute.xlu1 %1271 }
 0x301   : > { %3710 = vset.pattern.permute.xlu1 %v3846_v55  ;;  %v1229_v55 = vmul.f32 %v4043_v59, %v4141_v23 }
 0x302   : > { %2091 = vperm.xlu1 %3710, %v4085_v28   ;;  %1165 = vrot.lane.b32.xlu0 %v1159_v56, %s3838_s20  ;;  %v3848_v56 = vmov 45  }
 0x304   : > { %v4304_v15 = vpop.permute.xlu1 %1305 }
 0x306   : > { %3711 = vset.pattern.permute.xlu1 %v3847_v24  ;;  %1169 = vrot.lane.b32.xlu0 %v1161_v21, %s3838_s20  ;;  %v4323_v21 = vrot.slane %v4255_v58, %v4010_v25 }
 0x307   : > { %2125 = vperm.xlu1 %3711, %v4085_v28  }
 0x308   : > { %6260 = vst [vmem:[#allocation24_spill] sm:$0xff] %v4323_v21  ;;  %v1195_v24 = vmul.f32 %v4323_v21, %v4267_v19 }
 0x309   : > { %v4314_v45 = vpop.permute.xlu1 %1339 }
 0x30a   : > { %1199 = vrot.lane.b32.xlu0 %v1193_v47, %s3838_s20  ;;  %v1242_v47 = vrot.slane %v1229_v55, %v3978_v13 }
 0x30b   : > { %3712 = vset.pattern.permute.xlu1 %v3848_v56 }
 0x30c   : > { %2159 = vperm.xlu1 %3712, %v4085_v28   ;;  %v1251_v56 = vmul.f32 %v1242_v47, %v4279_v41 }
 0x30e   : > { %v4328_v10 = vpop.permute.xlu1 %1373  ;;  %1203 = vrot.lane.b32.xlu0 %v1195_v24, %s3838_s20  ;;  %v1253_v24 = vmul.f32 %v1250_v7, %v4279_v41  ;;  %v1285_v7 = vrot.slane %v1231_v36, %v3967_v8 }
 0x310   : > { %3714 = vset.pattern.permute.xlu1 %v3849_v30  ;;  %v1277_v30 = vrot.slane %v1229_v55, %v3967_v8 }
 0x311   : > { %2227 = vperm.xlu1 %3714, %v4085_v28  }
 0x312   : > { %1257 = vrot.lane.b32.xlu0 %v1251_v56, %s3850_s21  ;;  %v1286_v56 = vmul.f32 %v1277_v30, %v4290_v51  ;;  %v1311_v30 = vrot.slane %v1229_v55, %v4008_v22 }
 0x313   : > { %v4339_v32 = vpop.permute.xlu1 %1407 }
 0x315   : > { %3715 = vset.pattern.permute.xlu1 %v3851_v29 }
 0x316   : > { %2275 = vperm.xlu1 %3715, %v4085_v28   ;;  %1261 = vrot.lane.b32.xlu0 %v1253_v24, %s3850_s21  ;;  %v1288_v24 = vmul.f32 %v1285_v7, %v4290_v51  ;;  %v4367_v7 = vpop.permute.xlu0 %2514 }
 0x317   : > { %6264 = vst [vmem:[#allocation28_spill] sm:$0xff] %v4367_v7  ;;  %v1232_v7 = vmul.f32 %v4043_v59, %v4157_v40 }
 0x318   : > { %v4346_v47 = vpop.permute.xlu1 %1441 }
 0x31a   : > { %3717 = vset.pattern.permute.xlu1 %v3852_v2  ;;  %1292 = vrot.lane.b32.xlu0 %v1286_v56, %s3850_s21  ;;  %v1320_v2 = vmul.f32 %v1311_v30, %v4304_v15 }
 0x31b   : > { %2344 = vperm.xlu1 %3717, %v4085_v28  }
 0x31d   : > { %v4354_v29 = vpop.permute.xlu1 %1475 }
 0x31e   : > { %1296 = vrot.lane.b32.xlu0 %v1288_v24, %s3850_s21  ;;  %v1345_v24 = vrot.slane %v1229_v55, %v4010_v25 }
 0x31f   : > { %3718 = vset.pattern.permute.xlu1 %v3853_v18  ;;  %v1322_v18 = vmul.f32 %v1319_v38, %v4304_v15 }
 0x320   : > { %2378 = vperm.xlu1 %3718, %v4085_v28   ;;  %v1354_v30 = vmul.f32 %v1345_v24, %v4314_v45  ;;  %v1379_v24 = vrot.slane %v1232_v7, %v3978_v13 }
 0x322   : > { %v4363_v56 = vpop.permute.xlu1 %1523  ;;  %1326 = vrot.lane.b32.xlu0 %v1320_v2, %s3850_s21  ;;  %v4377_v2 = vpop.permute.xlu0 %2593 }
 0x323   : > { %6265 = vst [vmem:[#allocation29_spill] sm:$0xff] %v4377_v2  ;;  %v1388_v2 = vmul.f32 %v1379_v24, %v4328_v10  ;;  %v3858_v24 = vmov 59  }
 0x324   : > { %3720 = vset.pattern.permute.xlu1 %v3854_v35  ;;  %v1353_v35 = vrot.slane %v1231_v36, %v4010_v25 }
 0x325   : > { %2446 = vperm.xlu1 %3720, %v4085_v28  }
 0x326   : > { %1330 = vrot.lane.b32.xlu0 %v1322_v18, %s3850_s21  ;;  %v1356_v55 = vmul.f32 %v1353_v35, %v4314_v45  ;;  %v3856_v18 = vmov 56   ;;  %v4391_v36 = vpop.permute.xlu0 %2659  ;;  %v3857_v35 = vmov 57  }
 0x327   : > { %v4373_v1 = vpop.permute.xlu1 %1558  ;;  %6266 = vst [vmem:[#allocation30_spill] sm:$0xff] %v4391_v36  ;;  %v1413_v36 = vrot.slane %v1232_v7, %v3967_v8 }
 0x329   : > { %3721 = vset.pattern.permute.xlu1 %v3855_v5  ;;  %v1234_v5 = vmul.f32 %v4049_v62, %v4255_v58  ;;  %v1422_v9 = vmul.f32 %v1413_v36, %v4339_v32 }
 0x32a   : > { %2480 = vperm.xlu1 %3721, %v4085_v28   ;;  %1360 = vrot.lane.b32.xlu0 %v1354_v30, %s3850_s21 }
 0x32b   : > { %v1387_v16 = vrot.slane %v1234_v5, %v3978_v13 }
 0x32c   : > { %v4383_v38 = vpop.permute.xlu1 %1592 }
 0x32e   : > { %3723 = vset.pattern.permute.xlu1 %v3856_v18  ;;  %1364 = vrot.lane.b32.xlu0 %v1356_v55, %s3850_s21  ;;  %v1390_v18 = vmul.f32 %v1387_v16, %v4328_v10  ;;  %v4402_v55 = vpop.permute.xlu0 %2740 }
 0x32f   : > { %2548 = vperm.xlu1 %3723, %v4085_v28   ;;  %6267 = vst [vmem:[#allocation31_spill] sm:$0xff] %v4402_v55 }
 0x331   : > { %v4394_v30 = vpop.permute.xlu1 %1626 }
 0x332   : > { %1394 = vrot.lane.b32.xlu0 %v1388_v2, %s3850_s21  ;;  %v1421_v2 = vrot.slane %v1234_v5, %v3967_v8  ;;  %v4412_v16 = vpop.permute.xlu0 %2775 }
 0x333   : > { %3724 = vset.pattern.permute.xlu1 %v3857_v35  ;;  %6268 = vst [vmem:[#allocation32_spill] sm:$0xff] %v4412_v16  ;;  %v1455_v16 = vrot.slane %v1234_v5, %v4008_v22 }
 0x334   : > { %2571 = vperm.xlu1 %3724, %v4085_v28   ;;  %v1424_v55 = vmul.f32 %v1421_v2, %v4339_v32 }
 0x336   : > { %v4400_v3 = vpop.permute.xlu1 %1660  ;;  %1398 = vrot.lane.b32.xlu0 %v1390_v18, %s3850_s21  ;;  %v1447_v18 = vrot.slane %v1232_v7, %v4008_v22 }
 0x338   : > { %3726 = vset.pattern.permute.xlu1 %v3858_v24  ;;  %v1456_v24 = vmul.f32 %v1447_v18, %v4346_v47 }
 0x339   : > { %2615 = vperm.xlu1 %3726, %v4085_v28  }
 0x33a   : > { %1428 = vrot.lane.b32.xlu0 %v1422_v9, %s3850_s21  ;;  %v4421_v9 = vpop.permute.xlu0 %2877 }
 0x33b   : > { %v4410_v35 = vpop.permute.xlu1 %1694  ;;  %6269 = vst [vmem:[#allocation33_spill] sm:$0xff] %v4421_v9 }
 0x33d   : > { %3727 = vset.pattern.permute.xlu1 %v3859_v63  ;;  %v1458_v63 = vmul.f32 %v1455_v16, %v4346_v47  ;;  %v1516_v16 = vmul.f32 %v4045_v60, %v4141_v23 }
 0x33e   : > { %2637 = vperm.xlu1 %3727, %v4085_v28   ;;  %1432 = vrot.lane.b32.xlu0 %v1424_v55, %s3850_s21  ;;  %v1481_v55 = vrot.slane %v1232_v7, %v4010_v25  ;;  %v3862_v7 = vmov 66  }
 0x33f   : > { %v1598_v14 = vrot.slane %v1516_v16, %v4008_v22 }
 0x340   : > { %v4418_v36 = vpop.permute.xlu1 %1728  ;;  %v1490_v18 = vmul.f32 %v1481_v55, %v4354_v29  ;;  %v4447_v55 = vmul.f32 %v4053_v0, %v4192_v50 }
 0x342   : > { %3729 = vset.pattern.permute.xlu1 %v3860_v34  ;;  %1462 = vrot.lane.b32.xlu0 %v1456_v24, %s3850_s21  ;;  %v4432_v34 = vpop.permute.xlu0 %2979  ;;  %v1489_v24 = vrot.slane %v1234_v5, %v4010_v25  ;;  %v1606_v52 = vrot.slane %v4447_v55, %v4008_v22 }
 0x343   : > { %2681 = vperm.xlu1 %3729, %v4085_v28   ;;  %6270 = vst [vmem:[#allocation34_spill] sm:$0xff] %v4432_v34  ;;  %v1529_v34 = vrot.slane %v1516_v16, %v3978_v13 }
 0x345   : > { %v4427_v2 = vpop.permute.xlu1 %1762 }
 0x346   : > { %1466 = vrot.lane.b32.xlu0 %v1458_v63, %s3850_s21  ;;  %v1492_v63 = vmul.f32 %v1489_v24, %v4354_v29  ;;  %v1537_v24 = vrot.slane %v4447_v55, %v3978_v13 }
 0x347   : > { %3730 = vset.pattern.permute.xlu1 %v3861_v4 }
 0x348   : > { %2703 = vperm.xlu1 %3730, %v4085_v28  }
 0x34a   : > { %v4435_v9 = vpop.permute.xlu1 %1796  ;;  %1496 = vrot.lane.b32.xlu0 %v1490_v18, %s3850_s21  ;;  %v1538_v18 = vmul.f32 %v1529_v34, %v4363_v56  ;;  %v1564_v34 = vrot.slane %v1516_v16, %v3967_v8 }
 0x34c   : > { %3733 = vset.pattern.permute.xlu1 %v3862_v7  ;;  %v4442_v4 = vpop.permute.xlu0 %962  ;;  %v3863_v7 = vmov 67  }
 0x34d   : > { %6271 = vst [vmem:[#allocation35_spill] sm:$0xff] %v4442_v4  ;;  %2809 = vperm.xlu1 %3733, %v4085_v28  }
 0x34e   : > { %1500 = vrot.lane.b32.xlu0 %v1492_v63, %s3850_s21  ;;  %v1540_v63 = vmul.f32 %v1537_v24, %v4363_v56  ;;  %v3866_v24 = vmov 70  }
 0x34f   : > { %v4451_v5 = vpop.permute.xlu1 %1819 }
 0x350   : > { %v4454_v21 = vpop.permute.xlu0 %999 }
 0x351   : > { %6272 = vst [vmem:[#allocation36_spill] sm:$0xff] %v4454_v21  ;;  %3734 = vset.pattern.permute.xlu1 %v3863_v7  ;;  %v1573_v7 = vmul.f32 %v1564_v34, %v4373_v1 }
 0x352   : > { %2843 = vperm.xlu1 %3734, %v4085_v28   ;;  %1544 = vrot.lane.b32.xlu0 %v1538_v18, %s3864_s23  ;;  %v1572_v18 = vrot.slane %v4447_v55, %v3967_v8 }
 0x354   : > { %v4460_v4 = vpop.permute.xlu1 %1841  ;;  %v4463_v61 = vpop.permute.xlu0 %1029 }
 0x355   : > { %6273 = vst [vmem:[#allocation37_spill] sm:$0xff] %v4463_v61 }
 0x356   : > { %3736 = vset.pattern.permute.xlu1 %v3865_v31  ;;  %1548 = vrot.lane.b32.xlu0 %v1540_v63, %s3864_s23  ;;  %v4478_v31 = vrot.slane %v4141_v23, %v3978_v13  ;;  %v1575_v63 = vmul.f32 %v1572_v18, %v4373_v1 }
 0x357   : > { %2911 = vperm.xlu1 %3736, %v4085_v28  }
 0x358   : > { %v4469_v21 = vpop.permute.xlu0 %1033 }
 0x359   : > { %6274 = vst [vmem:[#allocation38_spill] sm:$0xff] %v4469_v21  ;;  %v4471_v33 = vpop.permute.xlu1 %1863  ;;  %v954_v21 = vmul.f32 %v4478_v31, %v4182_v26 }
 0x35a   : > { %1579 = vrot.lane.b32.xlu0 %v1573_v7, %s3864_s23  ;;  %v4492_v7 = vrot.slane %v4192_v50, %v3978_v13  ;;  %v4508_v50 = vrot.slane %v4141_v23, %v3967_v8 }
 0x35b   : > { %3737 = vset.pattern.permute.xlu1 %v3866_v24  ;;  %v6277_v24 = vmov 0  }
 0x35c   : > { %2945 = vperm.xlu1 %3737, %v4085_v28   ;;  %v4482_v34 = vpop.permute.xlu0 %1063  ;;  %v1607_v28 = vmul.f32 %v1598_v14, %v4383_v38  ;;  %v1609_v14 = vmul.f32 %v1606_v52, %v4383_v38 }
 0x35d   : > { %6275 = vst [vmem:[#allocation39_spill] sm:$0xff] %v4482_v34  ;;  %v956_v34 = vmul.f32 %v4492_v7, %v4182_v26  ;;  %v989_v26 = vmul.f32 %v4508_v50, %v4198_v39 }
 0x35e   : > { %v4486_v61 = vpop.permute.xlu1 %1885  ;;  %1583 = vrot.lane.b32.xlu0 %v1575_v63, %s3864_s23 }
 0x360   : > { %960 = vrot.lane.b32.xlu1 %v954_v21, %s3838_s20  ;;  %v4496_v18 = vpop.permute.xlu0 %1067 }
 0x361   : > { %6276 = vst [vmem:[#allocation40_spill] sm:$0xff] %v4496_v18  ;;  %3739 = vset.pattern.permute.xlu1 %v6277_v24  ;;  %v1632_v24 = vrot.slane %v1516_v16, %v4010_v25  ;;  %v1640_v16 = vrot.slane %v4447_v55, %v4010_v25 }
 0x362   : > { %1613 = vrot.lane.b32.xlu0 %v1607_v28, %s3864_s23  ;;  %v4520_v28 = vrot.slane %v4137_v20, %v3967_v8 }
 0x363   : > { %v4504_v63 = vpop.permute.xlu1 %1907 }
 0x364   : > { %964 = vrot.lane.b32.xlu1 %v956_v34, %s3838_s20  ;;  %v4512_v21 = vpop.permute.xlu0 %1097  ;;  %v1641_v34 = vmul.f32 %v1632_v24, %v4394_v30  ;;  %v1643_v24 = vmul.f32 %v1640_v16, %v4394_v30 }
 0x365   : > { %6278 = vst [vmem:[#allocation41_spill] sm:$0xff] %v4512_v21  ;;  %v990_v21 = vmul.f32 %v4520_v28, %v4198_v39 }
 0x366   : > { %1617 = vrot.lane.b32.xlu0 %v1609_v14, %s3864_s23  ;;  %v4534_v14 = vmul.f32 %v4045_v60, %v4157_v40  ;;  %v4551_v40 = vmul.f32 %v4053_v0, %v4255_v58 }
 0x368   : > { %995 = vrot.lane.b32.xlu1 %v989_v26, %s3838_s20  ;;  %v4523_v18 = vpop.permute.xlu1 %1929  ;;  %v4526_v52 = vpop.permute.xlu0 %1101  ;;  %v4539_v26 = vrot.slane %v4137_v20, %v4008_v22 }
 0x369   : > { %6279 = vst [vmem:[#allocation42_spill] sm:$0xff] %v4526_v52 }
 0x36a   : > { %1647 = vrot.lane.b32.xlu0 %v1641_v34, %s3864_s23  ;;  %6280 = vst [vmem:[#allocation43_spill] sm:$0xff] %v4539_v26  ;;  %v1024_v55 = vmul.f32 %v4539_v26, %v4206_v12  ;;  %v1666_v34 = vrot.slane %v4534_v14, %v3978_v13  ;;  %v1674_v26 = vrot.slane %v4551_v40, %v3978_v13 }
 0x36c   : > { %997 = vrot.lane.b32.xlu1 %v990_v21, %s3838_s20  ;;  %v4543_v52 = vpop.permute.xlu0 %1131  ;;  %v4558_v21 = vrot.slane %v4137_v20, %v4010_v25  ;;  %v1675_v16 = vmul.f32 %v1666_v34, %v4400_v3 }
 0x36d   : > { %6281 = vst [vmem:[#allocation44_spill] sm:$0xff] %v4543_v52  ;;  %v4545_v39 = vpop.permute.xlu1 %1951 }
 0x36e   : > { %1651 = vrot.lane.b32.xlu0 %v1643_v24, %s3864_s23  ;;  %6282 = vst [vmem:[#allocation45_spill] sm:$0xff] %v4558_v21  ;;  %v1058_v12 = vmul.f32 %v4558_v21, %v4216_v43  ;;  %v4573_v24 = vrot.slane %v4153_v6, %v3978_v13 }
 0x370   : > { %1031 = vrot.lane.b32.xlu1 %v1024_v55, %s3838_s20  ;;  %v4562_v52 = vpop.permute.xlu0 %1135  ;;  %v1677_v55 = vmul.f32 %v1674_v26, %v4400_v3  ;;  %v1092_v43 = vmul.f32 %v4573_v24, %v4228_v48 }
 0x371   : > { %6283 = vst [vmem:[#allocation46_spill] sm:$0xff] %v4562_v52  ;;  %v1700_v52 = vrot.slane %v4534_v14, %v3967_v8 }
 0x372   : > { %v4566_v58 = vpop.permute.xlu1 %1988  ;;  %1681 = vrot.lane.b32.xlu0 %v1675_v16, %s3864_s23  ;;  %v4588_v16 = vrot.slane %v4153_v6, %v3967_v8 }
 0x373   : > { %v1709_v26 = vmul.f32 %v1700_v52, %v4410_v35 }
 0x374   : > { %1065 = vrot.lane.b32.xlu1 %v1058_v12, %s3838_s20  ;;  %v4577_v34 = vpop.permute.xlu0 %1165  ;;  %6285 = vst [vmem:[#allocation48_spill] sm:$0xff] %v4588_v16  ;;  %v1126_v48 = vmul.f32 %v4588_v16, %v4239_v53  ;;  %v4613_v16 = vsel %vm1224_vm11, %v4043_v59, %v4049_v62 }
 0x375   : > { %6284 = vst [vmem:[#allocation47_spill] sm:$0xff] %v4577_v34  ;;  %v1708_v34 = vrot.slane %v4551_v40, %v3967_v8  ;;  %6290 = vst [vmem:[#allocation53_spill] sm:$0xff] %v4613_v16 }
 0x376   : > { %1685 = vrot.lane.b32.xlu0 %v1677_v55, %s3864_s23  ;;  %v4601_v55 = vrot.slane %v4153_v6, %v4008_v22 }
 0x377   : > { %v4584_v21 = vpop.permute.xlu1 %2023  ;;  %v1711_v52 = vmul.f32 %v1708_v34, %v4410_v35  ;;  %v1230_v34 = vmul.f32 %v4613_v16, %v4137_v20 }
 0x378   : > { %1099 = vrot.lane.b32.xlu1 %v1092_v43, %s3838_s20  ;;  %v4592_v12 = vpop.permute.xlu0 %1169  ;;  %6287 = vst [vmem:[#allocation50_spill] sm:$0xff] %v4601_v55  ;;  %v1160_v53 = vmul.f32 %v4601_v55, %v4257_v11 }
 0x379   : > { %6286 = vst [vmem:[#allocation49_spill] sm:$0xff] %v4592_v12 }
 0x37a   : > { %1715 = vrot.lane.b32.xlu0 %v1709_v26, %s3864_s23  ;;  %v1734_v26 = vrot.slane %v4534_v14, %v4008_v22 }
 0x37c   : > { %1133 = vrot.lane.b32.xlu1 %v1126_v48, %s3838_s20  ;;  %v4604_v43 = vpop.permute.xlu1 %2057  ;;  %v4607_v12 = vpop.permute.xlu0 %1199  ;;  %v4620_v48 = vrot.slane %v4153_v6, %v4010_v25  ;;  %v1743_v11 = vmul.f32 %v1734_v26, %v4418_v36 }
 0x37d   : > { %6288 = vst [vmem:[#allocation51_spill] sm:$0xff] %v4604_v43  ;;  %6289 = vst [vmem:[#allocation52_spill] sm:$0xff] %v4607_v12  ;;  %v1246_v43 = vrot.slane %v1230_v34, %v3978_v13 }
 0x37e   : > { %1719 = vrot.lane.b32.xlu0 %v1711_v52, %s3864_s23  ;;  %6291 = vst [vmem:[#allocation54_spill] sm:$0xff] %v4620_v48  ;;  %v1194_v59 = vmul.f32 %v4620_v48, %v4267_v19  ;;  %v1742_v52 = vrot.slane %v4551_v40, %v4008_v22  ;;  %v1768_v19 = vrot.slane %v4534_v14, %v4010_v25 }
 0x37f   : > { %v1252_v26 = vmul.f32 %v1246_v43, %v4279_v41  ;;  %v1776_v41 = vrot.slane %v4551_v40, %v4010_v25  ;;  %v1315_v14 = vrot.slane %v1230_v34, %v4008_v22  ;;  %v1233_v40 = vmul.f32 %v4613_v16, %v4153_v6 }
 0x380   : > { %1167 = vrot.lane.b32.xlu1 %v1160_v53, %s3838_s20  ;;  %v4626_v12 = vpop.permute.xlu0 %1203  ;;  %v1745_v53 = vmul.f32 %v1742_v52, %v4418_v36 }
 0x381   : > { %6292 = vst [vmem:[#allocation55_spill] sm:$0xff] %v4626_v12  ;;  %v4628_v62 = vpop.permute.xlu1 %2091 }
 0x382   : > { %6293 = vst [vmem:[#allocation56_spill] sm:$0xff] %v4628_v62  ;;  %1749 = vrot.lane.b32.xlu0 %v1743_v11, %s3864_s23  ;;  %v1281_v62 = vrot.slane %v1230_v34, %v3967_v8  ;;  %v1777_v11 = vmul.f32 %v1768_v19, %v4427_v2  ;;  %v1321_v19 = vmul.f32 %v1315_v14, %v4304_v15 }
 0x383   : > { %v1383_v15 = vrot.slane %v1233_v40, %v3978_v13 }
 0x384   : > { %1201 = vrot.lane.b32.xlu1 %v1194_v59, %s3838_s20  ;;  %v4638_v55 = vpop.permute.xlu0 %1257  ;;  %v1287_v52 = vmul.f32 %v1281_v62, %v4290_v51  ;;  %v1349_v62 = vrot.slane %v1230_v34, %v4010_v25  ;;  %v1801_v34 = vmul.f32 %v4435_v9, %v4492_v7 }
 0x385   : > { %6294 = vst [vmem:[#allocation57_spill] sm:$0xff] %v4638_v55  ;;  %v6326_v55 = vld [vmem:[#allocation45_spill] sm:$0xff] }
 0x386   : > { %v4641_v12 = vpop.permute.xlu1 %2125  ;;  %1753 = vrot.lane.b32.xlu0 %v1745_v53, %s3864_s23  ;;  %v1779_v53 = vmul.f32 %v1776_v41, %v4427_v2  ;;  %v1355_v41 = vmul.f32 %v1349_v62, %v4314_v45  ;;  %v1417_v45 = vrot.slane %v1233_v40, %v3967_v8  ;;  %v1822_v62 = vmul.f32 %v4451_v5, %v4508_v50 }
 0x388   : > { %1259 = vrot.lane.b32.xlu1 %v1252_v26, %s3850_s21  ;;  %v4649_v59 = vpop.permute.xlu0 %1261 }
 0x389   : > { %6295 = vst [vmem:[#allocation58_spill] sm:$0xff] %v4649_v59 }
 0x38a   : > { %1783 = vrot.lane.b32.xlu0 %v1777_v11, %s3864_s23  ;;  %v1799_v11 = vmul.f32 %v4435_v9, %v4478_v31 }
 0x38b   : > { %v4655_v43 = vpop.permute.xlu1 %2159 }
 0x38c   : > { %1294 = vrot.lane.b32.xlu1 %v1287_v52, %s3850_s21  ;;  %v4660_v26 = vpop.permute.xlu0 %1292 }
 0x38d   : > { %6296 = vst [vmem:[#allocation59_spill] sm:$0xff] %v4660_v26 }
 0x38e   : > { %1787 = vrot.lane.b32.xlu0 %v1779_v53, %s3864_s23 }
 0x390   : > { %1328 = vrot.lane.b32.xlu1 %v1321_v19, %s3850_s21  ;;  %v4668_v51 = vpop.permute.xlu1 %2227  ;;  %v4672_v52 = vpop.permute.xlu0 %1296  ;;  %v1389_v19 = vmul.f32 %v1383_v15, %v4328_v10  ;;  %v1824_v10 = vmul.f32 %v4451_v5, %v4204_v27 }
 0x391   : > { %6297 = vst [vmem:[#allocation60_spill] sm:$0xff] %v4672_v52  ;;  %v1451_v52 = vrot.slane %v1233_v40, %v4008_v22 }
 0x392   : > { %1805 = vrot.lane.b32.xlu0 %v1799_v11, %s3867_s24 }
 0x394   : > { %1362 = vrot.lane.b32.xlu1 %v1355_v41, %s3850_s21  ;;  %v4680_v14 = vpop.permute.xlu0 %1326  ;;  %v1423_v41 = vmul.f32 %v1417_v45, %v4339_v32 }
 0x395   : > { %6298 = vst [vmem:[#allocation61_spill] sm:$0xff] %v4680_v14  ;;  %v4682_v53 = vpop.permute.xlu1 %2275  ;;  %v6323_v14 = vld [vmem:[#allocation12_spill] sm:$0xff] }
 0x396   : > { %1809 = vrot.lane.b32.xlu0 %v1801_v34, %s3867_s24  ;;  %v1457_v34 = vmul.f32 %v1451_v52, %v4346_v47 }
 0x398   : > { %1396 = vrot.lane.b32.xlu1 %v1389_v19, %s3850_s21  ;;  %v4690_v11 = vpop.permute.xlu0 %1330  ;;  %v4706_v19 = vsel %vm753_vm4, %v4045_v60, %v4053_v0  ;;  %vm2563_vm4 = vcmask 777216  }
 0x399   : > { %6299 = vst [vmem:[#allocation62_spill] sm:$0xff] %v4690_v11  ;;  %6301 = vst [vmem:[#allocation64_spill] sm:$0xff] %v4706_v19  ;;  %v1517_v45 = vmul.f32 %v4706_v19, %v4137_v20  ;;  %v6321_v11 = vld [vmem:[#allocation43_spill] sm:$0xff] }
 0x39a   : > { %v4693_v16 = vpop.permute.xlu1 %2344  ;;  %1828 = vrot.lane.b32.xlu0 %v1822_v62, %s3867_s24  ;;  %v1485_v62 = vrot.slane %v1233_v40, %v4010_v25  ;;  %v1846_v40 = vmul.f32 %v4460_v4, %v4223_v46 }
 0x39c   : > { %1430 = vrot.lane.b32.xlu1 %v1423_v41, %s3850_s21  ;;  %v4700_v15 = vpop.permute.xlu0 %1360  ;;  %v1844_v41 = vmul.f32 %v4460_v4, %v4214_v42  ;;  %v1491_v52 = vmul.f32 %v1485_v62, %v4354_v29  ;;  %v1866_v29 = vmul.f32 %v4471_v33, %v4233_v49 }
 0x39d   : > { %6300 = vst [vmem:[#allocation63_spill] sm:$0xff] %v4700_v15  ;;  %v6322_v15 = vld [vmem:[#allocation18_spill] sm:$0xff] }
 0x39e   : > { %1832 = vrot.lane.b32.xlu0 %v1824_v10, %s3867_s24  ;;  %v1533_v10 = vrot.slane %v1517_v45, %v3978_v13 }
 0x39f   : > { %v4709_v32 = vpop.permute.xlu1 %2378 }
 0x3a0   : > { %1464 = vrot.lane.b32.xlu1 %v1457_v34, %s3850_s21  ;;  %v4717_v47 = vpop.permute.xlu0 %1364  ;;  %v1539_v34 = vmul.f32 %v1533_v10, %v4363_v56  ;;  %v1868_v56 = vmul.f32 %v4471_v33, %v4243_v54 }
 0x3a1   : > { %6302 = vst [vmem:[#allocation65_spill] sm:$0xff] %v4717_v47  ;;  %v1568_v47 = vrot.slane %v1517_v45, %v3967_v8 }
 0x3a2   : > { %1850 = vrot.lane.b32.xlu0 %v1844_v41, %s3867_s24 }
 0x3a4   : > { %1498 = vrot.lane.b32.xlu1 %v1491_v52, %s3850_s21  ;;  %v4723_v0 = vpop.permute.xlu1 %2446  ;;  %v4727_v60 = vpop.permute.xlu0 %1394  ;;  %v1574_v52 = vmul.f32 %v1568_v47, %v4373_v1  ;;  %v1520_v1 = vmul.f32 %v4706_v19, %v4153_v6  ;;  %v1636_v47 = vrot.slane %v1517_v45, %v4010_v25 }
 0x3a5   : > { %6303 = vst [vmem:[#allocation66_spill] sm:$0xff] %v4727_v60  ;;  %v1602_v60 = vrot.slane %v1517_v45, %v4008_v22  ;;  %v1890_v45 = vmul.f32 %v4486_v61, %v4265_v17 }
 0x3a6   : > { %1854 = vrot.lane.b32.xlu0 %v1846_v40, %s3867_s24  ;;  %v1704_v19 = vrot.slane %v1520_v1, %v3967_v8 }
 0x3a7   : > { %v1608_v40 = vmul.f32 %v1602_v60, %v4383_v38  ;;  %v1670_v38 = vrot.slane %v1520_v1, %v3978_v13 }
 0x3a8   : > { %1546 = vrot.lane.b32.xlu1 %v1539_v34, %s3864_s23  ;;  %v4735_v62 = vpop.permute.xlu0 %1398 }
 0x3a9   : > { %6304 = vst [vmem:[#allocation67_spill] sm:$0xff] %v4735_v62  ;;  %v4737_v41 = vpop.permute.xlu1 %2480  ;;  %v1642_v62 = vmul.f32 %v1636_v47, %v4394_v30  ;;  %v1910_v47 = vmul.f32 %v4504_v63, %v4273_v37 }
 0x3aa   : > { %1872 = vrot.lane.b32.xlu0 %v1866_v29, %s3867_s24  ;;  %v1888_v29 = vmul.f32 %v4486_v61, %v4251_v57 }
 0x3ac   : > { %1581 = vrot.lane.b32.xlu1 %v1574_v52, %s3864_s23  ;;  %v4745_v10 = vpop.permute.xlu0 %1428 }
 0x3ad   : > { %6305 = vst [vmem:[#allocation68_spill] sm:$0xff] %v4745_v10 }
 0x3ae   : > { %v4748_v34 = vpop.permute.xlu1 %2548  ;;  %1876 = vrot.lane.b32.xlu0 %v1868_v56, %s3867_s24 }
 0x3b0   : > { %1615 = vrot.lane.b32.xlu1 %v1608_v40, %s3864_s23  ;;  %v4757_v52 = vpop.permute.xlu0 %1432  ;;  %v1676_v40 = vmul.f32 %v1670_v38, %v4400_v3  ;;  %v1912_v3 = vmul.f32 %v4504_v63, %v4283_v44 }
 0x3b1   : > { %6306 = vst [vmem:[#allocation69_spill] sm:$0xff] %v4757_v52  ;;  %v1738_v52 = vrot.slane %v1520_v1, %v4008_v22 }
 0x3b2   : > { %1894 = vrot.lane.b32.xlu0 %v1888_v29, %s3867_s24 }
 0x3b3   : > { %v4761_v60 = vpop.permute.xlu1 %2571 }
 0x3b4   : > { %1649 = vrot.lane.b32.xlu1 %v1642_v62, %s3864_s23  ;;  %v4767_v56 = vpop.permute.xlu0 %1462  ;;  %v1710_v62 = vmul.f32 %v1704_v19, %v4410_v35  ;;  %v6310_v35 = vld [vmem:[#allocation21_spill] sm:$0xff] }
 0x3b5   : > { %6307 = vst [vmem:[#allocation70_spill] sm:$0xff] %v4767_v56  ;;  %v1932_v19 = vmul.f32 %v4523_v18, %v6310_v35 }
 0x3b6   : > { %1898 = vrot.lane.b32.xlu0 %v1890_v45, %s3867_s24 }
 0x3b8   : > { %1683 = vrot.lane.b32.xlu1 %v1676_v40, %s3864_s23  ;;  %v4773_v30 = vpop.permute.xlu1 %2615  ;;  %v4777_v29 = vpop.permute.xlu0 %1466  ;;  %v1744_v40 = vmul.f32 %v1738_v52, %v4418_v36  ;;  %v6312_v36 = vld [vmem:[#allocation22_spill] sm:$0xff] }
 0x3b9   : > { %6308 = vst [vmem:[#allocation71_spill] sm:$0xff] %v4777_v29  ;;  %v1772_v29 = vrot.slane %v1520_v1, %v4010_v25  ;;  %v1934_v52 = vmul.f32 %v4523_v18, %v6312_v36  ;;  %v6314_v1 = vld [vmem:[#allocation16_spill] sm:$0xff] }
 0x3ba   : > { %1916 = vrot.lane.b32.xlu0 %v1910_v47, %s3867_s24 }
 0x3bc   : > { %1717 = vrot.lane.b32.xlu1 %v1710_v62, %s3864_s23  ;;  %v4785_v38 = vpop.permute.xlu0 %1496  ;;  %v1778_v62 = vmul.f32 %v1772_v29, %v4427_v2  ;;  %v6315_v2 = vld [vmem:[#allocation23_spill] sm:$0xff] }
 0x3bd   : > { %6309 = vst [vmem:[#allocation72_spill] sm:$0xff] %v4785_v38  ;;  %v4787_v45 = vpop.permute.xlu1 %2637  ;;  %v1954_v29 = vmul.f32 %v4545_v39, %v6315_v2 }
 0x3be   : > { %1920 = vrot.lane.b32.xlu0 %v1912_v3, %s3867_s24 }
 0x3c0   : > { %1751 = vrot.lane.b32.xlu1 %v1744_v40, %s3864_s23  ;;  %v4795_v47 = vpop.permute.xlu0 %1500  ;;  %v1800_v40 = vmul.f32 %v4435_v9, %v6314_v1 }
 0x3c1   : > { %6311 = vst [vmem:[#allocation21_spill] sm:$0xff] %v4795_v47  ;;  %v6317_v47 = vld [vmem:[#allocation7_spill] sm:$0xff] }
 0x3c2   : > { %v4798_v56 = vpop.permute.xlu1 %2681  ;;  %1938 = vrot.lane.b32.xlu0 %v1932_v19, %s3867_s24 }
 0x3c4   : > { %1785 = vrot.lane.b32.xlu1 %v1778_v62, %s3864_s23  ;;  %v4804_v3 = vpop.permute.xlu0 %1544  ;;  %v1823_v62 = vmul.f32 %v4451_v5, %v4520_v28  ;;  %v1983_v5 = vmul.f32 %v6323_v14, %v6322_v15 }
 0x3c5   : > { %6313 = vst [vmem:[#allocation73_spill] sm:$0xff] %v4804_v3  ;;  %v1981_v3 = vmul.f32 %v6317_v47, %v4141_v23 }
 0x3c6   : > { %1942 = vrot.lane.b32.xlu0 %v1934_v52, %s3867_s24  ;;  %v6319_v52 = vld [vmem:[#allocation24_spill] sm:$0xff] }
 0x3c7   : > { %v4809_v38 = vpop.permute.xlu1 %2703  ;;  %v1994_v59 = vrot.slane %v1981_v3, %v3978_v13 }
 0x3c8   : > { %1807 = vrot.lane.b32.xlu1 %v1800_v40, %s3867_s24  ;;  %v4814_v19 = vpop.permute.xlu0 %1548  ;;  %v1956_v40 = vmul.f32 %v4545_v39, %v6319_v52 }
 0x3c9   : > { %6316 = vst [vmem:[#allocation16_spill] sm:$0xff] %v4814_v19  ;;  %v1845_v19 = vmul.f32 %v4460_v4, %v6321_v11  ;;  %v2002_v4 = vrot.slane %v1983_v5, %v3978_v13 }
 0x3ca   : > { %1960 = vrot.lane.b32.xlu0 %v1954_v29, %s3867_s24  ;;  %v2003_v29 = vmul.f32 %v1994_v59, %v4566_v58  ;;  %v1889_v59 = vmul.f32 %v4486_v61, %v4573_v24 }
 0x3cc   : > { %1830 = vrot.lane.b32.xlu1 %v1823_v62, %s3867_s24  ;;  %v4822_v9 = vpop.permute.xlu1 %2809  ;;  %v4826_v10 = vpop.permute.xlu0 %1579 }
 0x3cd   : > { %6318 = vst [vmem:[#allocation23_spill] sm:$0xff] %v4822_v9  ;;  %6320 = vst [vmem:[#allocation74_spill] sm:$0xff] %v4826_v10  ;;  %v1867_v10 = vmul.f32 %v4471_v33, %v6326_v55 }
 0x3ce   : > { %1964 = vrot.lane.b32.xlu0 %v1956_v40, %s3867_s24  ;;  %v2005_v40 = vmul.f32 %v2002_v4, %v4566_v58 }
 0x3d0   : > { %1852 = vrot.lane.b32.xlu1 %v1845_v19, %s3867_s24  ;;  %v4836_v62 = vpop.permute.xlu0 %1583 }
 0x3d1   : > { %6324 = vst [vmem:[#allocation43_spill] sm:$0xff] %v4836_v62  ;;  %v4838_v26 = vpop.permute.xlu1 %2843  ;;  %v2029_v62 = vrot.slane %v1981_v3, %v3967_v8 }
 0x3d2   : > { %6325 = vst [vmem:[#allocation18_spill] sm:$0xff] %v4838_v26  ;;  %2009 = vrot.lane.b32.xlu0 %v2003_v29, %s3868_s25  ;;  %v2071_v26 = vrot.slane %v1983_v5, %v4008_v22 }
 0x3d3   : > { %v2038_v33 = vmul.f32 %v2029_v62, %v4584_v21 }
 0x3d4   : > { %1874 = vrot.lane.b32.xlu1 %v1867_v10, %s3867_s24  ;;  %v4846_v9 = vpop.permute.xlu0 %1613  ;;  %v6330_v10 = vld [vmem:[#allocation48_spill] sm:$0xff] }
 0x3d5   : > { %6327 = vst [vmem:[#allocation45_spill] sm:$0xff] %v4846_v9  ;;  %v1911_v4 = vmul.f32 %v4504_v63, %v6330_v10  ;;  %v2037_v9 = vrot.slane %v1983_v5, %v3967_v8  ;;  %v2063_v63 = vrot.slane %v1981_v3, %v4008_v22 }
 0x3d6   : > { %v4850_v19 = vpop.permute.xlu1 %2911  ;;  %2013 = vrot.lane.b32.xlu0 %v2005_v40, %s3868_s25 }
 0x3d7   : > { %6328 = vst [vmem:[#allocation75_spill] sm:$0xff] %v4850_v19  ;;  %v2040_v40 = vmul.f32 %v2037_v9, %v4584_v21  ;;  %v6336_v9 = vld [vmem:[#allocation51_spill] sm:$0xff] }
 0x3d8   : > { %1896 = vrot.lane.b32.xlu1 %v1889_v59, %s3867_s24  ;;  %v4856_v29 = vpop.permute.xlu0 %1617  ;;  %v6333_v59 = vld [vmem:[#allocation50_spill] sm:$0xff] }
 0x3d9   : > { %6329 = vst [vmem:[#allocation76_spill] sm:$0xff] %v4856_v29  ;;  %v1933_v62 = vmul.f32 %v4523_v18, %v6333_v59  ;;  %v4872_v29 = vsel %vm1976_vm12, %v6317_v47, %v6323_v14  ;;  %v1955_v18 = vmul.f32 %v4545_v39, %v4620_v48 }
 0x3da   : > { %2044 = vrot.lane.b32.xlu0 %v2038_v33, %s3868_s25  ;;  %6334 = vst [vmem:[#allocation50_spill] sm:$0xff] %v4872_v29 }
 0x3db   : > { %v4862_v61 = vpop.permute.xlu1 %2945 }
 0x3dc   : > { %6331 = vst [vmem:[#allocation48_spill] sm:$0xff] %v4862_v61  ;;  %1918 = vrot.lane.b32.xlu1 %v1911_v4, %s3867_s24  ;;  %v4866_v19 = vpop.permute.xlu0 %1647  ;;  %v1982_v4 = vmul.f32 %v4872_v29, %v4137_v20 }
 0x3dd   : > { %6332 = vst [vmem:[#allocation77_spill] sm:$0xff] %v4866_v19  ;;  %v2072_v19 = vmul.f32 %v2063_v63, %v6336_v9 }
 0x3de   : > { %2048 = vrot.lane.b32.xlu0 %v2040_v40, %s3868_s25  ;;  %v1998_v40 = vrot.slane %v1982_v4, %v3978_v13 }
 0x3df   : > { %v4876_v33 = vpop.permute.xlu1 %960 }
 0x3e0   : > { %6335 = vst [vmem:[#allocation78_spill] sm:$0xff] %v4876_v33  ;;  %1940 = vrot.lane.b32.xlu1 %v1933_v62, %s3867_s24  ;;  %v4882_v61 = vpop.permute.xlu0 %1651  ;;  %v2074_v33 = vmul.f32 %v2071_v26, %v6336_v9  ;;  %v2004_v63 = vmul.f32 %v1998_v40, %v4566_v58  ;;  %v2105_v58 = vrot.slane %v1983_v5, %v4010_v25 }
 0x3e1   : > { %6337 = vst [vmem:[#allocation51_spill] sm:$0xff] %v4882_v61  ;;  %v2097_v61 = vrot.slane %v1981_v3, %v4010_v25  ;;  %v1985_v5 = vmul.f32 %v4872_v29, %v4153_v6 }
 0x3e2   : > { %2078 = vrot.lane.b32.xlu0 %v2072_v19, %s3868_s25  ;;  %v2033_v19 = vrot.slane %v1982_v4, %v3967_v8 }
 0x3e3   : > { %v4888_v36 = vpop.permute.xlu1 %964 }
 0x3e4   : > { %6338 = vst [vmem:[#allocation79_spill] sm:$0xff] %v4888_v36  ;;  %1962 = vrot.lane.b32.xlu1 %v1955_v18, %s3867_s24  ;;  %v4893_v62 = vpop.permute.xlu0 %1681  ;;  %v6340_v36 = vld [vmem:[#allocation56_spill] sm:$0xff]  ;;  %v2039_v26 = vmul.f32 %v2033_v19, %v4584_v21  ;;  %v6342_v18 = vld [vmem:[#allocation15_spill] sm:$0xff] }
 0x3e5   : > { %6339 = vst [vmem:[#allocation80_spill] sm:$0xff] %v4893_v62  ;;  %v2106_v48 = vmul.f32 %v2097_v61, %v6340_v36  ;;  %v1984_v62 = vmul.f32 %v6317_v47, %v6342_v18  ;;  %v2108_v40 = vmul.f32 %v2105_v58, %v6340_v36  ;;  %v6344_v21 = vld [vmem:[#allocation20_spill] sm:$0xff] }
 0x3e6   : > { %2082 = vrot.lane.b32.xlu0 %v2074_v33, %s3868_s25  ;;  %v2067_v33 = vrot.slane %v1982_v4, %v4008_v22  ;;  %v1986_v19 = vmul.f32 %v6323_v14, %v6344_v21  ;;  %v2135_v14 = vrot.slane %v1985_v5, %v3978_v13 }
 0x3e7   : > { %v4898_v39 = vpop.permute.xlu1 %995  ;;  %v2131_v47 = vrot.slane %v1984_v62, %v3978_v13 }
 0x3e8   : > { %2011 = vrot.lane.b32.xlu1 %v2004_v63, %s3868_s25  ;;  %v4903_v52 = vpop.permute.xlu0 %1685  ;;  %v2073_v63 = vmul.f32 %v2067_v33, %v6336_v9  ;;  %v2139_v33 = vrot.slane %v1986_v19, %v3978_v13 }
 0x3e9   : > { %6341 = vst [vmem:[#allocation56_spill] sm:$0xff] %v4903_v52  ;;  %v2140_v58 = vmul.f32 %v2131_v47, %v4641_v12  ;;  %v2141_v47 = vmul.f32 %v2135_v14, %v4641_v12  ;;  %v2169_v14 = vrot.slane %v1985_v5, %v3967_v8 }
 0x3ea   : > { %2112 = vrot.lane.b32.xlu0 %v2106_v48, %s3868_s25 }
 0x3eb   : > { %v4910_v3 = vpop.permute.xlu1 %997 }
 0x3ec   : > { %2046 = vrot.lane.b32.xlu1 %v2039_v26, %s3868_s25  ;;  %v4915_v61 = vpop.permute.xlu0 %1715  ;;  %v2101_v26 = vrot.slane %v1982_v4, %v4010_v25  ;;  %v2142_v4 = vmul.f32 %v2139_v33, %v4641_v12  ;;  %v2203_v33 = vrot.slane %v1985_v5, %v4008_v22 }
 0x3ed   : > { %6343 = vst [vmem:[#allocation15_spill] sm:$0xff] %v4915_v61 }
 0x3ee   : > { %2116 = vrot.lane.b32.xlu0 %v2108_v40, %s3868_s25  ;;  %v2107_v9 = vmul.f32 %v2101_v26, %v6340_v36  ;;  %v2165_v26 = vrot.slane %v1984_v62, %v3967_v8 }
 0x3ef   : > { %v4922_v48 = vpop.permute.xlu1 %1031 }
 0x3f0   : > { %2080 = vrot.lane.b32.xlu1 %v2073_v63, %s3868_s25  ;;  %v4929_v52 = vpop.permute.xlu0 %1719  ;;  %v2173_v63 = vrot.slane %v1986_v19, %v3967_v8 }
 0x3f1   : > { %6345 = vst [vmem:[#allocation20_spill] sm:$0xff] %v4929_v52 }
 0x3f2   : > { %2146 = vrot.lane.b32.xlu0 %v2140_v58, %s3868_s25  ;;  %v2176_v58 = vmul.f32 %v2173_v63, %v4655_v43  ;;  %v2233_v63 = vrot.slane %v1984_v62, %v4010_v25 }
 0x3f3   : > { %v4934_v40 = vpop.permute.xlu1 %1065 }
 0x3f4   : > { %2114 = vrot.lane.b32.xlu1 %v2107_v9, %s3868_s25  ;;  %v4939_v29 = vpop.permute.xlu0 %1749  ;;  %v2174_v9 = vmul.f32 %v2165_v26, %v4655_v43 }
 0x3f5   : > { %6346 = vst [vmem:[#allocation81_spill] sm:$0xff] %v4939_v29 }
 0x3f6   : > { %2150 = vrot.lane.b32.xlu0 %v2142_v4, %s3868_s25  ;;  %v6350_v4 = vld [vmem:[#allocation25_spill] sm:$0xff] }
 0x3f7   : > { %v4944_v36 = vpop.permute.xlu1 %1099  ;;  %v2209_v29 = vmul.f32 %v2203_v33, %v6350_v4  ;;  %v6355_v33 = vld [vmem:[#allocation14_spill] sm:$0xff] }
 0x3f8   : > { %6347 = vst [vmem:[#allocation82_spill] sm:$0xff] %v4944_v36  ;;  %2148 = vrot.lane.b32.xlu1 %v2141_v47, %s3868_s25  ;;  %v4949_v52 = vpop.permute.xlu0 %1753  ;;  %v2175_v47 = vmul.f32 %v2169_v14, %v4655_v43  ;;  %v2241_v14 = vrot.slane %v1986_v19, %v4010_v25 }
 0x3f9   : > { %6348 = vst [vmem:[#allocation83_spill] sm:$0xff] %v4949_v52  ;;  %v2242_v52 = vmul.f32 %v2233_v63, %v4668_v51 }
 0x3fa   : > { %2184 = vrot.lane.b32.xlu0 %v2176_v58, %s3868_s25  ;;  %v2199_v58 = vrot.slane %v1984_v62, %v4008_v22  ;;  %v2244_v63 = vmul.f32 %v2241_v14, %v4668_v51 }
 0x3fb   : > { %v4954_v12 = vpop.permute.xlu1 %1133 }
 0x3fc   : > { %6349 = vst [vmem:[#allocation84_spill] sm:$0xff] %v4954_v12  ;;  %2180 = vrot.lane.b32.xlu1 %v2174_v9, %s3868_s25  ;;  %v4959_v61 = vpop.permute.xlu0 %1783  ;;  %v6354_v9 = vld [vmem:[#allocation9_spill] sm:$0xff]  ;;  %v2208_v43 = vmul.f32 %v2199_v58, %v6350_v4 }
 0x3fd   : > { %6351 = vst [vmem:[#allocation25_spill] sm:$0xff] %v4959_v61  ;;  %v4974_v61 = vsel %vm757_vm6, %v6355_v33, %v6354_v9 }
 0x3fe   : > { %2216 = vrot.lane.b32.xlu0 %v2209_v29, %s3868_s25  ;;  %6356 = vst [vmem:[#allocation87_spill] sm:$0xff] %v4974_v61  ;;  %v4979_v29 = vmul.f32 %v4974_v61, %v4137_v20 }
 0x3ff   : > { %v4964_v26 = vpop.permute.xlu1 %1167 }
 0x400   : > { %6352 = vst [vmem:[#allocation85_spill] sm:$0xff] %v4964_v26  ;;  %2182 = vrot.lane.b32.xlu1 %v2175_v47, %s3868_s25  ;;  %v4969_v12 = vpop.permute.xlu0 %1787  ;;  %v2207_v47 = vrot.slane %v1986_v19, %v4008_v22  ;;  %v2268_v26 = vmul.f32 %v6355_v33, %v4141_v23  ;;  %v2285_v36 = vrot.slane %v4979_v29, %v3978_v13 }
 0x401   : > { %6353 = vst [vmem:[#allocation86_spill] sm:$0xff] %v4969_v12  ;;  %v2237_v19 = vrot.slane %v1985_v5, %v4010_v25 }
 0x402   : > { %2248 = vrot.lane.b32.xlu0 %v2242_v52, %s3868_s25  ;;  %v2210_v58 = vmul.f32 %v2207_v47, %v6350_v4  ;;  %v2270_v47 = vmul.f32 %v6354_v9, %v6322_v15  ;;  %v2281_v5 = vrot.slane %v2268_v26, %v3978_v13 }
 0x403   : > { %v4983_v62 = vpop.permute.xlu1 %1201  ;;  %v2243_v4 = vmul.f32 %v2237_v19, %v4668_v51 }
 0x404   : > { %6357 = vst [vmem:[#allocation88_spill] sm:$0xff] %v4983_v62  ;;  %2214 = vrot.lane.b32.xlu1 %v2208_v43, %s3868_s25  ;;  %v4988_v12 = vpop.permute.xlu0 %1805  ;;  %v2291_v43 = vmul.f32 %v2285_v36, %v4682_v53  ;;  %v2290_v51 = vmul.f32 %v2281_v5, %v4682_v53  ;;  %v2324_v19 = vrot.slane %v2270_v47, %v3967_v8 }
 0x405   : > { %6358 = vst [vmem:[#allocation89_spill] sm:$0xff] %v4988_v12  ;;  %v2316_v12 = vrot.slane %v2268_v26, %v3967_v8 }
 0x406   : > { %2252 = vrot.lane.b32.xlu0 %v2244_v63, %s3868_s25 }
 0x407   : > { %v4996_v52 = vpop.permute.xlu1 %1259 }
 0x408   : > { %6359 = vst [vmem:[#allocation90_spill] sm:$0xff] %v4996_v52  ;;  %2218 = vrot.lane.b32.xlu1 %v2210_v58, %s3868_s25  ;;  %v5001_v14 = vpop.permute.xlu0 %1809  ;;  %v6362_v58 = vld [vmem:[#allocation26_spill] sm:$0xff] }
 0x409   : > { %6360 = vst [vmem:[#allocation91_spill] sm:$0xff] %v5001_v14  ;;  %v2325_v36 = vmul.f32 %v2316_v12, %v6362_v58 }
 0x40a   : > { %2298 = vrot.lane.b32.xlu0 %v2291_v43, %s3869_s26  ;;  %v2289_v43 = vrot.slane %v2270_v47, %v3978_v13 }
 0x40b   : > { %v5008_v63 = vpop.permute.xlu1 %1294 }
 0x40c   : > { %6361 = vst [vmem:[#allocation92_spill] sm:$0xff] %v5008_v63  ;;  %2250 = vrot.lane.b32.xlu1 %v2243_v4, %s3868_s25  ;;  %v5013_v52 = vpop.permute.xlu0 %1828  ;;  %v2327_v63 = vmul.f32 %v2324_v19, %v6362_v58  ;;  %v2292_v12 = vmul.f32 %v2289_v43, %v4682_v53  ;;  %v2354_v4 = vrot.slane %v4979_v29, %v4008_v22 }
 0x40d   : > { %6363 = vst [vmem:[#allocation26_spill] sm:$0xff] %v5013_v52  ;;  %v2384_v53 = vrot.slane %v2268_v26, %v4010_v25 }
 0x40e   : > { %2331 = vrot.lane.b32.xlu0 %v2325_v36, %s3869_s26  ;;  %v2320_v36 = vrot.slane %v4979_v29, %v3967_v8 }
 0x40f   : > { %v5018_v14 = vpop.permute.xlu1 %1328 }
 0x410   : > { %2296 = vrot.lane.b32.xlu1 %v2290_v51, %s3869_s26  ;;  %v5023_v62 = vpop.permute.xlu0 %1832  ;;  %v2360_v51 = vmul.f32 %v2354_v4, %v4693_v16  ;;  %v2326_v19 = vmul.f32 %v2320_v36, %v6362_v58  ;;  %v5050_v4 = vmul.f32 %v4974_v61, %v4153_v6  ;;  %v2392_v58 = vrot.slane %v2270_v47, %v4010_v25 }
 0x411   : > { %6364 = vst [vmem:[#allocation93_spill] sm:$0xff] %v5023_v62  ;;  %v2393_v62 = vmul.f32 %v2384_v53, %v4709_v32 }
 0x412   : > { %2335 = vrot.lane.b32.xlu0 %v2327_v63, %s3869_s26  ;;  %v2350_v63 = vrot.slane %v2268_v26, %v4008_v22  ;;  %v2358_v26 = vrot.slane %v2270_v47, %v4008_v22  ;;  %v2422_v61 = vrot.slane %v5050_v4, %v3978_v13  ;;  %v2388_v47 = vrot.slane %v4979_v29, %v4010_v25 }
 0x413   : > { %v5029_v5 = vpop.permute.xlu1 %1362 }
 0x414   : > { %6365 = vst [vmem:[#allocation94_spill] sm:$0xff] %v5029_v5  ;;  %2300 = vrot.lane.b32.xlu1 %v2292_v12, %s3869_s26  ;;  %v5035_v52 = vpop.permute.xlu0 %1850  ;;  %v2359_v12 = vmul.f32 %v2350_v63, %v4693_v16  ;;  %v2361_v53 = vmul.f32 %v2358_v26, %v4693_v16  ;;  %v2271_v63 = vmul.f32 %v6355_v33, %v6342_v18 }
 0x415   : > { %6366 = vst [vmem:[#allocation95_spill] sm:$0xff] %v5035_v52  ;;  %v2394_v16 = vmul.f32 %v2388_v47, %v4709_v32  ;;  %v2273_v26 = vmul.f32 %v6354_v9, %v6344_v21 }
 0x416   : > { %2367 = vrot.lane.b32.xlu0 %v2360_v51, %s3869_s26  ;;  %v2395_v51 = vmul.f32 %v2392_v58, %v4709_v32  ;;  %v2452_v33 = vrot.slane %v2271_v63, %v3967_v8 }
 0x417   : > { %v5040_v43 = vpop.permute.xlu1 %1396  ;;  %v2460_v32 = vrot.slane %v2273_v26, %v3967_v8 }
 0x418   : > { %2333 = vrot.lane.b32.xlu1 %v2326_v19, %s3869_s26  ;;  %v5045_v5 = vpop.permute.xlu0 %1854  ;;  %v2461_v29 = vmul.f32 %v2452_v33, %v4723_v0 }
 0x419   : > { %6367 = vst [vmem:[#allocation96_spill] sm:$0xff] %v5045_v5  ;;  %v2463_v9 = vmul.f32 %v2460_v32, %v4723_v0 }
 0x41a   : > { %2399 = vrot.lane.b32.xlu0 %v2393_v62, %s3869_s26 }
 0x41b   : > { %v5054_v36 = vpop.permute.xlu1 %1430 }
 0x41c   : > { %2365 = vrot.lane.b32.xlu1 %v2359_v12, %s3869_s26  ;;  %v5059_v19 = vpop.permute.xlu0 %1872  ;;  %v6369_v12 = vld [vmem:[#allocation27_spill] sm:$0xff] }
 0x41d   : > { %6368 = vst [vmem:[#allocation97_spill] sm:$0xff] %v5059_v19  ;;  %v2428_v58 = vmul.f32 %v2422_v61, %v6369_v12  ;;  %v2418_v19 = vrot.slane %v2271_v63, %v3978_v13 }
 0x41e   : > { %2403 = vrot.lane.b32.xlu0 %v2395_v51, %s3869_s26 }
 0x41f   : > { %v5067_v62 = vpop.permute.xlu1 %1464 }
 0x420   : > { %2369 = vrot.lane.b32.xlu1 %v2361_v53, %s3869_s26  ;;  %v5073_v5 = vpop.permute.xlu0 %1876  ;;  %v2427_v53 = vmul.f32 %v2418_v19, %v6369_v12 }
 0x421   : > { %6370 = vst [vmem:[#allocation27_spill] sm:$0xff] %v5073_v5 }
 0x422   : > { %2435 = vrot.lane.b32.xlu0 %v2428_v58, %s3869_s26  ;;  %v2426_v58 = vrot.slane %v2273_v26, %v3978_v13 }
 0x423   : > { %v5080_v51 = vpop.permute.xlu1 %1498 }
 0x424   : > { %2401 = vrot.lane.b32.xlu1 %v2394_v16, %s3869_s26  ;;  %v5085_v61 = vpop.permute.xlu0 %1894  ;;  %v2429_v33 = vmul.f32 %v2426_v58, %v6369_v12  ;;  %v2490_v16 = vrot.slane %v5050_v4, %v4008_v22  ;;  %v2520_v12 = vrot.slane %v2271_v63, %v4010_v25 }
 0x425   : > { %6371 = vst [vmem:[#allocation98_spill] sm:$0xff] %v5085_v61 }
 0x426   : > { %2467 = vrot.lane.b32.xlu0 %v2461_v29, %s3869_s26  ;;  %v2456_v29 = vrot.slane %v5050_v4, %v3967_v8 }
 0x427   : > { %v5090_v47 = vpop.permute.xlu1 %1546 }
 0x428   : > { %2433 = vrot.lane.b32.xlu1 %v2427_v53, %s3869_s26  ;;  %v5095_v5 = vpop.permute.xlu0 %1898  ;;  %v2496_v53 = vmul.f32 %v2490_v16, %v4737_v41  ;;  %v2462_v32 = vmul.f32 %v2456_v29, %v4723_v0  ;;  %v2528_v16 = vrot.slane %v2273_v26, %v4010_v25  ;;  %v2494_v29 = vrot.slane %v2273_v26, %v4008_v22 }
 0x429   : > { %6372 = vst [vmem:[#allocation99_spill] sm:$0xff] %v5095_v5  ;;  %v6374_v5 = vld [vmem:[#allocation28_spill] sm:$0xff] }
 0x42a   : > { %2471 = vrot.lane.b32.xlu0 %v2463_v9, %s3869_s26  ;;  %v2486_v9 = vrot.slane %v2271_v63, %v4008_v22  ;;  %v2529_v52 = vmul.f32 %v2520_v12, %v6374_v5  ;;  %v2531_v63 = vmul.f32 %v2528_v16, %v6374_v5  ;;  %v2574_v16 = vmul.f32 %v4761_v60, %v4508_v50 }
 0x42b   : > { %v5101_v19 = vpop.permute.xlu1 %1581 }
 0x42c   : > { %6373 = vst [vmem:[#allocation100_spill] sm:$0xff] %v5101_v19  ;;  %2437 = vrot.lane.b32.xlu1 %v2429_v33, %s3869_s26  ;;  %v5107_v61 = vpop.permute.xlu0 %1916  ;;  %v2495_v33 = vmul.f32 %v2486_v9, %v4737_v41  ;;  %v2524_v9 = vrot.slane %v5050_v4, %v4010_v25 }
 0x42e   : > { %2503 = vrot.lane.b32.xlu0 %v2496_v53, %s3869_s26 }
 0x42f   : > { %v5112_v58 = vpop.permute.xlu1 %1615 }
 0x430   : > { %2469 = vrot.lane.b32.xlu1 %v2462_v32, %s3869_s26  ;;  %v5117_v19 = vpop.permute.xlu0 %1920  ;;  %v2497_v32 = vmul.f32 %v2494_v29, %v4737_v41  ;;  %v2551_v29 = vmul.f32 %v4748_v34, %v4478_v31  ;;  %v6375_v31 = vld [vmem:[#allocation29_spill] sm:$0xff] }
 0x432   : > { %2535 = vrot.lane.b32.xlu0 %v2529_v52, %s3869_s26  ;;  %v2552_v52 = vmul.f32 %v4748_v34, %v6314_v1 }
 0x433   : > { %v5122_v0 = vpop.permute.xlu1 %1649 }
 0x434   : > { %2501 = vrot.lane.b32.xlu1 %v2495_v33, %s3869_s26  ;;  %v5127_v53 = vpop.permute.xlu0 %1938  ;;  %v2530_v33 = vmul.f32 %v2524_v9, %v6374_v5  ;;  %v2576_v5 = vmul.f32 %v4761_v60, %v4204_v27  ;;  %v2597_v9 = vmul.f32 %v6375_v31, %v6321_v11 }
 0x436   : > { %2539 = vrot.lane.b32.xlu0 %v2531_v63, %s3869_s26 }
 0x437   : > { %v5131_v12 = vpop.permute.xlu1 %1683 }
 0x438   : > { %2505 = vrot.lane.b32.xlu1 %v2497_v32, %s3869_s26  ;;  %v5138_v26 = vpop.permute.xlu0 %1942  ;;  %v2553_v32 = vmul.f32 %v4748_v34, %v4492_v7  ;;  %v2618_v7 = vmul.f32 %v4773_v30, %v4233_v49 }
 0x43a   : > { %2559 = vrot.lane.b32.xlu0 %v2552_v52, %s3870_s28 }
 0x43b   : > { %v5142_v41 = vpop.permute.xlu1 %1717 }
 0x43c   : > { %2537 = vrot.lane.b32.xlu1 %v2530_v33, %s3869_s26  ;;  %v5147_v4 = vpop.permute.xlu0 %1960  ;;  %v2575_v33 = vmul.f32 %v4761_v60, %v4520_v28  ;;  %v2620_v28 = vmul.f32 %v4773_v30, %v4243_v54 }
 0x43e   : > { %2580 = vrot.lane.b32.xlu0 %v2574_v16, %s3870_s28  ;;  %v2596_v16 = vmul.f32 %v6375_v31, %v4214_v42  ;;  %v2641_v42 = vmul.f32 %v4787_v45, %v4573_v24 }
 0x43f   : > { %v5152_v1 = vpop.permute.xlu1 %1751 }
 0x440   : > { %2557 = vrot.lane.b32.xlu1 %v2551_v29, %s3870_s28  ;;  %v5157_v63 = vpop.permute.xlu0 %1964  ;;  %v2598_v29 = vmul.f32 %v6375_v31, %v4223_v46  ;;  %v6377_v46 = vld [vmem:[#allocation30_spill] sm:$0xff] }
 0x441   : > { %v2662_v31 = vmul.f32 %v6377_v46, %v4273_v37 }
 0x442   : > { %2584 = vrot.lane.b32.xlu0 %v2576_v5, %s3870_s28 }
 0x443   : > { %v5162_v50 = vpop.permute.xlu1 %1785 }
 0x444   : > { %2561 = vrot.lane.b32.xlu1 %v2553_v32, %s3870_s28  ;;  %v5167_v52 = vpop.permute.xlu0 %2009  ;;  %v2619_v32 = vmul.f32 %v4773_v30, %v6326_v55  ;;  %v2664_v55 = vmul.f32 %v6377_v46, %v4283_v44 }
 0x446   : > { %2604 = vrot.lane.b32.xlu0 %v2597_v9, %s3870_s28 }
 0x447   : > { %v5172_v27 = vpop.permute.xlu1 %1807 }
 0x448   : > { %2582 = vrot.lane.b32.xlu1 %v2575_v33, %s3870_s28  ;;  %v5177_v34 = vpop.permute.xlu0 %2013  ;;  %v2640_v33 = vmul.f32 %v4787_v45, %v4251_v57  ;;  %v2685_v57 = vmul.f32 %v4798_v56, %v6333_v59 }
 0x44a   : > { %2624 = vrot.lane.b32.xlu0 %v2618_v7, %s3870_s28  ;;  %v2642_v7 = vmul.f32 %v4787_v45, %v4265_v17  ;;  %v2706_v17 = vmul.f32 %v4809_v38, %v6315_v2  ;;  %v6384_v2 = vld [vmem:[#allocation24_spill] sm:$0xff] }
 0x44b   : > { %v5182_v11 = vpop.permute.xlu1 %1830 }
 0x44c   : > { %2602 = vrot.lane.b32.xlu1 %v2596_v16, %s3870_s28  ;;  %v5187_v60 = vpop.permute.xlu0 %2044 }
 0x44e   : > { %2628 = vrot.lane.b32.xlu0 %v2620_v28, %s3870_s28  ;;  %v2663_v28 = vmul.f32 %v6377_v46, %v6330_v10 }
 0x44f   : > { %v5192_v49 = vpop.permute.xlu1 %1852 }
 0x450   : > { %2606 = vrot.lane.b32.xlu1 %v2598_v29, %s3870_s28  ;;  %v5197_v5 = vpop.permute.xlu0 %2048  ;;  %v6381_v29 = vld [vmem:[#allocation13_spill] sm:$0xff] }
 0x451   : > { %6376 = vst [vmem:[#allocation28_spill] sm:$0xff] %v5197_v5 }
 0x452   : > { %2648 = vrot.lane.b32.xlu0 %v2641_v42, %s3870_s28  ;;  %v6382_v42 = vld [vmem:[#allocation11_spill] sm:$0xff] }
 0x453   : > { %v5202_v54 = vpop.permute.xlu1 %1874  ;;  %v5241_v59 = vsel %vm2728_vm13, %v6382_v42, %v6381_v29 }
 0x454   : > { %2626 = vrot.lane.b32.xlu1 %v2619_v32, %s3870_s28  ;;  %v5207_v9 = vpop.permute.xlu0 %2078  ;;  %6383 = vst [vmem:[#allocation102_spill] sm:$0xff] %v5241_v59  ;;  %v2684_v32 = vmul.f32 %v4798_v56, %v6310_v35  ;;  %v5247_v10 = vmul.f32 %v5241_v59, %v4137_v20  ;;  %v2733_v35 = vmul.f32 %v6382_v42, %v4141_v23 }
 0x456   : > { %2668 = vrot.lane.b32.xlu0 %v2662_v31, %s3870_s28  ;;  %v2708_v31 = vmul.f32 %v4809_v38, %v6384_v2  ;;  %v2750_v20 = vrot.slane %v5247_v10, %v3978_v13  ;;  %v6389_v2 = vld [vmem:[#allocation54_spill] sm:$0xff]  ;;  %v2781_v23 = vrot.slane %v2733_v35, %v3967_v8 }
 0x457   : > { %v5212_v24 = vpop.permute.xlu1 %1896 }
 0x458   : > { %2646 = vrot.lane.b32.xlu1 %v2640_v33, %s3870_s28  ;;  %v5217_v30 = vpop.permute.xlu0 %2082 }
 0x459   : > { %6378 = vst [vmem:[#allocation29_spill] sm:$0xff] %v5217_v30 }
 0x45a   : > { %2672 = vrot.lane.b32.xlu0 %v2664_v55, %s3870_s28  ;;  %v6386_v55 = vld [vmem:[#allocation22_spill] sm:$0xff] }
 0x45b   : > { %v5222_v37 = vpop.permute.xlu1 %1918 }
 0x45c   : > { %2650 = vrot.lane.b32.xlu1 %v2642_v7, %s3870_s28  ;;  %v5227_v16 = vpop.permute.xlu0 %2112  ;;  %v2686_v7 = vmul.f32 %v4798_v56, %v6386_v55  ;;  %v2735_v56 = vmul.f32 %v6381_v29, %v6322_v15  ;;  %v2746_v55 = vrot.slane %v2733_v35, %v3978_v13 }
 0x45d   : > { %6379 = vst [vmem:[#allocation30_spill] sm:$0xff] %v5227_v16 }
 0x45e   : > { %2692 = vrot.lane.b32.xlu0 %v2685_v57, %s3870_s28 }
 0x45f   : > { %v5232_v44 = vpop.permute.xlu1 %1940 }
 0x460   : > { %2670 = vrot.lane.b32.xlu1 %v2663_v28, %s3870_s28  ;;  %v5237_v45 = vpop.permute.xlu0 %2116  ;;  %v6387_v28 = vld [vmem:[#allocation31_spill] sm:$0xff] }
 0x461   : > { %6380 = vst [vmem:[#allocation101_spill] sm:$0xff] %v5237_v45  ;;  %v2707_v45 = vmul.f32 %v4809_v38, %v6389_v2  ;;  %v2755_v38 = vmul.f32 %v2746_v55, %v6387_v28  ;;  %v2789_v2 = vrot.slane %v2735_v56, %v3967_v8 }
 0x462   : > { %2712 = vrot.lane.b32.xlu0 %v2706_v17, %s3870_s28  ;;  %v2756_v17 = vmul.f32 %v2750_v20, %v6387_v28 }
 0x463   : > { %v5250_v46 = vpop.permute.xlu1 %1962 }
 0x464   : > { %2690 = vrot.lane.b32.xlu1 %v2684_v32, %s3870_s28  ;;  %v5255_v33 = vpop.permute.xlu0 %2146 }
 0x465   : > { %6385 = vst [vmem:[#allocation24_spill] sm:$0xff] %v5255_v33 }
 0x466   : > { %2716 = vrot.lane.b32.xlu0 %v2708_v31, %s3870_s28 }
 0x467   : > { %v5264_v57 = vpop.permute.xlu1 %2011 }
 0x468   : > { %2694 = vrot.lane.b32.xlu1 %v2686_v7, %s3870_s28  ;;  %v5268_v32 = vpop.permute.xlu0 %2150  ;;  %v6390_v7 = vld [vmem:[#allocation32_spill] sm:$0xff] }
 0x469   : > { %6388 = vst [vmem:[#allocation22_spill] sm:$0xff] %v5268_v32  ;;  %v2790_v20 = vmul.f32 %v2781_v23, %v6390_v7  ;;  %v2792_v33 = vmul.f32 %v2789_v2, %v6390_v7  ;;  %v2819_v23 = vrot.slane %v5247_v10, %v4008_v22 }
 0x46a   : > { %2763 = vrot.lane.b32.xlu0 %v2756_v17, %s3871_s30  ;;  %v2754_v17 = vrot.slane %v2735_v56, %v3978_v13 }
 0x46b   : > { %v5276_v31 = vpop.permute.xlu1 %2046 }
 0x46c   : > { %2714 = vrot.lane.b32.xlu1 %v2707_v45, %s3870_s28  ;;  %v5281_v32 = vpop.permute.xlu0 %2184  ;;  %v2757_v45 = vmul.f32 %v2754_v17, %v6387_v28  ;;  %v2849_v28 = vrot.slane %v2733_v35, %v4010_v25 }
 0x46d   : > { %6391 = vst [vmem:[#allocation31_spill] sm:$0xff] %v5281_v32  ;;  %v6394_v32 = vld [vmem:[#allocation23_spill] sm:$0xff] }
 0x46e   : > { %2796 = vrot.lane.b32.xlu0 %v2790_v20, %s3871_s30  ;;  %v2785_v20 = vrot.slane %v5247_v10, %v3967_v8 }
 0x46f   : > { %v5286_v15 = vpop.permute.xlu1 %2080 }
 0x470   : > { %2761 = vrot.lane.b32.xlu1 %v2755_v38, %s3871_s30  ;;  %v5291_v30 = vpop.permute.xlu0 %2216  ;;  %v2825_v38 = vmul.f32 %v2819_v23, %v6394_v32  ;;  %v2791_v2 = vmul.f32 %v2785_v20, %v6390_v7  ;;  %v2737_v23 = vmul.f32 %v5241_v59, %v4153_v6  ;;  %v2857_v7 = vrot.slane %v2735_v56, %v4010_v25 }
 0x471   : > { %6392 = vst [vmem:[#allocation54_spill] sm:$0xff] %v5291_v30  ;;  %v6395_v30 = vld [vmem:[#allocation18_spill] sm:$0xff] }
 0x472   : > { %2800 = vrot.lane.b32.xlu0 %v2792_v33, %s3871_s30  ;;  %v2815_v33 = vrot.slane %v2733_v35, %v4008_v22  ;;  %v2860_v35 = vmul.f32 %v2857_v7, %v6395_v30  ;;  %v2887_v6 = vrot.slane %v2737_v23, %v3978_v13 }
 0x473   : > { %v5297_v55 = vpop.permute.xlu1 %2114 }
 0x474   : > { %6393 = vst [vmem:[#allocation32_spill] sm:$0xff] %v5297_v55  ;;  %2765 = vrot.lane.b32.xlu1 %v2757_v45, %s3871_s30  ;;  %v5303_v16 = vpop.permute.xlu0 %2248  ;;  %v2858_v55 = vmul.f32 %v2849_v28, %v6395_v30  ;;  %v2824_v45 = vmul.f32 %v2815_v33, %v6394_v32  ;;  %v2736_v33 = vmul.f32 %v6382_v42, %v6342_v18 }
 0x475   : > { %v2738_v18 = vmul.f32 %v6381_v29, %v6344_v21 }
 0x476   : > { %2832 = vrot.lane.b32.xlu0 %v2825_v38, %s3871_s30  ;;  %v2823_v38 = vrot.slane %v2735_v56, %v4008_v22  ;;  %v2853_v56 = vrot.slane %v5247_v10, %v4010_v25  ;;  %v2883_v42 = vrot.slane %v2736_v33, %v3978_v13  ;;  %v6399_v10 = vld [vmem:[#allocation75_spill] sm:$0xff] }
 0x477   : > { %v5308_v17 = vpop.permute.xlu1 %2148 }
 0x478   : > { %2798 = vrot.lane.b32.xlu1 %v2791_v2, %s3871_s30  ;;  %v5313_v5 = vpop.permute.xlu0 %2252  ;;  %v2826_v28 = vmul.f32 %v2823_v38, %v6394_v32  ;;  %v2859_v32 = vmul.f32 %v2853_v56, %v6395_v30  ;;  %v2917_v38 = vrot.slane %v2736_v33, %v3967_v8  ;;  %v2925_v30 = vrot.slane %v2738_v18, %v3967_v8 }
 0x479   : > { %6396 = vst [vmem:[#allocation23_spill] sm:$0xff] %v5313_v5  ;;  %v2891_v56 = vrot.slane %v2738_v18, %v3978_v13 }
 0x47a   : > { %2864 = vrot.lane.b32.xlu0 %v2858_v55, %s3871_s30 }
 0x47b   : > { %v5320_v20 = vpop.permute.xlu1 %2180 }
 0x47c   : > { %2830 = vrot.lane.b32.xlu1 %v2824_v45, %s3871_s30  ;;  %v5325_v2 = vpop.permute.xlu0 %2298  ;;  %v6397_v45 = vld [vmem:[#allocation33_spill] sm:$0xff] }
 0x47d   : > { %v2893_v7 = vmul.f32 %v2887_v6, %v6397_v45 }
 0x47e   : > { %2868 = vrot.lane.b32.xlu0 %v2860_v35, %s3871_s30 }
 0x47f   : > { %v5332_v55 = vpop.permute.xlu1 %2182 }
 0x480   : > { %2834 = vrot.lane.b32.xlu1 %v2826_v28, %s3871_s30  ;;  %v5338_v59 = vpop.permute.xlu0 %2331  ;;  %v2926_v28 = vmul.f32 %v2917_v38, %v6399_v10  ;;  %v2951_v38 = vrot.slane %v2736_v33, %v4008_v22 }
 0x481   : > { %6398 = vst [vmem:[#allocation18_spill] sm:$0xff] %v5338_v59  ;;  %v2892_v59 = vmul.f32 %v2883_v42, %v6397_v45 }
 0x482   : > { %2900 = vrot.lane.b32.xlu0 %v2893_v7, %s3871_s30  ;;  %v2928_v7 = vmul.f32 %v2925_v30, %v6399_v10  ;;  %v2959_v30 = vrot.slane %v2738_v18, %v4008_v22 }
 0x483   : > { %v5345_v35 = vpop.permute.xlu1 %2214 }
 0x484   : > { %2866 = vrot.lane.b32.xlu1 %v2859_v32, %s3871_s30  ;;  %v5350_v6 = vpop.permute.xlu0 %2335  ;;  %v2894_v32 = vmul.f32 %v2891_v56, %v6397_v45 }
 0x485   : > { %6400 = vst [vmem:[#allocation33_spill] sm:$0xff] %v5350_v6  ;;  %v6402_v6 = vld [vmem:[#allocation48_spill] sm:$0xff] }
 0x486   : > { %2932 = vrot.lane.b32.xlu0 %v2926_v28, %s3871_s30  ;;  %v2921_v28 = vrot.slane %v2737_v23, %v3967_v8  ;;  %v2960_v13 = vmul.f32 %v2951_v38, %v6402_v6  ;;  %v2962_v56 = vmul.f32 %v2959_v30, %v6402_v6  ;;  %v3012_v8 = vld [vmem:[%s6122_s9] sm:$0xf]  ;;  %v2955_v38 = vrot.slane %v2737_v23, %v4008_v22 }
 0x487   : > { %v5355_v21 = vpop.permute.xlu1 %2218 }
 0x488   : > { %2898 = vrot.lane.b32.xlu1 %v2892_v59, %s3871_s30  ;;  %v5360_v29 = vpop.permute.xlu0 %2367  ;;  %v2927_v59 = vmul.f32 %v2921_v28, %v6399_v10  ;;  %v6407_v28 = vld [vmem:[#allocation34_spill] sm:$0xff]  ;;  %v2961_v30 = vmul.f32 %v2955_v38, %v6402_v6 }
 0x489   : > { %6401 = vst [vmem:[#allocation75_spill] sm:$0xff] %v5360_v29  ;;  %v6411_v29 = vmov 2  }
 0x48a   : > { %2936 = vrot.lane.b32.xlu0 %v2928_v7, %s3871_s30 }
 0x48b   : > { %v5365_v42 = vpop.permute.xlu1 %2250 }
 0x48c   : > { %2902 = vrot.lane.b32.xlu1 %v2894_v32, %s3871_s30  ;;  %v5370_v5 = vpop.permute.xlu0 %2399  ;;  %v2989_v32 = vrot.slane %v2737_v23, %v4010_v25  ;;  %v5405_v23 = vld [vmem:[%s6123_s10] sm:$0xf] }
 0x48d   : > { %6403 = vst [vmem:[#allocation48_spill] sm:$0xff] %v5370_v5  ;;  %v2985_v5 = vrot.slane %v2736_v33, %v4010_v25  ;;  %6412 = vst [vmem:[#allocation108_spill] sm:$0xff] %v5405_v23  ;;  %v2993_v33 = vrot.slane %v2738_v18, %v4010_v25  ;;  %v6420_v25 = vld [vmem:[#allocation79_spill] sm:$0xff] }
 0x48e   : > { %2966 = vrot.lane.b32.xlu0 %v2960_v13, %s3871_s30  ;;  %v2995_v13 = vmul.f32 %v2989_v32, %v6407_v28  ;;  %v6415_v32 = vld [vmem:[#allocation78_spill] sm:$0xff] }
 0x48f   : > { %v5375_v45 = vpop.permute.xlu1 %2296  ;;  %v2994_v22 = vmul.f32 %v2985_v5, %v6407_v28  ;;  %v2996_v5 = vmul.f32 %v2993_v33, %v6407_v28 }
 0x490   : > { %6404 = vst [vmem:[#allocation103_spill] sm:$0xff] %v5375_v45  ;;  %2934 = vrot.lane.b32.xlu1 %v2927_v59, %s3871_s30  ;;  %v5379_v7 = vpop.permute.xlu0 %2403 }
 0x491   : > { %6405 = vst [vmem:[#allocation104_spill] sm:$0xff] %v5379_v7 }
 0x492   : > { %2970 = vrot.lane.b32.xlu0 %v2962_v56, %s3871_s30 }
 0x493   : > { %v5386_v10 = vpop.permute.xlu1 %2300 }
 0x494   : > { %6406 = vst [vmem:[#allocation105_spill] sm:$0xff] %v5386_v10  ;;  %3015 = vperm.xlu1 %3739, %v3012_v8   ;;  %v5390_v59 = vpop.permute.xlu0 %2435  ;;  %v6414_v8 = vld [vmem:[#allocation35_spill] sm:$0xff]  ;;  %v6427_v10 = vld [vmem:[#allocation38_spill] sm:$0xff] }
 0x495   : > { %6408 = vst [vmem:[#allocation34_spill] sm:$0xff] %v5390_v59  ;;  %v967_v38 = vsel %vm966_vm14, %v6415_v32, %v6414_v8  ;;  %v968_v18 = vsel %vm966_vm14, %v6414_v8, %v6420_v25 }
 0x496   : > { %3002 = vrot.lane.b32.xlu0 %v2995_v13, %s3871_s30 }
 0x497   : > { %v5394_v7 = vpop.permute.xlu1 %2333 }
 0x498   : > { %6409 = vst [vmem:[#allocation106_spill] sm:$0xff] %v5394_v7  ;;  %2968 = vrot.lane.b32.xlu1 %v2961_v30, %s3871_s30  ;;  %v5398_v56 = vpop.permute.xlu0 %2467  ;;  %v1001_v30 = vsel %vm966_vm14, %v4898_v39, %v4910_v3  ;;  %v6423_v39 = vld [vmem:[#allocation36_spill] sm:$0xff]  ;;  %v6435_v7 = vld [vmem:[#allocation42_spill] sm:$0xff] }
 0x499   : > { %6410 = vst [vmem:[#allocation107_spill] sm:$0xff] %v5398_v56  ;;  %3741 = vset.pattern.permute.xlu1 %v6411_v29  ;;  %v6417_v29 = vld [vmem:[#allocation17_spill] sm:$0xff] }
 0x49a   : > { %3047 = vperm.xlu0 %3740, %v5405_v23   ;;  %v971_v56 = vadd.f32 %v967_v38, %v6417_v29  ;;  %v1002_v29 = vsel %vm966_vm14, %v4910_v3, %v6423_v39  ;;  %v6424_v38 = vld [vmem:[#allocation39_spill] sm:$0xff] }
 0x49b   : > { %v5407_v6 = vpop.permute.xlu1 %2365 }
 0x49c   : > { %6413 = vst [vmem:[#allocation109_spill] sm:$0xff] %v5407_v6  ;;  %3000 = vrot.lane.b32.xlu1 %v2994_v22, %s3871_s30  ;;  %v5415_v13 = vpop.permute.xlu0 %2471  ;;  %v6419_v6 = vmov 4   ;;  %v6421_v22 = vld [vmem:[#allocation37_spill] sm:$0xff]  ;;  %v1005_v28 = vadd.f32 %v1001_v30, %v971_v56  ;;  %v6428_v56 = vld [vmem:[#allocation82_spill] sm:$0xff] }
 0x49d   : > { %6416 = vst [vmem:[#allocation35_spill] sm:$0xff] %v5415_v13  ;;  %v1035_v32 = vsel %vm966_vm14, %v6421_v22, %v4922_v48  ;;  %v6425_v13 = vld [vmem:[#allocation19_spill] sm:$0xff]  ;;  %v6429_v30 = vld [vmem:[#allocation41_spill] sm:$0xff] }
 0x49e   : > { %3743 = vset.pattern.permute.xlu0 %v6419_v6  ;;  %v1069_v6 = vsel %vm966_vm14, %v6424_v38, %v4934_v40  ;;  %v1039_v8 = vadd.f32 %v1035_v32, %v1005_v28  ;;  %v1103_v22 = vsel %vm966_vm14, %v6429_v30, %v6428_v56  ;;  %v6431_v38 = vld [vmem:[#allocation40_spill] sm:$0xff]  ;;  %v1104_v30 = vsel %vm966_vm14, %v6428_v56, %v6435_v7 }
 0x49f   : > { %v5422_v59 = vpop.permute.xlu1 %2369  ;;  %v6433_v32 = vld [vmem:[#allocation44_spill] sm:$0xff] }
 0x4a0   : > { %6418 = vst [vmem:[#allocation78_spill] sm:$0xff] %v5422_v59  ;;  %3004 = vrot.lane.b32.xlu1 %v2996_v5, %s3871_s30  ;;  %v5432_v33 = vpop.permute.xlu0 %2503  ;;  %v972_v59 = vadd.f32 %v968_v18, %v6425_v13  ;;  %v1036_v5 = vsel %vm966_vm14, %v4922_v48, %v6427_v10  ;;  %v1073_v39 = vadd.f32 %v1069_v6, %v1039_v8  ;;  %v6432_v18 = vld [vmem:[#allocation84_spill] sm:$0xff]  ;;  %v6437_v6 = vld [vmem:[#allocation47_spill] sm:$0xff]  ;;  %v6438_v8 = vmov 3  }
 0x4a1   : > { %6422 = vst [vmem:[#allocation17_spill] sm:$0xff] %v5432_v33  ;;  %v1070_v13 = vsel %vm966_vm14, %v4934_v40, %v6431_v38  ;;  %v1137_v28 = vsel %vm966_vm14, %v6433_v32, %v6432_v18 }
 0x4a2   : > { %v1006_v3 = vadd.f32 %v1002_v29, %v972_v59  ;;  %v1107_v48 = vadd.f32 %v1103_v22, %v1073_v39  ;;  %v6436_v59 = vld [vmem:[#allocation85_spill] sm:$0xff]  ;;  %v6442_v39 = vld [vmem:[#allocation52_spill] sm:$0xff] }
 0x4a3   : > { %v5441_v25 = vpop.permute.xlu1 %2401  ;;  %v1171_v29 = vsel %vm966_vm14, %v6437_v6, %v6436_v59 }
 0x4a4   : > { %6426 = vst [vmem:[#allocation79_spill] sm:$0xff] %v5441_v25  ;;  %3072 = vperm.xlu1 %3741, %v5405_v23   ;;  %v5450_v33 = vpop.permute.xlu0 %2535  ;;  %v1040_v25 = vadd.f32 %v1036_v5, %v1006_v3  ;;  %v1141_v40 = vadd.f32 %v1137_v28, %v1107_v48  ;;  %v6440_v5 = vld [vmem:[#allocation46_spill] sm:$0xff]  ;;  %v6441_v3 = vld [vmem:[#allocation88_spill] sm:$0xff]  ;;  %v6445_v28 = vld [vmem:[#allocation57_spill] sm:$0xff] }
 0x4a5   : > { %6430 = vst [vmem:[#allocation37_spill] sm:$0xff] %v5450_v33  ;;  %v1138_v22 = vsel %vm966_vm14, %v6432_v18, %v6440_v5  ;;  %v1205_v7 = vsel %vm966_vm14, %v6442_v39, %v6441_v3  ;;  %v6447_v18 = vmov 5   ;;  %v6448_v5 = vld [vmem:[#allocation55_spill] sm:$0xff] }
 0x4a6   : > { %v1074_v33 = vadd.f32 %v1070_v13, %v1040_v25  ;;  %v1175_v32 = vadd.f32 %v1171_v29, %v1141_v40  ;;  %v6444_v13 = vld [vmem:[#allocation90_spill] sm:$0xff]  ;;  %v6450_v29 = vld [vmem:[#allocation59_spill] sm:$0xff] }
 0x4a7   : > { %v5458_v10 = vpop.permute.xlu1 %2433  ;;  %v1264_v48 = vsel %vm1263_vm15, %v6445_v28, %v6444_v13 }
 0x4a8   : > { %6434 = vst [vmem:[#allocation36_spill] sm:$0xff] %v5458_v10  ;;  %3742 = vset.pattern.permute.xlu1 %v6438_v8  ;;  %v5467_v38 = vpop.permute.xlu0 %2539  ;;  %v1108_v56 = vadd.f32 %v1104_v30, %v1074_v33  ;;  %v6443_v8 = vld [vmem:[#allocation49_spill] sm:$0xff]  ;;  %v1209_v10 = vadd.f32 %v1205_v7, %v1175_v32  ;;  %v1206_v33 = vsel %vm966_vm14, %v6441_v3, %v6448_v5  ;;  %v6449_v30 = vld [vmem:[#allocation92_spill] sm:$0xff] }
 0x4a9   : > { %6439 = vst [vmem:[#allocation39_spill] sm:$0xff] %v5467_v38  ;;  %3097 = vperm.xlu1 %3742, %v5405_v23   ;;  %v1172_v25 = vsel %vm966_vm14, %v6436_v59, %v6443_v8  ;;  %v1298_v40 = vsel %vm1263_vm15, %v6450_v29, %v6449_v30 }
 0x4aa   : > { %v1142_v38 = vadd.f32 %v1138_v22, %v1108_v56  ;;  %v1268_v8 = vadd.f32 %v1264_v48, %v1209_v10  ;;  %v6451_v22 = vld [vmem:[#allocation58_spill] sm:$0xff]  ;;  %v6452_v56 = vld [vmem:[#allocation61_spill] sm:$0xff]  ;;  %v6455_v10 = vld [vmem:[#allocation63_spill] sm:$0xff]  ;;  %v6456_v48 = vmov 6  }
 0x4ab   : > { %v5476_v6 = vpop.permute.xlu1 %2437  ;;  %v1265_v7 = vsel %vm1263_vm15, %v6444_v13, %v6451_v22  ;;  %v1332_v32 = vsel %vm1263_vm15, %v6452_v56, %v5018_v14  ;;  %v6460_v56 = vld [vmem:[#allocation65_spill] sm:$0xff] }
 0x4ac   : > { %v5484_v45 = vpop.permute.xlu0 %2559  ;;  %v1176_v59 = vadd.f32 %v1172_v25, %v1142_v38  ;;  %v1302_v3 = vadd.f32 %v1298_v40, %v1268_v8  ;;  %v6454_v38 = vld [vmem:[#allocation94_spill] sm:$0xff] }
 0x4ad   : > { %6446 = vst [vmem:[#allocation19_spill] sm:$0xff] %v5484_v45  ;;  %3744 = vset.pattern.permute.xlu1 %v6447_v18  ;;  %v6453_v18 = vld [vmem:[#allocation60_spill] sm:$0xff]  ;;  %v1366_v25 = vsel %vm1263_vm15, %v6455_v10, %v6454_v38  ;;  %v6457_v45 = vld [vmem:[#allocation62_spill] sm:$0xff]  ;;  %v1367_v10 = vsel %vm1263_vm15, %v6454_v38, %v6460_v56 }
 0x4ae   : > { %3144 = vperm.xlu1 %3744, %v5405_v23   ;;  %v1210_v28 = vadd.f32 %v1206_v33, %v1176_v59  ;;  %v1299_v29 = vsel %vm1263_vm15, %v6449_v30, %v6453_v18  ;;  %v1336_v13 = vadd.f32 %v1332_v32, %v1302_v3  ;;  %v1333_v33 = vsel %vm1263_vm15, %v5018_v14, %v6457_v45  ;;  %v6458_v40 = vld [vmem:[#allocation66_spill] sm:$0xff]  ;;  %v6462_v14 = vld [vmem:[#allocation67_spill] sm:$0xff] }
 0x4af   : > { %v5494_v39 = vpop.permute.xlu1 %2469  ;;  %v1400_v59 = vsel %vm1263_vm15, %v6458_v40, %v5040_v43  ;;  %v1401_v45 = vsel %vm1263_vm15, %v5040_v43, %v6462_v14  ;;  %v6464_v40 = vld [vmem:[#allocation69_spill] sm:$0xff] }
 0x4b0   : > { %v5502_v5 = vpop.permute.xlu0 %2580  ;;  %v1269_v23 = vadd.f32 %v1265_v7, %v1210_v28  ;;  %v1370_v18 = vadd.f32 %v1366_v25, %v1336_v13  ;;  %v6461_v7 = vld [vmem:[#allocation68_spill] sm:$0xff] }
 0x4b1   : > { %v1434_v32 = vsel %vm1263_vm15, %v6461_v7, %v5054_v36  ;;  %v6466_v7 = vld [vmem:[#allocation71_spill] sm:$0xff] }
 0x4b2   : > { %3745 = vset.pattern.permute.xlu1 %v6456_v48  ;;  %v1303_v8 = vadd.f32 %v1299_v29, %v1269_v23  ;;  %v1404_v3 = vadd.f32 %v1400_v59, %v1370_v18  ;;  %v6463_v23 = vld [vmem:[#allocation70_spill] sm:$0xff]  ;;  %v6465_v59 = vld [vmem:[#allocation72_spill] sm:$0xff] }
 0x4b3   : > { %v5511_v22 = vpop.permute.xlu1 %2501  ;;  %v1468_v29 = vsel %vm1263_vm15, %v6463_v23, %v5067_v62 }
 0x4b4   : > { %v5519_v30 = vpop.permute.xlu0 %2584  ;;  %v1337_v28 = vadd.f32 %v1333_v33, %v1303_v8  ;;  %v1438_v13 = vadd.f32 %v1434_v32, %v1404_v3  ;;  %v1435_v33 = vsel %vm1263_vm15, %v5054_v36, %v6464_v40  ;;  %v1502_v8 = vsel %vm1263_vm15, %v6465_v59, %v5080_v51  ;;  %v6467_v32 = vld [vmem:[#allocation73_spill] sm:$0xff] }
 0x4b5   : > { %6459 = vst [vmem:[#allocation38_spill] sm:$0xff] %v5519_v30  ;;  %v6468_v36 = vld [vmem:[#allocation21_spill] sm:$0xff] }
 0x4b6   : > { %v1371_v25 = vadd.f32 %v1367_v10, %v1337_v28  ;;  %v1472_v56 = vadd.f32 %v1468_v29, %v1438_v13  ;;  %v1469_v10 = vsel %vm1263_vm15, %v5067_v62, %v6466_v7  ;;  %v1551_v28 = vsel %vm1550_vm0, %v6467_v32, %v5090_v47  ;;  %v6470_v29 = vld [vmem:[#allocation74_spill] sm:$0xff]  ;;  %v6471_v62 = vld [vmem:[#allocation16_spill] sm:$0xff] }
 0x4b7   : > { %v5527_v48 = vpop.permute.xlu1 %2505  ;;  %v1503_v40 = vsel %vm1263_vm15, %v5080_v51, %v6468_v36  ;;  %v1552_v7 = vsel %vm1550_vm0, %v5090_v47, %v6471_v62  ;;  %v6473_v51 = vld [vmem:[#allocation43_spill] sm:$0xff]  ;;  %v6475_v47 = vld [vmem:[#allocation76_spill] sm:$0xff] }
 0x4b8   : > { %v5535_v38 = vpop.permute.xlu0 %2604  ;;  %v1405_v18 = vadd.f32 %v1401_v45, %v1371_v25  ;;  %v1506_v14 = vadd.f32 %v1502_v8, %v1472_v56  ;;  %v6469_v45 = vld [vmem:[#allocation100_spill] sm:$0xff]  ;;  %v1620_v62 = vsel %vm1550_vm0, %v5112_v58, %v6475_v47 }
 0x4b9   : > { %v1585_v25 = vsel %vm1550_vm0, %v6470_v29, %v6469_v45  ;;  %v1586_v36 = vsel %vm1550_vm0, %v6469_v45, %v6473_v51  ;;  %v6477_v45 = vld [vmem:[#allocation51_spill] sm:$0xff] }
 0x4ba   : > { %v1439_v3 = vadd.f32 %v1435_v33, %v1405_v18  ;;  %v1555_v59 = vadd.f32 %v1551_v28, %v1506_v14  ;;  %v6472_v33 = vld [vmem:[#allocation45_spill] sm:$0xff]  ;;  %v1654_v51 = vsel %vm1550_vm0, %v5122_v0, %v6477_v45 }
 0x4bb   : > { %v5543_v43 = vpop.permute.xlu1 %2537  ;;  %v1619_v8 = vsel %vm1550_vm0, %v6472_v33, %v5112_v58  ;;  %v6479_v58 = vld [vmem:[#allocation56_spill] sm:$0xff] }
 0x4bc   : > { %v5551_v23 = vpop.permute.xlu0 %2624  ;;  %v1473_v13 = vadd.f32 %v1469_v10, %v1439_v3  ;;  %v1589_v56 = vadd.f32 %v1585_v25, %v1555_v59  ;;  %v6474_v10 = vld [vmem:[#allocation77_spill] sm:$0xff]  ;;  %v1688_v47 = vsel %vm1550_vm0, %v5131_v12, %v6479_v58 }
 0x4bd   : > { %v1653_v28 = vsel %vm1550_vm0, %v6474_v10, %v5122_v0 }
 0x4be   : > { %v1507_v18 = vadd.f32 %v1503_v40, %v1473_v13  ;;  %v1623_v14 = vadd.f32 %v1619_v8, %v1589_v56  ;;  %v6476_v40 = vld [vmem:[#allocation80_spill] sm:$0xff] }
 0x4bf   : > { %v5559_v30 = vpop.permute.xlu1 %2557  ;;  %v1687_v25 = vsel %vm1550_vm0, %v6476_v40, %v5131_v12  ;;  %v6481_v40 = vld [vmem:[#allocation20_spill] sm:$0xff] }
 0x4c0   : > { %v5567_v32 = vpop.permute.xlu0 %2628  ;;  %v1556_v3 = vadd.f32 %v1552_v7, %v1507_v18  ;;  %v1657_v59 = vadd.f32 %v1653_v28, %v1623_v14  ;;  %v6478_v7 = vld [vmem:[#allocation15_spill] sm:$0xff] }
 0x4c1   : > { %v1721_v8 = vsel %vm1550_vm0, %v6478_v7, %v5142_v41  ;;  %v6483_v7 = vld [vmem:[#allocation83_spill] sm:$0xff] }
 0x4c2   : > { %v1590_v13 = vadd.f32 %v1586_v36, %v1556_v3  ;;  %v1691_v56 = vadd.f32 %v1687_v25, %v1657_v59  ;;  %v6480_v36 = vld [vmem:[#allocation81_spill] sm:$0xff] }
 0x4c3   : > { %v5575_v29 = vpop.permute.xlu1 %2561  ;;  %v1755_v28 = vsel %vm1550_vm0, %v6480_v36, %v5152_v1  ;;  %v6482_v25 = vld [vmem:[#allocation25_spill] sm:$0xff] }
 0x4c4   : > { %v5583_v33 = vpop.permute.xlu0 %2648  ;;  %v1624_v18 = vadd.f32 %v1620_v62, %v1590_v13  ;;  %v1725_v14 = vadd.f32 %v1721_v8, %v1691_v56  ;;  %v1722_v62 = vsel %vm1550_vm0, %v5142_v41, %v6481_v40  ;;  %v1789_v13 = vsel %vm1550_vm0, %v6482_v25, %v5162_v50  ;;  %v6484_v8 = vld [vmem:[#allocation89_spill] sm:$0xff]  ;;  %v6485_v41 = vld [vmem:[#allocation86_spill] sm:$0xff] }
 0x4c5   : > { %v1790_v40 = vsel %vm1550_vm0, %v5162_v50, %v6485_v41  ;;  %v6489_v50 = vld [vmem:[#allocation93_spill] sm:$0xff] }
 0x4c6   : > { %v1658_v3 = vadd.f32 %v1654_v51, %v1624_v18  ;;  %v1759_v45 = vadd.f32 %v1755_v28, %v1725_v14  ;;  %v1756_v51 = vsel %vm1550_vm0, %v5152_v1, %v6483_v7  ;;  %v1812_v18 = vsel %vm1811_vm1, %v6484_v8, %v5172_v27  ;;  %v6487_v1 = vld [vmem:[#allocation91_spill] sm:$0xff] }
 0x4c7   : > { %v5591_v10 = vpop.permute.xlu1 %2582  ;;  %v1813_v7 = vsel %vm1811_vm1, %v5172_v27, %v6487_v1  ;;  %v1835_v41 = vsel %vm1811_vm1, %v5182_v11, %v6489_v50  ;;  %v6491_v27 = vld [vmem:[#allocation96_spill] sm:$0xff] }
 0x4c8   : > { %v5599_v0 = vpop.permute.xlu0 %2668  ;;  %v1692_v59 = vadd.f32 %v1688_v47, %v1658_v3  ;;  %v1793_v58 = vadd.f32 %v1789_v13, %v1759_v45  ;;  %v6486_v47 = vld [vmem:[#allocation26_spill] sm:$0xff]  ;;  %v1857_v1 = vsel %vm1811_vm1, %v5192_v49, %v6491_v27 }
 0x4c9   : > { %v1834_v28 = vsel %vm1811_vm1, %v6486_v47, %v5182_v11  ;;  %v6493_v11 = vld [vmem:[#allocation27_spill] sm:$0xff] }
 0x4ca   : > { %v1726_v56 = vadd.f32 %v1722_v62, %v1692_v59  ;;  %v1816_v14 = vadd.f32 %v1812_v18, %v1793_v58  ;;  %v6488_v62 = vld [vmem:[#allocation95_spill] sm:$0xff]  ;;  %v1879_v50 = vsel %vm1811_vm1, %v5202_v54, %v6493_v11 }
 0x4cb   : > { %v5607_v12 = vpop.permute.xlu1 %2602  ;;  %v1856_v13 = vsel %vm1811_vm1, %v6488_v62, %v5192_v49  ;;  %v6494_v49 = vld [vmem:[#allocation99_spill] sm:$0xff] }
 0x4cc   : > { %v5615_v36 = vpop.permute.xlu0 %2672  ;;  %v1760_v3 = vadd.f32 %v1756_v51, %v1726_v56  ;;  %v1838_v45 = vadd.f32 %v1834_v28, %v1816_v14  ;;  %v6490_v51 = vld [vmem:[#allocation97_spill] sm:$0xff] }
 0x4cd   : > { %v1878_v18 = vsel %vm1811_vm1, %v6490_v51, %v5202_v54  ;;  %v1901_v51 = vsel %vm1811_vm1, %v5212_v24, %v6494_v49 }
 0x4ce   : > { %v1794_v59 = vadd.f32 %v1790_v40, %v1760_v3  ;;  %v1860_v58 = vadd.f32 %v1856_v13, %v1838_v45  ;;  %v6492_v40 = vld [vmem:[#allocation98_spill] sm:$0xff] }
 0x4cf   : > { %v5623_v25 = vpop.permute.xlu1 %2606  ;;  %v1900_v28 = vsel %vm1811_vm1, %v6492_v40, %v5212_v24  ;;  %v2016_v40 = vsel %vm2015_vm2, %v5167_v52, %v5264_v57  ;;  %v2084_v52 = vsel %vm2015_vm2, %v5207_v9, %v5286_v15 }
 0x4d0   : > { %v5631_v8 = vpop.permute.xlu0 %2692  ;;  %v1817_v56 = vadd.f32 %v1813_v7, %v1794_v59  ;;  %v1882_v14 = vadd.f32 %v1878_v18, %v1860_v58  ;;  %v1922_v7 = vsel %vm1811_vm1, %v5107_v61, %v5222_v37  ;;  %v1923_v61 = vsel %vm1811_vm1, %v5222_v37, %v5117_v19 }
 0x4d1   : > { %v1966_v58 = vsel %vm1811_vm1, %v5147_v4, %v5250_v46  ;;  %v1967_v19 = vsel %vm1811_vm1, %v5250_v46, %v5157_v63  ;;  %v2050_v4 = vsel %vm2015_vm2, %v5187_v60, %v5276_v31  ;;  %v6495_v63 = vld [vmem:[#allocation28_spill] sm:$0xff] }
 0x4d2   : > { %v1839_v3 = vadd.f32 %v1835_v41, %v1817_v56  ;;  %v1904_v59 = vadd.f32 %v1900_v28, %v1882_v14  ;;  %v1944_v41 = vsel %vm1811_vm1, %v5127_v53, %v5232_v44  ;;  %v1945_v53 = vsel %vm1811_vm1, %v5232_v44, %v5138_v26  ;;  %v6496_v46 = vld [vmem:[#allocation32_spill] sm:$0xff] }
 0x4d3   : > { %v5639_v47 = vpop.permute.xlu1 %2626  ;;  %v2017_v26 = vsel %vm2015_vm2, %v5264_v57, %v5177_v34  ;;  %v2051_v60 = vsel %vm2015_vm2, %v5276_v31, %v6495_v63  ;;  %v6498_v34 = vld [vmem:[#allocation29_spill] sm:$0xff]  ;;  %v6499_v57 = vld [vmem:[#allocation24_spill] sm:$0xff] }
 0x4d4   : > { %v5647_v62 = vpop.permute.xlu0 %2712  ;;  %v1861_v13 = vadd.f32 %v1857_v1, %v1839_v3  ;;  %v1926_v56 = vadd.f32 %v1922_v7, %v1904_v59  ;;  %v6497_v59 = vld [vmem:[#allocation30_spill] sm:$0xff]  ;;  %v2085_v9 = vsel %vm2015_vm2, %v5286_v15, %v6498_v34  ;;  %v6500_v31 = vld [vmem:[#allocation101_spill] sm:$0xff] }
 0x4d5   : > { %v2118_v49 = vsel %vm2015_vm2, %v6497_v59, %v6496_v46  ;;  %v6501_v15 = vld [vmem:[#allocation22_spill] sm:$0xff] }
 0x4d6   : > { %v1883_v18 = vadd.f32 %v1879_v50, %v1861_v13  ;;  %v1948_v1 = vadd.f32 %v1944_v41, %v1926_v56  ;;  %v2152_v56 = vsel %vm2015_vm2, %v6499_v57, %v5308_v17  ;;  %v6507_v34 = vld [vmem:[#allocation18_spill] sm:$0xff] }
 0x4d7   : > { %v5655_v45 = vpop.permute.xlu1 %2646 }
 0x4d8   : > { %v5663_v54 = vpop.permute.xlu0 %2716  ;;  %v1905_v27 = vadd.f32 %v1901_v51, %v1883_v18  ;;  %v1970_v3 = vadd.f32 %v1966_v58, %v1948_v1  ;;  %v2119_v1 = vsel %vm2015_vm2, %v6496_v46, %v6500_v31  ;;  %v6504_v46 = vld [vmem:[#allocation103_spill] sm:$0xff] }
 0x4d9   : > { %v2303_v59 = vsel %vm2302_vm3, %v6504_v46, %v5325_v2  ;;  %v6509_v31 = vld [vmem:[#allocation75_spill] sm:$0xff] }
 0x4da   : > { %v1927_v28 = vadd.f32 %v1923_v61, %v1905_v27  ;;  %v2020_v11 = vadd.f32 %v2016_v40, %v1970_v3 }
 0x4db   : > { %v5671_v24 = vpop.permute.xlu1 %2650 }
 0x4dc   : > { %v5679_v14 = vpop.permute.xlu0 %2763  ;;  %v1949_v37 = vadd.f32 %v1945_v53, %v1927_v28  ;;  %v2054_v7 = vadd.f32 %v2050_v4, %v2020_v11  ;;  %v2186_v53 = vsel %vm2015_vm2, %v5320_v20, %v5332_v55  ;;  %v6502_v4 = vld [vmem:[#allocation54_spill] sm:$0xff]  ;;  %v2254_v20 = vsel %vm2015_vm2, %v5303_v16, %v5365_v42 }
 0x4de   : > { %v1971_v44 = vadd.f32 %v1967_v19, %v1949_v37  ;;  %v2088_v41 = vadd.f32 %v2084_v52, %v2054_v7  ;;  %v2153_v19 = vsel %vm2015_vm2, %v5308_v17, %v6501_v15  ;;  %v2220_v37 = vsel %vm2015_vm2, %v5345_v35, %v6502_v4  ;;  %v6503_v52 = vld [vmem:[#allocation31_spill] sm:$0xff] }
 0x4df   : > { %v5687_v50 = vpop.permute.xlu1 %2670  ;;  %v2221_v35 = vsel %vm2015_vm2, %v6502_v4, %v5355_v21  ;;  %v6512_v4 = vld [vmem:[#allocation79_spill] sm:$0xff] }
 0x4e0   : > { %v5695_v13 = vpop.permute.xlu0 %2796  ;;  %v2021_v51 = vadd.f32 %v2017_v26, %v1971_v44  ;;  %v2122_v58 = vadd.f32 %v2118_v49, %v2088_v41  ;;  %v2187_v44 = vsel %vm2015_vm2, %v5332_v55, %v6503_v52  ;;  %v6506_v41 = vld [vmem:[#allocation106_spill] sm:$0xff] }
 0x4e2   : > { %v2055_v61 = vadd.f32 %v2051_v60, %v2021_v51  ;;  %v2156_v28 = vadd.f32 %v2152_v56, %v2122_v58  ;;  %v6505_v51 = vld [vmem:[#allocation23_spill] sm:$0xff]  ;;  %v6508_v58 = vld [vmem:[#allocation105_spill] sm:$0xff] }
 0x4e3   : > { %v5703_v18 = vpop.permute.xlu1 %2690  ;;  %v2255_v16 = vsel %vm2015_vm2, %v5365_v42, %v6505_v51  ;;  %v2304_v21 = vsel %vm2302_vm3, %v5325_v2, %v6508_v58  ;;  %v6511_v42 = vld [vmem:[#allocation33_spill] sm:$0xff]  ;;  %v6514_v2 = vld [vmem:[#allocation78_spill] sm:$0xff]  ;;  %v6518_v51 = vld [vmem:[#allocation107_spill] sm:$0xff] }
 0x4e4   : > { %v5711_v27 = vpop.permute.xlu0 %2800  ;;  %v2089_v40 = vadd.f32 %v2085_v9, %v2055_v61  ;;  %v2190_v26 = vadd.f32 %v2186_v53, %v2156_v28  ;;  %v2337_v9 = vsel %vm2302_vm3, %v6507_v34, %v6506_v41  ;;  %v6519_v58 = vld [vmem:[#allocation17_spill] sm:$0xff] }
 0x4e6   : > { %v2123_v11 = vadd.f32 %v2119_v1, %v2089_v40  ;;  %v2224_v63 = vadd.f32 %v2220_v37, %v2190_v26  ;;  %v6510_v1 = vld [vmem:[#allocation109_spill] sm:$0xff]  ;;  %v6513_v37 = vld [vmem:[#allocation48_spill] sm:$0xff] }
 0x4e7   : > { %v5719_v3 = vpop.permute.xlu1 %2694  ;;  %v2371_v53 = vsel %vm2302_vm3, %v6510_v1, %v6509_v31 }
 0x4e8   : > { %v2157_v7 = vadd.f32 %v2153_v19, %v2123_v11  ;;  %v5733_v60 = vpop.permute.xlu0 %2832  ;;  %v2258_v55 = vadd.f32 %v2254_v20, %v2224_v63  ;;  %v2338_v19 = vsel %vm2302_vm3, %v6506_v41, %v6511_v42  ;;  %v2405_v11 = vsel %vm2302_vm3, %v6513_v37, %v6512_v4  ;;  %v6516_v63 = vld [vmem:[#allocation36_spill] sm:$0xff] }
 0x4e9   : > { %v2372_v20 = vsel %vm2302_vm3, %v6509_v31, %v6514_v2 }
 0x4ea   : > { %v2191_v49 = vadd.f32 %v2187_v44, %v2157_v7  ;;  %v2307_v56 = vadd.f32 %v2303_v59, %v2258_v55  ;;  %v6515_v7 = vld [vmem:[#allocation34_spill] sm:$0xff] }
 0x4eb   : > { %v5735_v17 = vpop.permute.xlu1 %2714 }
 0x4ec   : > { %v2225_v57 = vadd.f32 %v2221_v35, %v2191_v49  ;;  %v2341_v28 = vadd.f32 %v2337_v9, %v2307_v56  ;;  %v5757_v15 = vpop.permute.xlu0 %2864  ;;  %v2439_v35 = vsel %vm2302_vm3, %v6516_v63, %v6515_v7  ;;  %v6517_v49 = vld [vmem:[#allocation104_spill] sm:$0xff]  ;;  %v2440_v56 = vsel %vm2302_vm3, %v6515_v7, %v5476_v6 }
 0x4ed   : > { %v2406_v55 = vsel %vm2302_vm3, %v6512_v4, %v6517_v49  ;;  %v2508_v6 = vsel %vm2302_vm3, %v6519_v58, %v5527_v48  ;;  %v2586_v7 = vsel %vm2563_vm4, %v5502_v5, %v5591_v10  ;;  %v2630_v5 = vsel %vm2563_vm4, %v5551_v23, %v5639_v47 }
 0x4ee   : > { %v2259_v40 = vadd.f32 %v2255_v16, %v2225_v57  ;;  %v2375_v52 = vadd.f32 %v2371_v53, %v2341_v28  ;;  %v2473_v16 = vsel %vm2302_vm3, %v6518_v51, %v5494_v39  ;;  %v6520_v53 = vld [vmem:[#allocation35_spill] sm:$0xff]  ;;  %v6521_v28 = vld [vmem:[#allocation37_spill] sm:$0xff]  ;;  %v2674_v23 = vsel %vm2563_vm4, %v5599_v0, %v5687_v50 }
 0x4ef   : > { %v5749_v61 = vpop.permute.xlu1 %2761  ;;  %v2541_v42 = vsel %vm2302_vm3, %v6521_v28, %v5543_v43  ;;  %v2718_v0 = vsel %vm2563_vm4, %v5647_v62, %v5735_v17 }
 0x4f0   : > { %v2308_v26 = vadd.f32 %v2304_v21, %v2259_v40  ;;  %v2409_v59 = vadd.f32 %v2405_v11, %v2375_v52  ;;  %v5779_v9 = vpop.permute.xlu0 %2868  ;;  %v2507_v21 = vsel %vm2302_vm3, %v5511_v22, %v6519_v58  ;;  %v2474_v40 = vsel %vm2302_vm3, %v5494_v39, %v6520_v53  ;;  %v6522_v11 = vld [vmem:[#allocation19_spill] sm:$0xff] }
 0x4f1   : > { %v2564_v22 = vsel %vm2563_vm4, %v5559_v30, %v6522_v11  ;;  %v6523_v39 = vld [vmem:[#allocation39_spill] sm:$0xff]  ;;  %v2565_v48 = vsel %vm2563_vm4, %v6522_v11, %v5575_v29  ;;  %v2608_v30 = vsel %vm2563_vm4, %v5607_v12, %v5535_v38  ;;  %v2609_v29 = vsel %vm2563_vm4, %v5535_v38, %v5623_v25 }
 0x4f2   : > { %v2342_v46 = vadd.f32 %v2338_v19, %v2308_v26  ;;  %v2443_v34 = vadd.f32 %v2439_v35, %v2409_v59  ;;  %v2652_v12 = vsel %vm2563_vm4, %v5655_v45, %v5583_v33  ;;  %v2653_v38 = vsel %vm2563_vm4, %v5583_v33, %v5671_v24 }
 0x4f3   : > { %v5765_v44 = vpop.permute.xlu1 %2765  ;;  %v2696_v25 = vsel %vm2563_vm4, %v5703_v18, %v5631_v8  ;;  %v2697_v33 = vsel %vm2563_vm4, %v5631_v8, %v5719_v3  ;;  %v2768_v24 = vsel %vm2767_vm5, %v5749_v61, %v5679_v14 }
 0x4f4   : > { %v2376_v41 = vadd.f32 %v2372_v20, %v2342_v46  ;;  %v2477_v1 = vadd.f32 %v2473_v16, %v2443_v34  ;;  %v5801_v2 = vpop.permute.xlu0 %2900  ;;  %v2542_v20 = vsel %vm2302_vm3, %v5543_v43, %v6523_v39  ;;  %v2769_v8 = vsel %vm2767_vm5, %v5679_v14, %v5765_v44 }
 0x4f6   : > { %v2410_v31 = vadd.f32 %v2406_v55, %v2376_v41  ;;  %v2511_v4 = vadd.f32 %v2507_v21, %v2477_v1  ;;  %v6524_v55 = vld [vmem:[#allocation38_spill] sm:$0xff] }
 0x4f7   : > { %v5781_v57 = vpop.permute.xlu1 %2798  ;;  %v2587_v43 = vsel %vm2563_vm4, %v5591_v10, %v6524_v55  ;;  %v2631_v10 = vsel %vm2563_vm4, %v5639_v47, %v5567_v32  ;;  %v2675_v32 = vsel %vm2563_vm4, %v5687_v50, %v5615_v36  ;;  %v2719_v36 = vsel %vm2563_vm4, %v5735_v17, %v5663_v54 }
 0x4f8   : > { %v2444_v19 = vadd.f32 %v2440_v56, %v2410_v31  ;;  %v2545_v52 = vadd.f32 %v2541_v42, %v2511_v4  ;;  %v2933_v41 = vpop.permute.xlu0 %2932  ;;  %v2802_v62 = vsel %vm2767_vm5, %v5695_v13, %v5781_v57  ;;  %v2803_v54 = vsel %vm2767_vm5, %v5781_v57, %v5711_v27 }
 0x4fa   : > { %v2478_v26 = vadd.f32 %v2474_v40, %v2444_v19  ;;  %v2568_v35 = vadd.f32 %v2564_v22, %v2545_v52 }
 0x4fb   : > { %v2831_v37 = vpop.permute.xlu1 %2830 }
 0x4fc   : > { %v2512_v63 = vadd.f32 %v2508_v6, %v2478_v26  ;;  %v2590_v49 = vadd.f32 %v2586_v7, %v2568_v35  ;;  %v2937_v40 = vpop.permute.xlu0 %2936  ;;  %v2836_v3 = vsel %vm2767_vm5, %v2831_v37, %v5733_v60 }
 0x4fe   : > { %v2546_v59 = vadd.f32 %v2542_v20, %v2512_v63  ;;  %v2612_v16 = vadd.f32 %v2608_v30, %v2590_v49 }
 0x4ff   : > { %v2835_v46 = vpop.permute.xlu1 %2834 }
 0x500   : > { %v2569_v51 = vadd.f32 %v2565_v48, %v2546_v59  ;;  %v2634_v58 = vadd.f32 %v2630_v5, %v2612_v16  ;;  %v2967_v6 = vpop.permute.xlu0 %2966  ;;  %v2837_v39 = vsel %vm2767_vm5, %v5733_v60, %v2835_v46 }
 0x502   : > { %v2591_v56 = vadd.f32 %v2587_v43, %v2569_v51  ;;  %v2656_v31 = vadd.f32 %v2652_v12, %v2634_v58 }
 0x503   : > { %v2867_v34 = vpop.permute.xlu1 %2866 }
 0x504   : > { %v2613_v21 = vadd.f32 %v2609_v29, %v2591_v56  ;;  %v2678_v53 = vadd.f32 %v2674_v23, %v2656_v31  ;;  %v2870_v13 = vsel %vm2767_vm5, %v5757_v15, %v2867_v34  ;;  %v2971_v20 = vpop.permute.xlu0 %2970  ;;  %v2871_v7 = vsel %vm2767_vm5, %v2867_v34, %v5779_v9  ;;  %v6525_v23 = vld [vmem:[#allocation108_spill] sm:$0xff]  ;;  %v3237_v31 = vld [vmem:[%s6124_s11] sm:$0xf] }
 0x506   : > { %v2635_v45 = vadd.f32 %v2631_v10, %v2613_v21  ;;  %v2700_v28 = vadd.f32 %v2696_v25, %v2678_v53  ;;  %v6526_v21 = vmov 7   ;;  %v6529_v25 = vmov 1  }
 0x507   : > { %v2899_v1 = vpop.permute.xlu1 %2898 }
 0x508   : > { %v2657_v47 = vadd.f32 %v2653_v38, %v2635_v45  ;;  %v2722_v19 = vadd.f32 %v2718_v0, %v2700_v28  ;;  %v2904_v14 = vsel %vm2767_vm5, %v2899_v1, %v5801_v2  ;;  %v3003_v59 = vpop.permute.xlu0 %3002  ;;  %v6527_v1 = vmov 8  }
 0x509   : > { %v6528_v38 = vmov 0   ;;  %v6530_v45 = vmov 2  }
 0x50a   : > { %v2679_v18 = vadd.f32 %v2675_v32, %v2657_v47  ;;  %v2772_v4 = vadd.f32 %v2768_v24, %v2722_v19 }
 0x50b   : > { %v2903_v42 = vpop.permute.xlu1 %2902 }
 0x50c   : > { %v2701_v50 = vadd.f32 %v2697_v33, %v2679_v18  ;;  %v2806_v22 = vadd.f32 %v2802_v62, %v2772_v4  ;;  %v2905_v35 = vsel %vm2767_vm5, %v5801_v2, %v2903_v42 }
 0x50e   : > { %v2723_v61 = vadd.f32 %v2719_v36, %v2701_v50  ;;  %v2840_v26 = vadd.f32 %v2836_v3, %v2806_v22  ;;  %v6531_v3 = vld [vmem:[#allocation53_spill] sm:$0xff] }
 0x50f   : > { %v2935_v11 = vpop.permute.xlu1 %2934 }
 0x510   : > { %v2773_v17 = vadd.f32 %v2769_v8, %v2723_v61  ;;  %v2874_v37 = vadd.f32 %v2870_v13, %v2840_v26  ;;  %v2938_v27 = vsel %vm2767_vm5, %v2933_v41, %v2935_v11  ;;  %v2939_v30 = vsel %vm2767_vm5, %v2935_v11, %v2937_v40  ;;  %v6532_v13 = vld [vmem:[#allocation6_spill] sm:$0xff] }
 0x512   : > { %v2807_v44 = vadd.f32 %v2803_v54, %v2773_v17  ;;  %v2908_v63 = vadd.f32 %v2904_v14, %v2874_v37 }
 0x513   : > { %v3016_v52 = vpop.permute.xlu1 %3015 }
 0x514   : > { %v2841_v57 = vadd.f32 %v2837_v39, %v2807_v44  ;;  %v2942_v46 = vadd.f32 %v2938_v27, %v2908_v63  ;;  %v6534_v44 = vld [vmem:[#allocation10_spill] sm:$0xff] }
 0x516   : > { %v2875_v60 = vadd.f32 %v2871_v7, %v2841_v57  ;;  %v6535_v7 = vld [vmem:[#allocation8_spill] sm:$0xff]  ;;  %v6536_v57 = vld [vmem:[#allocation7_spill] sm:$0xff] }
 0x517   : > { %v2969_v15 = vpop.permute.xlu1 %2968 }
 0x518   : > { %v2972_v48 = vsel %vm2767_vm5, %v2967_v6, %v2969_v15  ;;  %v2909_v49 = vadd.f32 %v2905_v35, %v2875_v60  ;;  %v2973_v9 = vsel %vm2767_vm5, %v2969_v15, %v2971_v20 }
 0x519   : > { %v2976_v55 = vadd.f32 %v2972_v48, %v2942_v46  ;;  %v3048_v32 = vpop.permute.xlu0 %3047  ;;  %v6537_v48 = vld [vmem:[#allocation64_spill] sm:$0xff] }
 0x51a   : > { %v2943_v51 = vadd.f32 %v2939_v30, %v2909_v49  ;;  %v6538_v30 = vld [vmem:[#allocation12_spill] sm:$0xff] }
 0x51b   : > { %v3001_v43 = vpop.permute.xlu1 %3000 }
 0x51c   : > { %v3006_v5 = vsel %vm2767_vm5, %v3001_v43, %v3003_v59  ;;  %v2977_v41 = vadd.f32 %v2973_v9, %v2943_v51  ;;  %v6539_v43 = vld [vmem:[#allocation50_spill] sm:$0xff]  ;;  %v6540_v51 = vld [vmem:[#allocation87_spill] sm:$0xff] }
 0x51d   : > { %v3010_v16 = vadd.f32 %v3006_v5, %v2976_v55 }
 0x51f   : > { %v3018_v34 = vadd.f32 %v3016_v52, %v3010_v16  ;;  %v3005_v29 = vpop.permute.xlu1 %3004 }
 0x520   : > { %v3007_v2 = vsel %vm2767_vm5, %v3003_v59, %v3005_v29  ;;  %v6541_v29 = vld [vmem:[#allocation14_spill] sm:$0xff] }
 0x521   : > { %v3020_v12 = vmax.f32 %v3018_v34, 0.0  ;;  %v3011_v56 = vadd.f32 %v3007_v2, %v2977_v41 }
 0x523   : > { %v3019_v58 = vadd.f32 %v3016_v52, %v3011_v56  ;;  %3024 = vrot.lane.b32.xlu0 %v3020_v12, %s3789_s22  ;;  %v3073_v53 = vpop.permute.xlu1 %3072  ;;  %v6533_v52 = vld [vmem:[#allocation5_spill] sm:$0xff]  ;;  %v6542_v56 = vld [vmem:[#allocation102_spill] sm:$0xff] }
 0x525   : > { %v3021_v10 = vmax.f32 %v3019_v58, 0.0 }
 0x527   : > { %3119 = vperm.xlu0 %3743, %v6525_v23   ;;  %3026 = vrot.lane.b32.xlu1 %v3021_v10, %s3789_s22 }
 0x528   : > { %v3098_v40 = vpop.permute.xlu1 %3097 }
 0x52b   : > { %3746 = vset.pattern.permute.xlu0 %v6526_v21  ;;  %3169 = vperm.xlu1 %3745, %v6525_v23  }
 0x52c   : > { %3191 = vperm.xlu0 %3746, %v6525_v23  }
 0x52d   : > { %v3145_v0 = vpop.permute.xlu1 %3144 }
 0x52f   : > { %3747 = vset.pattern.permute.xlu1 %v6527_v1 }
 0x530   : > { %3216 = vperm.xlu1 %3747, %v6525_v23   ;;  %3749 = vset.pattern.permute.xlu0 %v6528_v38 }
 0x531   : > { %3240 = vperm.xlu0 %3749, %v3237_v31   ;;  %v6543_v31 = vld [vmem:[#allocation9_spill] sm:$0xff] }
 0x534   : > { %3748 = vset.pattern.permute.xlu1 %v6528_v38 }
 0x535   : > { %3039 = vperm.xlu1 %3748, %v6525_v23   ;;  %3750 = vset.pattern.permute.xlu0 %v6529_v25 }
 0x539   : > { %3751 = vset.pattern.permute.xlu1 %v6530_v45 }
 0x595   : > { %v3025_v47 = vpop.permute.xlu0 %3024 }
 0x596   : > { %v5898_v28 = vsel %vm777_vm10, 0.0, %v3025_v47 }
 0x597   : > { %v3050_v42 = vmul.f32 %v3048_v32, %v5898_v28  ;;  %v3093_v17 = vmul.f32 %v5898_v28, %v6532_v13  ;;  %v3068_v39 = vmul.f32 %v5898_v28, %v6533_v52  ;;  %v3140_v63 = vmul.f32 %v5898_v28, %v6536_v57 }
 0x598   : > { %v3165_v2 = vmul.f32 %v5898_v28, %v6541_v29 }
 0x599   : > { %3056 = vrot.lane.b32.xlu0 %v3050_v42, %s3838_s20  ;;  %v3027_v33 = vpop.permute.xlu1 %3026  ;;  %v3100_v14 = vmul.f32 %v3098_v40, %v3093_v17  ;;  %v3075_v20 = vmul.f32 %v3073_v53, %v3068_v39  ;;  %v3147_v46 = vmul.f32 %v3145_v0, %v3140_v63  ;;  %v6550_v63 = vld [vmem:[#allocation4_spill] sm:$0xff] }
 0x59a   : > { %v5903_v24 = vsel %vm777_vm10, %v3025_v47, %v3027_v33  ;;  %v5906_v18 = vsel %vm777_vm10, %v3027_v33, 0.0  ;;  %v6545_v47 = vld [vmem:[#allocation13_spill] sm:$0xff]  ;;  %v6546_v33 = vmov 4  }
 0x59b   : > { %v3052_v19 = vmul.f32 %v3048_v32, %v5906_v18  ;;  %v3051_v36 = vmul.f32 %v3048_v32, %v5903_v24  ;;  %v3069_v61 = vmul.f32 %v5903_v24, %v6531_v3  ;;  %v3095_v37 = vmul.f32 %v5906_v18, %v6534_v44  ;;  %v5968_v32 = vld [vmem:[%s6125_s12] sm:$0xf] }
 0x59c   : > { %v3070_v27 = vmul.f32 %v5906_v18, %v6535_v7  ;;  %v3094_v60 = vmul.f32 %v5903_v24, %v6537_v48  ;;  %v3142_v59 = vmul.f32 %v5906_v18, %v6538_v30  ;;  %v3141_v9 = vmul.f32 %v5903_v24, %v6539_v43 }
 0x59d   : > { %3060 = vrot.lane.b32.xlu0 %v3052_v19, %s3838_s20  ;;  %3058 = vrot.lane.b32.xlu1 %v3051_v36, %s3838_s20  ;;  %v3076_v54 = vmul.f32 %v3073_v53, %v3069_v61  ;;  %v3102_v15 = vmul.f32 %v3098_v40, %v3095_v37  ;;  %v3166_v16 = vmul.f32 %v5903_v24, %v6540_v51  ;;  %v6547_v36 = vmov 3  }
 0x59e   : > { %v3077_v35 = vmul.f32 %v3073_v53, %v3070_v27  ;;  %v3101_v55 = vmul.f32 %v3098_v40, %v3094_v60  ;;  %v3149_v5 = vmul.f32 %v3145_v0, %v3142_v59  ;;  %v3148_v41 = vmul.f32 %v3145_v0, %v3141_v9  ;;  %v6544_v53 = vld [vmem:[#allocation11_spill] sm:$0xff] }
 0x59f   : > { %v3213_v58 = vmul.f32 %v5903_v24, %v6542_v56  ;;  %v3167_v25 = vmul.f32 %v5906_v18, %v6543_v31  ;;  %v3212_v40 = vmul.f32 %v5898_v28, %v6544_v53  ;;  %v3214_v42 = vmul.f32 %v5906_v18, %v6545_v47 }
 0x5a6   : > { %v3120_v62 = vpop.permute.xlu0 %3119 }
 0x5a7   : > { %v3122_v50 = vmul.f32 %v3120_v62, %v5898_v28  ;;  %v3123_v4 = vmul.f32 %v3120_v62, %v5903_v24  ;;  %v3124_v6 = vmul.f32 %v3120_v62, %v5906_v18  ;;  %v6548_v62 = vmov 5  }
 0x5a9   : > { %3130 = vrot.lane.b32.xlu0 %v3123_v4, %s3867_s24  ;;  %3128 = vrot.lane.b32.xlu1 %v3122_v50, %s3867_s24  ;;  %v6549_v50 = vmov 6  }
 0x5aa   : > { %v3170_v49 = vpop.permute.xlu1 %3169 }
 0x5ab   : > { %v3192_v11 = vpop.permute.xlu0 %3191  ;;  %v3173_v34 = vmul.f32 %v3170_v49, %v3166_v16  ;;  %v3172_v10 = vmul.f32 %v3170_v49, %v3165_v2  ;;  %v3174_v45 = vmul.f32 %v3170_v49, %v3167_v25 }
 0x5ac   : > { %v3196_v8 = vmul.f32 %v3192_v11, %v5906_v18  ;;  %v3194_v22 = vmul.f32 %v3192_v11, %v5898_v28  ;;  %v3195_v26 = vmul.f32 %v3192_v11, %v5903_v24 }
 0x5ad   : > { %3132 = vrot.lane.b32.xlu1 %v3124_v6, %s3867_s24 }
 0x5ae   : > { %3204 = vrot.lane.b32.xlu0 %v3196_v8, %s3870_s28 }
 0x5af   : > { %v3217_v12 = vpop.permute.xlu1 %3216 }
 0x5b0   : > { %v3220_v23 = vmul.f32 %v3217_v12, %v3213_v58  ;;  %v3219_v0 = vmul.f32 %v3217_v12, %v3212_v40  ;;  %v3221_v19 = vmul.f32 %v3217_v12, %v3214_v42  ;;  %v5982_v18 = vpop.permute.xlu0 %3240 }
 0x5b1   : > { %3200 = vrot.lane.b32.xlu1 %v3194_v22, %s3870_s28 }
 0x5b2   : > { %3083 = vrot.lane.b32.xlu0 %v3076_v54, %s3850_s21 }
 0x5b4   : > { %v3040_v6 = vpop.permute.xlu1 %3039 }
 0x5b5   : > { %3202 = vrot.lane.b32.xlu1 %v3195_v26, %s3870_s28 }
 0x5b6   : > { %3106 = vrot.lane.b32.xlu0 %v3100_v14, %s3864_s23 }
 0x5b9   : > { %3081 = vrot.lane.b32.xlu1 %v3075_v20, %s3850_s21 }
 0x5ba   : > { %3110 = vrot.lane.b32.xlu0 %v3102_v15, %s3864_s23  ;;  %v3035_v15 = vmul.f32 %v5898_v28, %v6550_v63 }
 0x5bc   : > { %v3042_v60 = vmul.f32 %v3040_v6, %v3035_v15 }
 0x5bd   : > { %3085 = vrot.lane.b32.xlu1 %v3077_v35, %s3850_s21 }
 0x5be   : > { %3153 = vrot.lane.b32.xlu0 %v3147_v46, %s3868_s25 }
 0x5c1   : > { %3108 = vrot.lane.b32.xlu1 %v3101_v55, %s3864_s23  ;;  %v6551_v55 = vld [vmem:[#allocation3_spill] sm:$0xff] }
 0x5c2   : > { %3157 = vrot.lane.b32.xlu0 %v3149_v5, %s3868_s25  ;;  %v3036_v9 = vmul.f32 %v5903_v24, %v6551_v55 }
 0x5c5   : > { %3155 = vrot.lane.b32.xlu1 %v3148_v41, %s3868_s25  ;;  %v3043_v41 = vmul.f32 %v3040_v6, %v3036_v9 }
 0x5c6   : > { %3180 = vrot.lane.b32.xlu0 %v3173_v34, %s3869_s26 }
 0x5c9   : > { %3178 = vrot.lane.b32.xlu1 %v3172_v10, %s3869_s26 }
 0x5ca   : > { %3227 = vrot.lane.b32.xlu0 %v3220_v23, %s3871_s30 }
 0x5cd   : > { %3182 = vrot.lane.b32.xlu1 %v3174_v45, %s3869_s26 }
 0x5ce   : > { %3272 = vperm.xlu0 %3750, %v5968_v32  }
 0x5d1   : > { %3225 = vrot.lane.b32.xlu1 %v3219_v0, %s3871_s30 }
 0x5d2   : > { %3753 = vset.pattern.permute.xlu0 %v6546_v33 }
 0x5d5   : > { %3229 = vrot.lane.b32.xlu1 %v3221_v19, %s3871_s30 }
 0x5d9   : > { %3297 = vperm.xlu1 %3751, %v5968_v32  }
 0x5dd   : > { %3752 = vset.pattern.permute.xlu1 %v6547_v36 }
 0x5de   : > { %3322 = vperm.xlu1 %3752, %v5968_v32  }
 0x5e2   : > { %3754 = vset.pattern.permute.xlu1 %v6548_v62 }
 0x5e3   : > { %3369 = vperm.xlu1 %3754, %v5968_v32  }
 0x5e7   : > { %3755 = vset.pattern.permute.xlu1 %v6549_v50 }
 0x60b   : > { %v3057_v4 = vpop.permute.xlu0 %3056 }
 0x60f   : > { %v3061_v11 = vpop.permute.xlu0 %3060  ;;  %v3059_v8 = vpop.permute.xlu1 %3058 }
 0x610   : > { %v3062_v35 = vsel %vm966_vm14, %v3057_v4, %v3059_v8  ;;  %v3063_v16 = vsel %vm966_vm14, %v3059_v8, %v3061_v11 }
 0x611   : > { %v3066_v5 = vadd.f32 %v3062_v35, %v3042_v60  ;;  %v3067_v58 = vadd.f32 %v3063_v16, %v3043_v41 }
 0x61b   : > { %v3131_v61 = vpop.permute.xlu0 %3130  ;;  %v3129_v22 = vpop.permute.xlu1 %3128 }
 0x61c   : > { %v3134_v0 = vsel %vm1811_vm1, %v3129_v22, %v3131_v61 }
 0x61f   : > { %v3133_v54 = vpop.permute.xlu1 %3132 }
 0x620   : > { %v3205_v17 = vpop.permute.xlu0 %3204  ;;  %v3135_v62 = vsel %vm1811_vm1, %v3131_v61, %v3133_v54 }
 0x623   : > { %v3201_v26 = vpop.permute.xlu1 %3200 }
 0x624   : > { %v3084_v39 = vpop.permute.xlu0 %3083 }
 0x627   : > { %v3203_v14 = vpop.permute.xlu1 %3202 }
 0x628   : > { %v3107_v37 = vpop.permute.xlu0 %3106  ;;  %v3206_v22 = vsel %vm2563_vm4, %v3201_v26, %v3203_v14  ;;  %v3207_v54 = vsel %vm2563_vm4, %v3203_v14, %v3205_v17  ;;  %v3462_v17 = vld [vmem:[%s6126_s13] sm:$0xf] }
 0x62b   : > { %v3082_v20 = vpop.permute.xlu1 %3081 }
 0x62c   : > { %v3111_v27 = vpop.permute.xlu0 %3110  ;;  %v3087_v59 = vsel %vm1263_vm15, %v3082_v20, %v3084_v39 }
 0x62d   : > { %v3091_v34 = vadd.f32 %v3087_v59, %v3066_v5 }
 0x62f   : > { %v3086_v46 = vpop.permute.xlu1 %3085 }
 0x630   : > { %v3154_v49 = vpop.permute.xlu0 %3153  ;;  %v3088_v12 = vsel %vm1263_vm15, %v3084_v39, %v3086_v46 }
 0x631   : > { %v3092_v45 = vadd.f32 %v3088_v12, %v3067_v58 }
 0x633   : > { %v3109_v2 = vpop.permute.xlu1 %3108 }
 0x634   : > { %v3112_v28 = vsel %vm1550_vm0, %v3107_v37, %v3109_v2  ;;  %v3158_v23 = vpop.permute.xlu0 %3157  ;;  %v3113_v25 = vsel %vm1550_vm0, %v3109_v2, %v3111_v27 }
 0x635   : > { %v3116_v10 = vadd.f32 %v3112_v28, %v3091_v34  ;;  %v3117_v24 = vadd.f32 %v3113_v25, %v3092_v45 }
 0x637   : > { %v3156_v40 = vpop.permute.xlu1 %3155  ;;  %v3138_v42 = vadd.f32 %v3134_v0, %v3116_v10  ;;  %v3139_v4 = vadd.f32 %v3135_v62, %v3117_v24 }
 0x638   : > { %v3159_v33 = vsel %vm2015_vm2, %v3154_v49, %v3156_v40  ;;  %v3181_v19 = vpop.permute.xlu0 %3180  ;;  %v3160_v11 = vsel %vm2015_vm2, %v3156_v40, %v3158_v23 }
 0x639   : > { %v3163_v6 = vadd.f32 %v3159_v33, %v3138_v42  ;;  %v3164_v20 = vadd.f32 %v3160_v11, %v3139_v4 }
 0x63b   : > { %v3179_v36 = vpop.permute.xlu1 %3178 }
 0x63c   : > { %v3184_v50 = vsel %vm2302_vm3, %v3179_v36, %v3181_v19  ;;  %v3228_v27 = vpop.permute.xlu0 %3227 }
 0x63d   : > { %v3188_v8 = vadd.f32 %v3184_v50, %v3163_v6 }
 0x63f   : > { %v3183_v39 = vpop.permute.xlu1 %3182  ;;  %v3210_v35 = vadd.f32 %v3206_v22, %v3188_v8 }
 0x640   : > { %v3185_v37 = vsel %vm2302_vm3, %v3181_v19, %v3183_v39 }
 0x641   : > { %v3189_v15 = vadd.f32 %v3185_v37, %v3164_v20 }
 0x643   : > { %v3226_v60 = vpop.permute.xlu1 %3225  ;;  %v3211_v49 = vadd.f32 %v3207_v54, %v3189_v15 }
 0x644   : > { %v3231_v46 = vsel %vm2767_vm5, %v3226_v60, %v3228_v27 }
 0x645   : > { %v3235_v61 = vadd.f32 %v3231_v46, %v3210_v35 }
 0x647   : > { %v3243_v59 = vadd.f32 %v5982_v18, %v3235_v61  ;;  %v3230_v9 = vpop.permute.xlu1 %3229 }
 0x648   : > { %v3232_v5 = vsel %vm2767_vm5, %v3228_v27, %v3230_v9 }
 0x649   : > { %v3245_v16 = vmax.f32 %v3243_v59, 0.0  ;;  %v3236_v41 = vadd.f32 %v3232_v5, %v3211_v49 }
 0x64b   : > { %v3244_v34 = vadd.f32 %v5982_v18, %v3236_v41  ;;  %3249 = vrot.lane.b32.xlu0 %v3245_v16, %s3789_s22 }
 0x64d   : > { %v3246_v26 = vmax.f32 %v3244_v34, 0.0  ;;  %v3273_v14 = vpop.permute.xlu0 %3272 }
 0x64f   : > { %3344 = vperm.xlu0 %3753, %v5968_v32   ;;  %3251 = vrot.lane.b32.xlu1 %v3246_v26, %s3789_s22 }
 0x653   : > { %3756 = vset.pattern.permute.xlu0 %v6526_v21  ;;  %3394 = vperm.xlu1 %3755, %v5968_v32  }
 0x654   : > { %3416 = vperm.xlu0 %3756, %v5968_v32  }
 0x657   : > { %3757 = vset.pattern.permute.xlu1 %v6527_v1 }
 0x658   : > { %3441 = vperm.xlu1 %3757, %v5968_v32   ;;  %3759 = vset.pattern.permute.xlu0 %v6528_v38  ;;  %v3298_v21 = vpop.permute.xlu1 %3297 }
 0x659   : > { %3465 = vperm.xlu0 %3759, %v3462_v17  }
 0x65c   : > { %3758 = vset.pattern.permute.xlu1 %v6528_v38 }
 0x65d   : > { %3264 = vperm.xlu1 %3758, %v5968_v32   ;;  %v3323_v18 = vpop.permute.xlu1 %3322 }
 0x662   : > { %v3370_v2 = vpop.permute.xlu1 %3369 }
 0x6bd   : > { %v3250_v12 = vpop.permute.xlu0 %3249 }
 0x6be   : > { %v6021_v28 = vsel %vm777_vm10, 0.0, %v3250_v12 }
 0x6bf   : > { %v3275_v58 = vmul.f32 %v3273_v14, %v6021_v28  ;;  %v3318_v62 = vmul.f32 %v6021_v28, %v6532_v13  ;;  %v3293_v4 = vmul.f32 %v6021_v28, %v6533_v52  ;;  %v3365_v13 = vmul.f32 %v6021_v28, %v6536_v57 }
 0x6c1   : > { %3281 = vrot.lane.b32.xlu0 %v3275_v58, %s3838_s20  ;;  %v3252_v1 = vpop.permute.xlu1 %3251  ;;  %v3300_v11 = vmul.f32 %v3298_v21, %v3293_v4  ;;  %v3260_v58 = vmul.f32 %v6021_v28, %v6550_v63 }
 0x6c2   : > { %v6026_v10 = vsel %vm777_vm10, %v3250_v12, %v3252_v1  ;;  %v3258_v38 = vsel %vm777_vm10, %v3252_v1, 0.0 }
 0x6c3   : > { %v3277_v23 = vmul.f32 %v3273_v14, %v3258_v38  ;;  %v3276_v32 = vmul.f32 %v3273_v14, %v6026_v10  ;;  %v3294_v33 = vmul.f32 %v6026_v10, %v6531_v3  ;;  %v3325_v3 = vmul.f32 %v3323_v18, %v3318_v62 }
 0x6c4   : > { %v3320_v6 = vmul.f32 %v3258_v38, %v6534_v44  ;;  %v3295_v8 = vmul.f32 %v3258_v38, %v6535_v7  ;;  %v3319_v52 = vmul.f32 %v6026_v10, %v6537_v48  ;;  %v3372_v44 = vmul.f32 %v3370_v2, %v3365_v13 }
 0x6c5   : > { %3285 = vrot.lane.b32.xlu0 %v3277_v23, %s3838_s20  ;;  %3283 = vrot.lane.b32.xlu1 %v3276_v32, %s3838_s20  ;;  %v3301_v36 = vmul.f32 %v3298_v21, %v3294_v33  ;;  %v3367_v20 = vmul.f32 %v3258_v38, %v6538_v30  ;;  %v3366_v57 = vmul.f32 %v6026_v10, %v6539_v43 }
 0x6c6   : > { %v3327_v39 = vmul.f32 %v3323_v18, %v3320_v6  ;;  %v3302_v37 = vmul.f32 %v3298_v21, %v3295_v8  ;;  %v3326_v22 = vmul.f32 %v3323_v18, %v3319_v52  ;;  %v3391_v15 = vmul.f32 %v6026_v10, %v6540_v51 }
 0x6c7   : > { %v3374_v27 = vmul.f32 %v3370_v2, %v3367_v20  ;;  %v3373_v48 = vmul.f32 %v3370_v2, %v3366_v57  ;;  %v3390_v30 = vmul.f32 %v6021_v28, %v6541_v29  ;;  %v3438_v46 = vmul.f32 %v6026_v10, %v6542_v56 }
 0x6c8   : > { %v3392_v54 = vmul.f32 %v3258_v38, %v6543_v31  ;;  %v3437_v29 = vmul.f32 %v6021_v28, %v6544_v53  ;;  %v3439_v49 = vmul.f32 %v3258_v38, %v6545_v47 }
 0x6ce   : > { %v3345_v25 = vpop.permute.xlu0 %3344 }
 0x6cf   : > { %v3347_v45 = vmul.f32 %v3345_v25, %v6021_v28  ;;  %v3348_v40 = vmul.f32 %v3345_v25, %v6026_v10  ;;  %v3349_v0 = vmul.f32 %v3345_v25, %v3258_v38 }
 0x6d1   : > { %3355 = vrot.lane.b32.xlu0 %v3348_v40, %s3867_s24  ;;  %3353 = vrot.lane.b32.xlu1 %v3347_v45, %s3867_s24  ;;  %v3261_v45 = vmul.f32 %v6026_v10, %v6551_v55 }
 0x6d2   : > { %v3395_v7 = vpop.permute.xlu1 %3394 }
 0x6d3   : > { %v3417_v24 = vpop.permute.xlu0 %3416  ;;  %v3398_v35 = vmul.f32 %v3395_v7, %v3391_v15  ;;  %v3397_v43 = vmul.f32 %v3395_v7, %v3390_v30  ;;  %v3399_v51 = vmul.f32 %v3395_v7, %v3392_v54 }
 0x6d4   : > { %v3421_v42 = vmul.f32 %v3417_v24, %v3258_v38  ;;  %v3419_v19 = vmul.f32 %v3417_v24, %v6021_v28  ;;  %v3420_v50 = vmul.f32 %v3417_v24, %v6026_v10 }
 0x6d5   : > { %3357 = vrot.lane.b32.xlu1 %v3349_v0, %s3867_s24 }
 0x6d6   : > { %3429 = vrot.lane.b32.xlu0 %v3421_v42, %s3870_s28 }
 0x6d7   : > { %v3442_v60 = vpop.permute.xlu1 %3441 }
 0x6d8   : > { %v3445_v61 = vmul.f32 %v3442_v60, %v3438_v46  ;;  %v3444_v59 = vmul.f32 %v3442_v60, %v3437_v29  ;;  %v3446_v56 = vmul.f32 %v3442_v60, %v3439_v49  ;;  %v6082_v9 = vpop.permute.xlu0 %3465 }
 0x6d9   : > { %3425 = vrot.lane.b32.xlu1 %v3419_v19, %s3870_s28 }
 0x6da   : > { %3308 = vrot.lane.b32.xlu0 %v3301_v36, %s3850_s21 }
 0x6dc   : > { %v3265_v5 = vpop.permute.xlu1 %3264 }
 0x6dd   : > { %3427 = vrot.lane.b32.xlu1 %v3420_v50, %s3870_s28  ;;  %v3267_v38 = vmul.f32 %v3265_v5, %v3260_v58  ;;  %v3268_v24 = vmul.f32 %v3265_v5, %v3261_v45 }
 0x6de   : > { %3331 = vrot.lane.b32.xlu0 %v3325_v3, %s3864_s23 }
 0x6e1   : > { %3306 = vrot.lane.b32.xlu1 %v3300_v11, %s3850_s21 }
 0x6e2   : > { %3335 = vrot.lane.b32.xlu0 %v3327_v39, %s3864_s23 }
 0x6e5   : > { %3310 = vrot.lane.b32.xlu1 %v3302_v37, %s3850_s21  ;;  %s489_s21 = scalar_lea.vmem %s6127_s14, %s4002_s17 }
 0x6e6   : > { %3378 = vrot.lane.b32.xlu0 %v3372_v44, %s3868_s25 }
 0x6e9   : > { %3333 = vrot.lane.b32.xlu1 %v3326_v22, %s3864_s23 }
 0x6ea   : > { %3382 = vrot.lane.b32.xlu0 %v3374_v27, %s3868_s25 }
 0x6ed   : > { %3380 = vrot.lane.b32.xlu1 %v3373_v48, %s3868_s25 }
 0x6ee   : > { %3405 = vrot.lane.b32.xlu0 %v3398_v35, %s3869_s26 }
 0x6f1   : > { %3403 = vrot.lane.b32.xlu1 %v3397_v43, %s3869_s26 }
 0x6f2   : > { %3452 = vrot.lane.b32.xlu0 %v3445_v61, %s3871_s30 }
 0x6f5   : > { %3407 = vrot.lane.b32.xlu1 %v3399_v51, %s3869_s26 }
 0x6f9   : > { %3450 = vrot.lane.b32.xlu1 %v3444_v59, %s3871_s30 }
 0x6fd   : > { %3454 = vrot.lane.b32.xlu1 %v3446_v56, %s3871_s30 }
 0x733   : > { %v3282_v31 = vpop.permute.xlu0 %3281 }
 0x737   : > { %v3286_v16 = vpop.permute.xlu0 %3285  ;;  %v3284_v41 = vpop.permute.xlu1 %3283 }
 0x738   : > { %v3287_v1 = vsel %vm966_vm14, %v3282_v31, %v3284_v41  ;;  %v3288_v0 = vsel %vm966_vm14, %v3284_v41, %v3286_v16 }
 0x739   : > { %v3291_v40 = vadd.f32 %v3287_v1, %v3267_v38  ;;  %v3292_v28 = vadd.f32 %v3288_v0, %v3268_v24 }
 0x743   : > { %v3356_v34 = vpop.permute.xlu0 %3355  ;;  %v3354_v26 = vpop.permute.xlu1 %3353 }
 0x744   : > { %v3359_v6 = vsel %vm1811_vm1, %v3354_v26, %v3356_v34 }
 0x747   : > { %v3358_v17 = vpop.permute.xlu1 %3357 }
 0x748   : > { %v3430_v53 = vpop.permute.xlu0 %3429  ;;  %v3360_v39 = vsel %vm1811_vm1, %v3356_v34, %v3358_v17 }
 0x74b   : > { %v3426_v21 = vpop.permute.xlu1 %3425 }
 0x74c   : > { %v3309_v18 = vpop.permute.xlu0 %3308 }
 0x74f   : > { %v3428_v14 = vpop.permute.xlu1 %3427 }
 0x750   : > { %v3332_v2 = vpop.permute.xlu0 %3331  ;;  %v3431_v15 = vsel %vm2563_vm4, %v3426_v21, %v3428_v14  ;;  %v3432_v61 = vsel %vm2563_vm4, %v3428_v14, %v3430_v53 }
 0x753   : > { %v3307_v47 = vpop.permute.xlu1 %3306 }
 0x754   : > { %v3336_v12 = vpop.permute.xlu0 %3335  ;;  %v3312_v32 = vsel %vm1263_vm15, %v3307_v47, %v3309_v18 }
 0x755   : > { %v3316_v42 = vadd.f32 %v3312_v32, %v3291_v40 }
 0x757   : > { %v3311_v23 = vpop.permute.xlu1 %3310 }
 0x758   : > { %v3379_v25 = vpop.permute.xlu0 %3378  ;;  %v3313_v19 = vsel %vm1263_vm15, %v3309_v18, %v3311_v23 }
 0x759   : > { %v3317_v4 = vadd.f32 %v3313_v19, %v3292_v28 }
 0x75b   : > { %v3334_v33 = vpop.permute.xlu1 %3333 }
 0x75c   : > { %v3337_v63 = vsel %vm1550_vm0, %v3332_v2, %v3334_v33  ;;  %v3383_v62 = vpop.permute.xlu0 %3382  ;;  %v3338_v50 = vsel %vm1550_vm0, %v3334_v33, %v3336_v12 }
 0x75d   : > { %v3341_v36 = vadd.f32 %v3337_v63, %v3316_v42  ;;  %v3342_v55 = vadd.f32 %v3338_v50, %v3317_v4 }
 0x75f   : > { %v3381_v3 = vpop.permute.xlu1 %3380  ;;  %v3363_v10 = vadd.f32 %v3359_v6, %v3341_v36  ;;  %v3364_v52 = vadd.f32 %v3360_v39, %v3342_v55 }
 0x760   : > { %v3384_v11 = vsel %vm2015_vm2, %v3379_v25, %v3381_v3  ;;  %v3406_v8 = vpop.permute.xlu0 %3405  ;;  %v3385_v20 = vsel %vm2015_vm2, %v3381_v3, %v3383_v62 }
 0x761   : > { %v3388_v44 = vadd.f32 %v3384_v11, %v3363_v10  ;;  %v3389_v27 = vadd.f32 %v3385_v20, %v3364_v52 }
 0x763   : > { %v3404_v13 = vpop.permute.xlu1 %3403 }
 0x764   : > { %v3409_v37 = vsel %vm2302_vm3, %v3404_v13, %v3406_v8  ;;  %v3453_v48 = vpop.permute.xlu0 %3452 }
 0x765   : > { %v3413_v7 = vadd.f32 %v3409_v37, %v3388_v44 }
 0x767   : > { %v3408_v22 = vpop.permute.xlu1 %3407  ;;  %v3435_v30 = vadd.f32 %v3431_v15, %v3413_v7 }
 0x768   : > { %v3410_v57 = vsel %vm2302_vm3, %v3406_v8, %v3408_v22 }
 0x769   : > { %v3414_v35 = vadd.f32 %v3410_v57, %v3389_v27 }
 0x76b   : > { %v3451_v60 = vpop.permute.xlu1 %3450  ;;  %v3436_v54 = vadd.f32 %v3432_v61, %v3414_v35 }
 0x76c   : > { %v3456_v46 = vsel %vm2767_vm5, %v3451_v60, %v3453_v48 }
 0x76d   : > { %v3460_v43 = vadd.f32 %v3456_v46, %v3435_v30 }
 0x76f   : > { %v3455_v51 = vpop.permute.xlu1 %3454  ;;  %v3468_v59 = vadd.f32 %v6082_v9, %v3460_v43 }
 0x770   : > { %v3457_v29 = vsel %vm2767_vm5, %v3453_v48, %v3455_v51 }
 0x771   : > { %v3461_v49 = vadd.f32 %v3457_v29, %v3436_v54  ;;  %v3470_v31 = vmax.f32 %v3468_v59, 0.0 }
 0x773   : > { %v3469_v56 = vadd.f32 %v6082_v9, %v3461_v49 }
 0x775   : > { %v3471_v5 = vmax.f32 %v3469_v56, 0.0 }
 0x777   : > { %v3474_v16 = vcombine.low %v3470_v31, %v3471_v5 }
 0x779   : > { %3476 = vst [vmem:[%s489_s21] sm:$0xff] %v3474_v16 }
 0x77a PF: > { %s26_s15 = sadd.s32 1, %s3778_s15  }
 0x77b   : > { %p23_p4 = scmp.ge.s32.totalorder %s26_s15, 4  }
 0x77d   :  { %25 = sbr.rel (!%p23_p4) target bundleno = 3 (0x3), region = 110 }

</bundles_post_ra>
